<compile_context>
chip_gen: v5e
topology: v5e:2x2
jax: 0.10.0
libtpu: 0.0.40
codegen_flags: <defaults>
</compile_context>

<pallas_src>
import math

import jax
import jax.numpy as jnp
from jax.experimental import pallas as pl
from jax.experimental.pallas import tpu as pltpu


def _make_kernel(hp, D, neg_penalty, qk_dtype):
    """Per-(batch, head-group) kernel. hp heads per step, inner_dim D."""
    D2 = D // 2

    def kernel(hid_ref, w_ref, b_ref, am_ref, cos_ref, sin_ref, out_ref, rope_ref):
        # hid_ref: (1, Lp, H)   w_ref: (1, H, hp*2D)   b_ref: (1, 1, hp*2D)
        # am_ref:  (1, 1, Lp)   cos/sin: (Lp, D/2)     out: (1, hp, Lp, Lp)
        # rope_ref (scratch):   (Lp, hp*2D)
        h = hid_ref[0]                                   # [Lp, H]
        w = w_ref[0]                                     # [H, hp*2D]
        proj = jnp.dot(h, w, preferred_element_type=jnp.float32) + b_ref[0]

        cos = cos_ref[...]                               # [Lp, D/2]
        sin = sin_ref[...]
        Lp = cos.shape[0]

        # --- masks: computed ONCE per step, fused into a single penalty ------
        pad = jnp.broadcast_to(am_ref[0], (Lp, Lp)).astype(jnp.float32)  # key-axis mask
        ii = jax.lax.broadcasted_iota(jnp.int32, (Lp, Lp), 0)
        jj = jax.lax.broadcasted_iota(jnp.int32, (Lp, Lp), 1)
        tril = (ii > jj).astype(jnp.float32)             # strictly lower triangle
        penalty = (1.0 - pad) * neg_penalty + tril * neg_penalty

        # --- RoPE on every D-wide segment (q and k of every head) ------------
        # Weight columns were permuted to [even dims | odd dims] per segment, so
        # the rotation is a plain complex multiply on contiguous halves (VPU only).
        for seg in range(2 * hp):
            base = seg * D
            lo = proj[:, base: base + D2]                # original even dims
            hi = proj[:, base + D2: base + D]            # original odd dims
            rope_ref[:, base: base + D2] = lo * cos - hi * sin
            rope_ref[:, base + D2: base + D] = hi * cos + lo * sin

        # --- per-head QK^T + masking ------------------------------------------
        for i in range(hp):
            q = rope_ref[:, i * 2 * D: i * 2 * D + D].astype(qk_dtype)        # [Lp, D]
            k = rope_ref[:, i * 2 * D + D: (i + 1) * 2 * D].astype(qk_dtype)  # [Lp, D]
            s = jax.lax.dot_general(q, k, (((1,), (1,)), ((), ())),
                                    preferred_element_type=jnp.float32)       # [Lp, Lp]
            # 1/sqrt(D) already folded into the q weights; penalty pre-scaled.
            out_ref[0, i, :, :] = (s * pad - penalty).astype(out_ref.dtype)

    return kernel


def _arrange_params(w, b, E, D, hp, scale):
    """Permute dense weight columns to per-step slabs with [even|odd] q/k layout
    and fold the 1/sqrt(D) scale into the q columns."""
    H = w.shape[0]
    D2 = D // 2
    seg_perm = jnp.concatenate([jnp.arange(0, D, 2), jnp.arange(1, D, 2)])   # [D]
    cols = []
    for e in range(E):
        cols.append(e * 2 * D + seg_perm)          # q of head e
        cols.append(e * 2 * D + D + seg_perm)      # k of head e
    perm = jnp.concatenate(cols)                   # [E*2D]

    # scale q columns (original layout: first D of every 2D block) by 1/sqrt(D)
    col_scale = jnp.where((jnp.arange(E * 2 * D) % (2 * D)) < D, scale, 1.0)
    w_s = w * col_scale[None, :]
    b_s = b * col_scale

    w_arr = w_s[:, perm]                           # [H, E*2D], rearranged
    b_arr = b_s[perm]

    G = E // hp
    Wg = hp * 2 * D
    w_blk = w_arr.reshape(H, G, Wg).transpose(1, 0, 2)   # [G, H, Wg]
    b_blk = b_arr.reshape(G, 1, Wg)                      # [G, 1, Wg]
    return w_blk, b_blk


def global_pointer_forward(last_hidden_state, attention_mask, w, b,
                           ent_type_size, inner_dim,
                           heads_per_step=None, qk_dtype=jnp.float32):
    """JAX wrapper: weight rearrangement, RoPE tables, padding, pallas_call."""
    B, L, H = last_hidden_state.shape
    E, D = ent_type_size, inner_dim
    assert D % 2 == 0
    hp = heads_per_step if heads_per_step is not None else (2 if E % 2 == 0 else 1)
    assert E % hp == 0
    G = E // hp
    Wg = hp * 2 * D
    D2 = D // 2

    # Pad seq_len to a multiple of 128 for lane-dense logits stores.  Padded key
    # positions are masked by the zero-padded attention mask; padded rows/cols
    # are sliced off at the end.
    Lp = ((L + 127) // 128) * 128

    scale = 1.0 / math.sqrt(D)
    neg = 1e12 * scale   # penalty constant matching the reference post-division

    hid = jnp.zeros((B, Lp, H), jnp.float32).at[:, :L, :].set(
        last_hidden_state.astype(jnp.float32))
    am = jnp.zeros((B, 1, Lp), jnp.float32).at[:, 0, :L].set(
        attention_mask.astype(jnp.float32))

    # RoPE tables in half layout: plain cos/sin(theta_i), shape [Lp, D/2].
    pos = jnp.arange(Lp, dtype=jnp.float32)[:, None]
    freq = jnp.power(10000.0, -2.0 * jnp.arange(D2, dtype=jnp.float32) / D)
    theta = pos * freq[None, :]
    cos_t = jnp.cos(theta)
    sin_t = jnp.sin(theta)

    w_blk, b_blk = _arrange_params(w.astype(jnp.float32), b.astype(jnp.float32),
                                   E, D, hp, scale)

    # VMEM budget from actual block sizes (x2 double-buffering) + intermediates.
    blk_bytes = 4 * (Lp * H + H * Wg + Wg + Lp + 2 * Lp * D2 + hp * Lp * Lp)
    inter_bytes = 4 * (2 * Lp * Wg + 4 * Lp * Lp)
    vmem_limit = int(min(64 * 2 ** 20,
                         max(2 * blk_bytes + inter_bytes + (4 << 20), 32 * 2 ** 20)))

    out = pl.pallas_call(
        _make_kernel(hp, D, neg, qk_dtype),
        out_shape=jax.ShapeDtypeStruct((B, E, Lp, Lp), jnp.float32),
        grid_spec=pltpu.PrefetchScalarGridSpec(
            num_scalar_prefetch=0,
            grid=(B, G),
            in_specs=[
                pl.BlockSpec((1, Lp, H), lambda bi, g: (bi, 0, 0)),   # hidden (resident over g)
                pl.BlockSpec((1, H, Wg), lambda bi, g: (g, 0, 0)),    # weight slab for head group
                pl.BlockSpec((1, 1, Wg), lambda bi, g: (g, 0, 0)),    # bias slab
                pl.BlockSpec((1, 1, Lp), lambda bi, g: (bi, 0, 0)),   # attention mask
                pl.BlockSpec((Lp, D2), lambda bi, g: (0, 0)),         # cos table
                pl.BlockSpec((Lp, D2), lambda bi, g: (0, 0)),         # sin table
            ],
            out_specs=pl.BlockSpec((1, hp, Lp, Lp), lambda bi, g: (bi, g, 0, 0)),
            scratch_shapes=[pltpu.VMEM((Lp, Wg), jnp.float32)],
        ),
        compiler_params=pltpu.CompilerParams(
            dimension_semantics=("parallel", "parallel"),
            vmem_limit_bytes=vmem_limit,
        ),
    )(hid, w_blk, b_blk, am, cos_t, sin_t)

    return out[:, :, :L, :L]


if __name__ == "__main__":
    # Small shapes consistent with the module's forward.
    B, L, H = 2, 8, 32          # batch, seq_len, hidden_size
    E, D = 4, 16                # ent_type_size, inner_dim
    vocab, n_types = 64, 2

    key = jax.random.PRNGKey(0)
    k_ids, k_word, k_type, k_pos, k_dense = jax.random.split(key, 5)

    input_ids = jax.random.randint(k_ids, (B, L), 0, vocab)
    token_type_ids = jnp.zeros((B, L), jnp.int32)
    attention_mask = jnp.array([[1] * L, [1] * (L - 2) + [0] * 2], jnp.int32)

    # TODO(synk): the HuggingFace encoder is replaced by a deterministic
    # embedding-sum stub; a full transformer encoder is out of scope here.
    word_emb = 0.1 * jax.random.normal(k_word, (vocab, H), jnp.float32)
    type_emb = 0.1 * jax.random.normal(k_type, (n_types, H), jnp.float32)
    pos_emb = 0.1 * jax.random.normal(k_pos, (L, H), jnp.float32)
    last_hidden_state = (word_emb[input_ids]
                         + type_emb[token_type_ids]
                         + pos_emb[None, :, :])                      # [B, L, H]

    # Deterministic dense (nn.Linear(hidden_size, ent_type_size*inner_dim*2)) params.
    k_w, k_b = jax.random.split(k_dense)
    dense_w = 0.05 * jax.random.normal(k_w, (H, E * 2 * D), jnp.float32)
    dense_b = 0.05 * jax.random.normal(k_b, (E * 2 * D,), jnp.float32)

    logits = global_pointer_forward(last_hidden_state, attention_mask,
                                    dense_w, dense_b, E, D)
    jax.block_until_ready(logits)
    assert logits.shape == (B, E, L, L)
    print("KERNEL_OK")
</pallas_src>

<mosaic_0001>
module attributes {stable_mosaic.version = 11 : i64} {
  func.func @kernel(%arg0: i32, %arg1: i32, %arg2: memref<1x128x32xf32, #tpu.memory_space<vmem>>, %arg3: memref<1x32x64xf32, #tpu.memory_space<vmem>>, %arg4: memref<1x1x64xf32, #tpu.memory_space<vmem>>, %arg5: memref<1x1x128xf32, #tpu.memory_space<vmem>>, %arg6: memref<128x8xf32, #tpu.memory_space<vmem>>, %arg7: memref<128x8xf32, #tpu.memory_space<vmem>>, %arg8: memref<1x2x128x128xf32, #tpu.memory_space<vmem>>, %arg9: memref<128x64xf32, #tpu.memory_space<vmem>>) attributes {dimension_semantics = [#tpu.dimension_semantics<parallel>, #tpu.dimension_semantics<parallel>], iteration_bounds = array<i64: 2, 2>, scalar_prefetch = 0 : i64, scratch_operands = 1 : i64, tpu.core_type = #tpu.core_type<tc>, window_params = [{transform_indices = @transform_0, window_bounds = array<i64: 1, 128, 32>}, {transform_indices = @transform_1, window_bounds = array<i64: 1, 32, 64>}, {transform_indices = @transform_2, window_bounds = array<i64: 1, 1, 64>}, {transform_indices = @transform_3, window_bounds = array<i64: 1, 1, 128>}, {pipeline_mode = #tpu.pipeline_mode<synchronous>, transform_indices = @transform_4, window_bounds = array<i64: 128, 8>}, {pipeline_mode = #tpu.pipeline_mode<synchronous>, transform_indices = @transform_5, window_bounds = array<i64: 128, 8>}, {transform_indices = @transform_6, window_bounds = array<i64: 1, 2, 128, 128>}]} {
    %c0 = arith.constant 0 : index
    %c0_0 = arith.constant 0 : index
    %c0_1 = arith.constant 0 : index
    %0 = vector.load %arg2[%c0, %c0_0, %c0_1] : memref<1x128x32xf32, #tpu.memory_space<vmem>>, vector<1x128x32xf32>
    %1 = vector.shape_cast %0 : vector<1x128x32xf32> to vector<128x32xf32>
    %c0_2 = arith.constant 0 : index
    %c0_3 = arith.constant 0 : index
    %c0_4 = arith.constant 0 : index
    %2 = vector.load %arg3[%c0_2, %c0_3, %c0_4] : memref<1x32x64xf32, #tpu.memory_space<vmem>>, vector<1x32x64xf32>
    %3 = vector.shape_cast %2 : vector<1x32x64xf32> to vector<32x64xf32>
    %cst = arith.constant dense<0.000000e+00> : vector<128x64xf32>
    %4 = tpu.matmul %1, %3, %cst {dimension_numbers = #tpu.dot_dimension_numbers<[1], [0], [0], [1], [0, 0, 1, 1], [], []>} : vector<128x32xf32>, vector<32x64xf32>, vector<128x64xf32> -> vector<128x64xf32>
    %c0_5 = arith.constant 0 : index
    %c0_6 = arith.constant 0 : index
    %c0_7 = arith.constant 0 : index
    %5 = vector.load %arg4[%c0_5, %c0_6, %c0_7] : memref<1x1x64xf32, #tpu.memory_space<vmem>>, vector<1x1x64xf32>
    %6 = vector.shape_cast %5 : vector<1x1x64xf32> to vector<1x64xf32>
    %7 = vector.broadcast %6 : vector<1x64xf32> to vector<128x64xf32>
    %8 = arith.addf %4, %7 : vector<128x64xf32>
    %c0_8 = arith.constant 0 : index
    %c0_9 = arith.constant 0 : index
    %9 = vector.load %arg6[%c0_8, %c0_9] : memref<128x8xf32, #tpu.memory_space<vmem>>, vector<128x8xf32>
    %c0_10 = arith.constant 0 : index
    %c0_11 = arith.constant 0 : index
    %10 = vector.load %arg7[%c0_10, %c0_11] : memref<128x8xf32, #tpu.memory_space<vmem>>, vector<128x8xf32>
    %c0_12 = arith.constant 0 : index
    %c0_13 = arith.constant 0 : index
    %c0_14 = arith.constant 0 : index
    %11 = vector.load %arg5[%c0_12, %c0_13, %c0_14] : memref<1x1x128xf32, #tpu.memory_space<vmem>>, vector<1x1x128xf32>
    %12 = vector.shape_cast %11 : vector<1x1x128xf32> to vector<1x128xf32>
    %13 = vector.shape_cast %12 : vector<1x128xf32> to vector<1x128xf32>
    %14 = vector.broadcast %13 : vector<1x128xf32> to vector<128x128xf32>
    %15 = tpu.iota {dimensions = array<i32: 0>} : vector<128x128xi32>
    %16 = tpu.iota {dimensions = array<i32: 1>} : vector<128x128xi32>
    %17 = arith.cmpi sgt, %15, %16 : vector<128x128xi32>
    %18 = arith.extui %17 : vector<128x128xi1> to vector<128x128xi32>
    %19 = arith.sitofp %18 : vector<128x128xi32> to vector<128x128xf32>
    %cst_15 = arith.constant 1.000000e+00 : f32
    %20 = vector.broadcast %cst_15 : f32 to vector<128x128xf32>
    %21 = arith.subf %20, %14 : vector<128x128xf32>
    %cst_16 = arith.constant 2.500000e+11 : f32
    %22 = vector.broadcast %cst_16 : f32 to vector<128x128xf32>
    %23 = arith.mulf %21, %22 : vector<128x128xf32>
    %cst_17 = arith.constant 2.500000e+11 : f32
    %24 = vector.broadcast %cst_17 : f32 to vector<128x128xf32>
    %25 = arith.mulf %19, %24 : vector<128x128xf32>
    %26 = arith.addf %23, %25 : vector<128x128xf32>
    %27 = vector.extract_strided_slice %8 {offsets = [0, 0], sizes = [128, 8], strides = [1, 1]} : vector<128x64xf32> to vector<128x8xf32>
    %28 = vector.extract_strided_slice %8 {offsets = [0, 8], sizes = [128, 8], strides = [1, 1]} : vector<128x64xf32> to vector<128x8xf32>
    %29 = arith.mulf %27, %9 : vector<128x8xf32>
    %30 = arith.mulf %28, %10 : vector<128x8xf32>
    %31 = arith.subf %29, %30 : vector<128x8xf32>
    %c0_18 = arith.constant 0 : index
    %c0_19 = arith.constant 0 : index
    %32 = vector.load %arg9[%c0_18, %c0_19] : memref<128x64xf32, #tpu.memory_space<vmem>>, vector<128x8xf32>
    tpu.vector_store %arg9[%c0_18, %c0_19], %31 {strides = array<i32>} : memref<128x64xf32, #tpu.memory_space<vmem>>, vector<128x8xf32>,
    %33 = arith.mulf %28, %9 : vector<128x8xf32>
    %34 = arith.mulf %27, %10 : vector<128x8xf32>
    %35 = arith.addf %33, %34 : vector<128x8xf32>
    %c0_20 = arith.constant 0 : index
    %c8 = arith.constant 8 : index
    %36 = vector.load %arg9[%c0_20, %c8] : memref<128x64xf32, #tpu.memory_space<vmem>>, vector<128x8xf32>
    tpu.vector_store %arg9[%c0_20, %c8], %35 {strides = array<i32>} : memref<128x64xf32, #tpu.memory_space<vmem>>, vector<128x8xf32>,
    %37 = vector.extract_strided_slice %8 {offsets = [0, 16], sizes = [128, 8], strides = [1, 1]} : vector<128x64xf32> to vector<128x8xf32>
    %38 = vector.extract_strided_slice %8 {offsets = [0, 24], sizes = [128, 8], strides = [1, 1]} : vector<128x64xf32> to vector<128x8xf32>
    %39 = arith.mulf %37, %9 : vector<128x8xf32>
    %40 = arith.mulf %38, %10 : vector<128x8xf32>
    %41 = arith.subf %39, %40 : vector<128x8xf32>
    %c0_21 = arith.constant 0 : index
    %c16 = arith.constant 16 : index
    %42 = vector.load %arg9[%c0_21, %c16] : memref<128x64xf32, #tpu.memory_space<vmem>>, vector<128x8xf32>
    tpu.vector_store %arg9[%c0_21, %c16], %41 {strides = array<i32>} : memref<128x64xf32, #tpu.memory_space<vmem>>, vector<128x8xf32>,
    %43 = arith.mulf %38, %9 : vector<128x8xf32>
    %44 = arith.mulf %37, %10 : vector<128x8xf32>
    %45 = arith.addf %43, %44 : vector<128x8xf32>
    %c0_22 = arith.constant 0 : index
    %c24 = arith.constant 24 : index
    %46 = vector.load %arg9[%c0_22, %c24] : memref<128x64xf32, #tpu.memory_space<vmem>>, vector<128x8xf32>
    tpu.vector_store %arg9[%c0_22, %c24], %45 {strides = array<i32>} : memref<128x64xf32, #tpu.memory_space<vmem>>, vector<128x8xf32>,
    %47 = vector.extract_strided_slice %8 {offsets = [0, 32], sizes = [128, 8], strides = [1, 1]} : vector<128x64xf32> to vector<128x8xf32>
    %48 = vector.extract_strided_slice %8 {offsets = [0, 40], sizes = [128, 8], strides = [1, 1]} : vector<128x64xf32> to vector<128x8xf32>
    %49 = arith.mulf %47, %9 : vector<128x8xf32>
    %50 = arith.mulf %48, %10 : vector<128x8xf32>
    %51 = arith.subf %49, %50 : vector<128x8xf32>
    %c0_23 = arith.constant 0 : index
    %c32 = arith.constant 32 : index
    %52 = vector.load %arg9[%c0_23, %c32] : memref<128x64xf32, #tpu.memory_space<vmem>>, vector<128x8xf32>
    tpu.vector_store %arg9[%c0_23, %c32], %51 {strides = array<i32>} : memref<128x64xf32, #tpu.memory_space<vmem>>, vector<128x8xf32>,
    %53 = arith.mulf %48, %9 : vector<128x8xf32>
    %54 = arith.mulf %47, %10 : vector<128x8xf32>
    %55 = arith.addf %53, %54 : vector<128x8xf32>
    %c0_24 = arith.constant 0 : index
    %c40 = arith.constant 40 : index
    %56 = vector.load %arg9[%c0_24, %c40] : memref<128x64xf32, #tpu.memory_space<vmem>>, vector<128x8xf32>
    tpu.vector_store %arg9[%c0_24, %c40], %55 {strides = array<i32>} : memref<128x64xf32, #tpu.memory_space<vmem>>, vector<128x8xf32>,
    %57 = vector.extract_strided_slice %8 {offsets = [0, 48], sizes = [128, 8], strides = [1, 1]} : vector<128x64xf32> to vector<128x8xf32>
    %58 = vector.extract_strided_slice %8 {offsets = [0, 56], sizes = [128, 8], strides = [1, 1]} : vector<128x64xf32> to vector<128x8xf32>
    %59 = arith.mulf %57, %9 : vector<128x8xf32>
    %60 = arith.mulf %58, %10 : vector<128x8xf32>
    %61 = arith.subf %59, %60 : vector<128x8xf32>
    %c0_25 = arith.constant 0 : index
    %c48 = arith.constant 48 : index
    %62 = vector.load %arg9[%c0_25, %c48] : memref<128x64xf32, #tpu.memory_space<vmem>>, vector<128x8xf32>
    tpu.vector_store %arg9[%c0_25, %c48], %61 {strides = array<i32>} : memref<128x64xf32, #tpu.memory_space<vmem>>, vector<128x8xf32>,
    %63 = arith.mulf %58, %9 : vector<128x8xf32>
    %64 = arith.mulf %57, %10 : vector<128x8xf32>
    %65 = arith.addf %63, %64 : vector<128x8xf32>
    %c0_26 = arith.constant 0 : index
    %c56 = arith.constant 56 : index
    %66 = vector.load %arg9[%c0_26, %c56] : memref<128x64xf32, #tpu.memory_space<vmem>>, vector<128x8xf32>
    tpu.vector_store %arg9[%c0_26, %c56], %65 {strides = array<i32>} : memref<128x64xf32, #tpu.memory_space<vmem>>, vector<128x8xf32>,
    %c0_27 = arith.constant 0 : index
    %c0_28 = arith.constant 0 : index
    %67 = vector.load %arg9[%c0_27, %c0_28] : memref<128x64xf32, #tpu.memory_space<vmem>>, vector<128x16xf32>
    %c0_29 = arith.constant 0 : index
    %c16_30 = arith.constant 16 : index
    %68 = vector.load %arg9[%c0_29, %c16_30] : memref<128x64xf32, #tpu.memory_space<vmem>>, vector<128x16xf32>
    %cst_31 = arith.constant dense<0.000000e+00> : vector<128x128xf32>
    %69 = tpu.matmul %67, %68, %cst_31 {dimension_numbers = #tpu.dot_dimension_numbers<[1], [1], [0], [0], [0, 0, 1, 0], [], []>} : vector<128x16xf32>, vector<128x16xf32>, vector<128x128xf32> -> vector<128x128xf32>
    %70 = arith.mulf %69, %14 : vector<128x128xf32>
    %71 = arith.subf %70, %26 : vector<128x128xf32>
    %c0_32 = arith.constant 0 : index
    %c0_33 = arith.constant 0 : index
    %c0_34 = arith.constant 0 : index
    %c0_35 = arith.constant 0 : index
    %72 = vector.load %arg8[%c0_32, %c0_33, %c0_34, %c0_35] : memref<1x2x128x128xf32, #tpu.memory_space<vmem>>, vector<1x1x128x128xf32>
    %73 = vector.shape_cast %72 : vector<1x1x128x128xf32> to vector<128x128xf32>
    %74 = vector.shape_cast %71 : vector<128x128xf32> to vector<1x1x128x128xf32>
    tpu.vector_store %arg8[%c0_32, %c0_33, %c0_34, %c0_35], %74 {strides = array<i32>} : memref<1x2x128x128xf32, #tpu.memory_space<vmem>>, vector<1x1x128x128xf32>,
    %c0_36 = arith.constant 0 : index
    %c32_37 = arith.constant 32 : index
    %75 = vector.load %arg9[%c0_36, %c32_37] : memref<128x64xf32, #tpu.memory_space<vmem>>, vector<128x16xf32>
    %c0_38 = arith.constant 0 : index
    %c48_39 = arith.constant 48 : index
    %76 = vector.load %arg9[%c0_38, %c48_39] : memref<128x64xf32, #tpu.memory_space<vmem>>, vector<128x16xf32>
    %cst_40 = arith.constant dense<0.000000e+00> : vector<128x128xf32>
    %77 = tpu.matmul %75, %76, %cst_40 {dimension_numbers = #tpu.dot_dimension_numbers<[1], [1], [0], [0], [0, 0, 1, 0], [], []>} : vector<128x16xf32>, vector<128x16xf32>, vector<128x128xf32> -> vector<128x128xf32>
    %78 = arith.mulf %77, %14 : vector<128x128xf32>
    %79 = arith.subf %78, %26 : vector<128x128xf32>
    %c0_41 = arith.constant 0 : index
    %c1 = arith.constant 1 : index
    %c0_42 = arith.constant 0 : index
    %c0_43 = arith.constant 0 : index
    %80 = vector.load %arg8[%c0_41, %c1, %c0_42, %c0_43] : memref<1x2x128x128xf32, #tpu.memory_space<vmem>>, vector<1x1x128x128xf32>
    %81 = vector.shape_cast %80 : vector<1x1x128x128xf32> to vector<128x128xf32>
    %82 = vector.shape_cast %79 : vector<128x128xf32> to vector<1x1x128x128xf32>
    tpu.vector_store %arg8[%c0_41, %c1, %c0_42, %c0_43], %82 {strides = array<i32>} : memref<1x2x128x128xf32, #tpu.memory_space<vmem>>, vector<1x1x128x128xf32>,
    return
  }
  func.func @transform_0(%arg0: i32, %arg1: i32) -> (i32, i32, i32) {
    %c0_i32 = arith.constant 0 : i32
    %c0_i32_0 = arith.constant 0 : i32
    %c0_i32_1 = arith.constant 0 : i32
    return %arg0, %c0_i32, %c0_i32_0 : i32, i32, i32
  }
  func.func @transform_1(%arg0: i32, %arg1: i32) -> (i32, i32, i32) {
    %c0_i32 = arith.constant 0 : i32
    %c0_i32_0 = arith.constant 0 : i32
    %c0_i32_1 = arith.constant 0 : i32
    return %arg1, %c0_i32, %c0_i32_0 : i32, i32, i32
  }
  func.func @transform_2(%arg0: i32, %arg1: i32) -> (i32, i32, i32) {
    %c0_i32 = arith.constant 0 : i32
    %c0_i32_0 = arith.constant 0 : i32
    %c0_i32_1 = arith.constant 0 : i32
    return %arg1, %c0_i32, %c0_i32_0 : i32, i32, i32
  }
  func.func @transform_3(%arg0: i32, %arg1: i32) -> (i32, i32, i32) {
    %c0_i32 = arith.constant 0 : i32
    %c0_i32_0 = arith.constant 0 : i32
    %c0_i32_1 = arith.constant 0 : i32
    return %arg0, %c0_i32, %c0_i32_0 : i32, i32, i32
  }
  func.func @transform_4(%arg0: i32, %arg1: i32) -> (i32, i32) {
    %c0_i32 = arith.constant 0 : i32
    %c0_i32_0 = arith.constant 0 : i32
    %c0_i32_1 = arith.constant 0 : i32
    return %c0_i32, %c0_i32_0 : i32, i32
  }
  func.func @transform_5(%arg0: i32, %arg1: i32) -> (i32, i32) {
    %c0_i32 = arith.constant 0 : i32
    %c0_i32_0 = arith.constant 0 : i32
    %c0_i32_1 = arith.constant 0 : i32
    return %c0_i32, %c0_i32_0 : i32, i32
  }
  func.func @transform_6(%arg0: i32, %arg1: i32) -> (i32, i32, i32, i32) {
    %c0_i32 = arith.constant 0 : i32
    %c0_i32_0 = arith.constant 0 : i32
    %c0_i32_1 = arith.constant 0 : i32
    return %arg0, %arg1, %c0_i32, %c0_i32_0 : i32, i32, i32, i32
  }
}

</mosaic_0001>

<bundles_post_ra>
// kernel: tpu_custom_call.1
= control target key start
LH: loop header
LB: loop body
LE: loop exit
PB: predicated region body
PF: predicated region fallthrough
CT: control target
= control target key end

     0   :  { %11 = vsyncpa [#allocation4], 0  ;;  %s5843_s0 = inlined_call_operand.vmem [shape: f32[2,128,32], index: 0, kind: input, shape index: {}]   ;;  %s5844_s1 = inlined_call_operand.vmem [shape: f32[2,32,64], index: 1, kind: input, shape index: {}]   ;;  %s5845_s2 = inlined_call_operand.vmem [shape: f32[2,1,64], index: 2, kind: input, shape index: {}]   ;;  %s5846_s3 = inlined_call_operand.vmem [shape: f32[2,1,128], index: 3, kind: input, shape index: {}]   ;;  %s5847_s4 = inlined_call_operand.vmem [shape: f32[128,8], index: 4, kind: input, shape index: {}]   ;;  %s5848_s5 = inlined_call_operand.vmem [shape: f32[128,8], index: 5, kind: input, shape index: {}]   ;;  %s5849_s6 = inlined_call_operand.hbm [shape: f32[2,4,128,128], index: 6, kind: output, shape index: {}]  }
   0x1   :  { %13 = vsyncpa [#allocation4 + $0x1], 0  ;;  %s3416_s21 = smov 0   ;;  %s3418_s22 = smov 0  }
   0x2   :  { %s3420_s23 = smov 0   ;;  %s3422_s24 = smov 0  }
   0x3   :  { %s3424_s25 = smov 0   ;;  %s3426_s26 = smov 0  }
   0x4   :  { %s3428_s27 = smov 0   ;;  %s3430_s28 = smov 0  }
   0x5 LB: > { %5898 = sst [smem:[#allocation6_spill]] %s3358_s26  ;;  %s2965_s29 = sadd.s32 4294967295, %s3366_s28   ;;  %s3366_s28 = sphi %s3430_s28, %s19_s28   ;;  %s3362_s27 = sphi %s3428_s27, %s6022_s27   ;;  %s3358_s26 = sphi %s3426_s26, %s6021_s26   ;;  %s3354_s25 = sphi %s3424_s25, %s6020_s25   ;;  %s3350_s24 = sphi %s3422_s24, %s6019_s24   ;;  %s3346_s23 = sphi %s3420_s23, %s6025_s23   ;;  %s3342_s22 = sphi %s3418_s22, %s6024_s22   ;;  %s3338_s21 = sphi %s3416_s21, %s6023_s21  }
   0x6   : > { %5899 = sst [smem:[#allocation7_spill]] %s3362_s27  ;;  %s2966_s30 = sadd.s32 4294967294, %s3366_s28  }
   0x7   : > { %s28_s7 = sadd.s32 1, %s3358_s26  ;;  %s31_s8 = sadd.s32 1, %s3362_s27 }
   0x8   : > { %p29_p0 = scmp.ge.s32.totalorder %s28_s7, 2  ;;  %p196_p1 = scmp.ne.s32.totalorder %s3346_s23, %s3342_s22 }
   0x9   : > { %p197_p2 = scmp.eq.s32.totalorder %s2965_s29, 3  ;;  %p202_p5 = scmp.ne.s32.totalorder %s3342_s22, %s3338_s21 }
   0xa   : > { %s6027_s7 = smov (%p29_p0, %s28_s7), 0  ;;  %s6029_s8 = smov (!%p29_p0, %s31_s8), %s3362_s27 }
   0xb   : > { %5900 = sst [smem:[#allocation8_spill]] %s6027_s7  ;;  %s182_s9 = ssub.s32 %s3358_s26, %s6027_s7 }
   0xc   : > { %p3467_p3 = por %p197_p2, %p196_p1  ;;  %p33_p4 = scmp.ge.s32.totalorder %s6029_s8, 2 }
   0xd   : > { %p203_p6 = scmp.eq.s32.totalorder %s2966_s30, 3  ;;  %p2969_p7 = scmp.ge.s32.totalorder %s3366_s28, 1 }
   0xe   : > { %s6031_s8 = smov (%p33_p4, %s6029_s8), 0  ;;  %p255_p9 = scmp.lt.s32.totalorder %s3366_s28, 5 }
   0xf   : > { %5902 = sst [smem:[#allocation9_spill]] %s6031_s8  ;;  %p3476_p8 = por %p203_p6, %p202_p5 }
  0x10   : > { %s181_s12 = ssub.s32 %s3362_s27, %s6031_s8  ;;  %s186_s13 = sadd.s32 1, %s3346_s23 }
  0x11   : > { %s183_s14 = sor.u32 %s182_s9, %s181_s12  ;;  %p256_p10 = pnand %p2969_p7, %p255_p9 }
  0x12   : > { %p184_p11 = scmp.eq.s32.totalorder %s183_s14, 0 }
  0x13   : > { %259 = sbr.rel (%p256_p10) target bundleno = 1711 (0x6af), region = 44 }
  0x14   : > { %s3485_s15 = scalar_select %p184_p11, %s3346_s23, %s186_s13  }
  0x16   : > { %5904 = sst [smem:[#allocation10_spill]] %s3485_s15 }
  0x18   : > { %v3490_v0 = vld [vmem:[%s5848_s5 + $0x20] sm:$0xff]  ;;  %v3495_v1 = vld [vmem:[%s5848_s5 + $0x10] sm:$0xff]  ;;  %p301_p12 = scmp.lt.s32.totalorder %s3350_s24, 1  ;;  %s5850_s30 = smov 8   ;;  %v3527_v4 = vld [vmem:[%s5848_s5 + $0x28] sm:$0xff]  ;;  %vm337_vm0 = vcmask 261120  }
  0x19   : > { %5905 = vst [vmem:[#allocation11_spill] sm:$0xff] %v3490_v0  ;;  %v3500_v2 = vld [vmem:[%s5848_s5] sm:$0xff]  ;;  %628 = vrot.lane.b32.xlu2 %v3490_v0, %s5850_s30  ;;  %624 = vrot.lane.b32.xlu1 %v3495_v1, %s5850_s30  ;;  %p296_p13 = scmp.lt.s32.totalorder %s3354_s25, 1  ;;  %v3532_v5 = vld [vmem:[%s5848_s5 + $0x18] sm:$0xff]  ;;  %s3369_s19 = smov 16   ;;  %vm764_vm1 = vcmask 64512  }
  0x1a   : > { %5906 = vst [vmem:[#allocation12_spill] sm:$0xff] %v3495_v1  ;;  %620 = vrot.lane.b32.xlu0 %v3500_v2, %s5850_s30  ;;  %s3511_s9 = scalar_select %p301_p12, %s3350_s24, 1  ;;  %v3542_v6 = vld [vmem:[%s5848_s5 + $0x8] sm:$0xff]  ;;  %v3559_v11 = vld [vmem:[%s5848_s5 + $0x40] sm:$0xff]  ;;  %v3564_v12 = vld [vmem:[%s5848_s5 + $0x38] sm:$0xff]  ;;  %vm957_vm2 = vcmask 130112  }
  0x1b   : > { %5907 = vst [vmem:[#allocation13_spill] sm:$0xff] %v3500_v2  ;;  %s3514_s12 = scalar_select %p296_p13, %s3354_s25, 1  ;;  %v3570_v13 = vld [vmem:[%s5848_s5 + $0x30] sm:$0xff]  ;;  %v3582_v15 = vld [vmem:[%s5848_s5 + $0x58] sm:$0xff]  ;;  %v3593_v17 = vld [vmem:[%s5848_s5 + $0x48] sm:$0xff]  ;;  %vm1182_vm3 = vcmask 195712  }
  0x1c   : > { %s3095_s13 = sshll.u32 %s3511_s9, 5  ;;  %s308_s17 = scalar_lea.vmem %s5845_s2, %s3511_s9  ;;  %5908 = vst [vmem:[#allocation14_spill] sm:$0xff] %v3527_v4  ;;  %v3587_v16 = vld [vmem:[%s5848_s5 + $0x50] sm:$0xff]  ;;  %v3610_v20 = vld [vmem:[%s5848_s5 + $0x68] sm:$0xff]  ;;  %v3616_v21 = vld [vmem:[%s5848_s5 + $0x60] sm:$0xff]  ;;  %vm1407_vm4 = vcmask 261312  }
  0x1d   : > { %s305_s20 = scalar_lea.vmem %s5844_s1, %s3095_s13  ;;  %5909 = vst [vmem:[#allocation15_spill] sm:$0xff] %v3532_v5  ;;  %s3094_s27 = sshll.u32 %s3514_s12, 7  ;;  %v3605_v19 = vld [vmem:[%s5848_s5 + $0x70] sm:$0xff]  ;;  %v3633_v24 = vld [vmem:[%s5847_s4] sm:$0xff]  ;;  %v3639_v25 = vld [vmem:[%s5848_s5 + $0x78] sm:$0xff]  ;;  %vm1632_vm5 = vcmask 326912  }
  0x1e   : > { %v332_v3 = vld [vmem:[%s305_s20 + $0x18] sm:$0xff]  ;;  %s311_s14 = scalar_lea.vmem %s5846_s3, %s3514_s12  ;;  %5910 = vst [vmem:[#allocation16_spill] sm:$0xff] %v3542_v6  ;;  %v331_v7 = vld [vmem:[%s305_s20 + $0x10] sm:$0xff]  ;;  %s5911_s30 = smov 8   ;;  %v330_v8 = vld [vmem:[%s305_s20 + $0x8] sm:$0xff]  ;;  %vm1857_vm6 = vcmask 392512  }
  0x1f   : > { %398 = vmatpush.msra.mxu0 %v332_v3  ;;  %s3551_s13 = scalar_lea.vmem %s5843_s0, %s3094_s27  ;;  %v329_v9 = vld [vmem:[%s305_s20] sm:$0xff]  ;;  %5912 = vst [vmem:[#allocation17_spill] sm:$0xff] %v3559_v11  ;;  %v3628_v23 = vld [vmem:[%s5847_s4 + $0x10] sm:$0xff]  ;;  %v3651_v27 = vld [vmem:[%s5847_s4 + $0x28] sm:$0xff]  ;;  %s3370_s27 = smov 24   ;;  %vm2082_vm7 = vcmask 458112  }
  0x20   : > { %v313_v10 = vld [vmem:[%s3551_s13] sm:$0xff]  ;;  %5913 = vst [vmem:[#allocation18_spill] sm:$0xff] %v3564_v12  ;;  %v314_v14 = vld [vmem:[%s3551_s13 + $0x8] sm:$0xff]  ;;  %v315_v18 = vld [vmem:[%s3551_s13 + $0x10] sm:$0xff]  ;;  %s3371_s9 = smov 120   ;;  %s3372_s20 = smov 32  }
  0x21   : > { %630 = vrot.lane.b32.xlu2 %v3527_v4, %s5911_s30  ;;  %626 = vrot.lane.b32.xlu1 %v3532_v5, %s5911_s30  ;;  %5914 = vst [vmem:[#allocation19_spill] sm:$0xff] %v3570_v13  ;;  %v316_v22 = vld [vmem:[%s3551_s13 + $0x18] sm:$0xff]  ;;  %v317_v26 = vld [vmem:[%s3551_s13 + $0x20] sm:$0xff]  ;;  %vm2307_vm8 = vcmask 523712   ;;  %s3377_s29 = smov 112   ;;  %vm2388_vm9 = vcmask 130048  }
  0x22   : > { %622 = vrot.lane.b32.xlu0 %v3542_v6, %s5911_s30  ;;  %399 = vmatpush.msra.mxu0 %v331_v7  ;;  %5915 = vst [vmem:[#allocation20_spill] sm:$0xff] %v3582_v15  ;;  %v3656_v28 = vld [vmem:[%s5847_s4 + $0x18] sm:$0xff]  ;;  %v3662_v29 = vld [vmem:[%s5847_s4 + $0x8] sm:$0xff]  ;;  %v3674_v31 = vld [vmem:[%s5847_s4 + $0x40] sm:$0xff]  ;;  %s293_s12 = sand.u32 1, %s3342_s22   ;;  %s3096_s18 = sshll.u32 %s3350_s24, 5 }
  0x23   : > { %5916 = vst [vmem:[#allocation21_spill] sm:$0xff] %v3587_v16  ;;  %v318_v30 = vld [vmem:[%s3551_s13 + $0x28] sm:$0xff]  ;;  %v3679_v32 = vld [vmem:[%s5847_s4 + $0x30] sm:$0xff]  ;;  %v3685_v33 = vld [vmem:[%s5847_s4 + $0x20] sm:$0xff]  ;;  %s3090_s7 = sshll.u32 %s3354_s25, 6  ;;  %s2841_s16 = scalar_lea.sflag [#allocation4], %s293_s12 }
  0x24   : > { %400 = vmatpush.msra.mxu0 %v330_v8  ;;  %5917 = vst [vmem:[#allocation22_spill] sm:$0xff] %v3593_v17  ;;  %v319_v34 = vld [vmem:[%s3551_s13 + $0x30] sm:$0xff]  ;;  %v3697_v35 = vld [vmem:[%s5847_s4 + $0x58] sm:$0xff]  ;;  %v3702_v36 = vld [vmem:[%s5847_s4 + $0x48] sm:$0xff]  ;;  %s2853_s8 = sadd.s32 %s3096_s18, %s3090_s7 }
  0x25   : > { %5918 = vst [vmem:[#allocation23_spill] sm:$0xff] %v3616_v21  ;;  %v3708_v37 = vld [vmem:[%s5847_s4 + $0x38] sm:$0xff]  ;;  %v3720_v39 = vld [vmem:[%s5847_s4 + $0x70] sm:$0xff]  ;;  %v3725_v40 = vld [vmem:[%s5847_s4 + $0x60] sm:$0xff]  ;;  %s3091_s24 = sshll.u32 %s2853_s8, 3 }
  0x26   : > { %401 = vmatpush.msra.mxu0 %v329_v9  ;;  %v320_v38 = vld [vmem:[%s3551_s13 + $0x38] sm:$0xff]  ;;  %5919 = vst [vmem:[#allocation24_spill] sm:$0xff] %v3725_v40  ;;  %v3731_v41 = vld [vmem:[%s5847_s4 + $0x50] sm:$0xff]  ;;  %v321_v42 = vld [vmem:[%s3551_s13 + $0x40] sm:$0xff]  ;;  %s2855_s15 = scalar_lea.hbm %s5849_s6, %s3091_s24 }
  0x27   : > { %2975 = vmatmul.msk.f32.vlgmr.msra.gmra.mxu0 %vm337_vm0, %v313_v10  ;;  %v3743_v43 = vld [vmem:[%s5847_s4 + $0x78] sm:$0xff]  ;;  %v3749_v44 = vld [vmem:[%s5847_s4 + $0x68] sm:$0xff]  ;;  %v323_v47 = vld [vmem:[%s3551_s13 + $0x50] sm:$0xff] }
  0x28   : > { %5920 = vst [vmem:[#allocation25_spill] sm:$0xff] %v3743_v43  ;;  %v322_v45 = vld [vmem:[%s3551_s13 + $0x48] sm:$0xff]  ;;  %v324_v49 = vld [vmem:[%s3551_s13 + $0x58] sm:$0xff]  ;;  %v325_v51 = vld [vmem:[%s3551_s13 + $0x60] sm:$0xff] }
  0x29   : > { %636 = vrot.lane.b32.xlu2 %v3559_v11, %s5911_s30  ;;  %634 = vrot.lane.b32.xlu1 %v3564_v12, %s5911_s30  ;;  %v326_v55 = vld [vmem:[%s3551_s13 + $0x68] sm:$0xff]  ;;  %v327_v59 = vld [vmem:[%s3551_s13 + $0x70] sm:$0xff] }
  0x2a   : > { %632 = vrot.lane.b32.xlu0 %v3570_v13, %s5911_s30  ;;  %v328_v63 = vld [vmem:[%s3551_s13 + $0x78] sm:$0xff]  ;;  %v3828_v3 = vld [vmem:[%s308_s17] ss:$0 sm:$0xff] }
  0x2f   : > { %2976 = vmatmul.msk.f32.gmra.mxu0 %vm337_vm0, %v314_v14 }
  0x31   : > { %642 = vrot.lane.b32.xlu2 %v3582_v15, %s5911_s30  ;;  %640 = vrot.lane.b32.xlu1 %v3587_v16, %s5911_s30 }
  0x32   : > { %638 = vrot.lane.b32.xlu0 %v3593_v17, %s5911_s30 }
  0x37   : > { %2977 = vmatmul.msk.f32.gmra.mxu0 %vm337_vm0, %v315_v18 }
  0x39   : > { %648 = vrot.lane.b32.xlu2 %v3605_v19, %s5911_s30  ;;  %646 = vrot.lane.b32.xlu1 %v3610_v20, %s5911_s30 }
  0x3a   : > { %644 = vrot.lane.b32.xlu0 %v3616_v21, %s5911_s30 }
  0x3f   : > { %2978 = vmatmul.msk.f32.gmra.mxu0 %vm337_vm0, %v316_v22 }
  0x41   : > { %801 = vrot.lane.b32.xlu1 %v3628_v23, %s5911_s30  ;;  %797 = vrot.lane.b32.xlu2 %v3633_v24, %s5911_s30 }
  0x42   : > { %650 = vrot.lane.b32.xlu0 %v3639_v25, %s5911_s30 }
  0x47   : > { %2979 = vmatmul.msk.f32.gmra.mxu0 %vm337_vm0, %v317_v26 }
  0x49   : > { %807 = vrot.lane.b32.xlu1 %v3651_v27, %s5911_s30  ;;  %803 = vrot.lane.b32.xlu2 %v3656_v28, %s5911_s30 }
  0x4a   : > { %799 = vrot.lane.b32.xlu0 %v3662_v29, %s5911_s30 }
  0x4f   : > { %2980 = vmatmul.msk.f32.gmra.mxu0 %vm337_vm0, %v318_v30 }
  0x51   : > { %813 = vrot.lane.b32.xlu1 %v3674_v31, %s5911_s30  ;;  %809 = vrot.lane.b32.xlu2 %v3679_v32, %s5911_s30 }
  0x52   : > { %805 = vrot.lane.b32.xlu0 %v3685_v33, %s5911_s30 }
  0x57   : > { %2981 = vmatmul.msk.f32.gmra.mxu0 %vm337_vm0, %v319_v34 }
  0x59   : > { %819 = vrot.lane.b32.xlu1 %v3697_v35, %s5911_s30  ;;  %815 = vrot.lane.b32.xlu2 %v3702_v36, %s5911_s30 }
  0x5a   : > { %811 = vrot.lane.b32.xlu0 %v3708_v37, %s5911_s30 }
  0x5f   : > { %2982 = vmatmul.msk.f32.gmra.mxu0 %vm337_vm0, %v320_v38 }
  0x61   : > { %825 = vrot.lane.b32.xlu1 %v3720_v39, %s5911_s30  ;;  %821 = vrot.lane.b32.xlu2 %v3725_v40, %s5911_s30 }
  0x62   : > { %817 = vrot.lane.b32.xlu0 %v3731_v41, %s5911_s30 }
  0x67   : > { %2983 = vmatmul.msk.f32.gmra.mxu0 %vm337_vm0, %v321_v42 }
  0x69   : > { %974 = vrot.lane.b32.xlu1 %v3633_v24, %s3369_s19  ;;  %827 = vrot.lane.b32.xlu2 %v3743_v43, %s5911_s30 }
  0x6a   : > { %823 = vrot.lane.b32.xlu0 %v3749_v44, %s5911_s30 }
  0x6f   : > { %2984 = vmatmul.msk.f32.gmra.mxu0 %vm337_vm0, %v322_v45 }
  0x71   : > { %980 = vrot.lane.b32.xlu1 %v3656_v28, %s3369_s19  ;;  %976 = vrot.lane.b32.xlu2 %v3662_v29, %s3369_s19 }
  0x72   : > { %978 = vrot.lane.b32.xlu0 %v3628_v23, %s3369_s19 }
  0x73   : > { %v3765_v46 = vpop.permute.xlu2 %628 }
  0x77   : > { %2985 = vmatmul.msk.f32.gmra.mxu0 %vm337_vm0, %v323_v47 }
  0x79   : > { %986 = vrot.lane.b32.xlu1 %v3679_v32, %s3369_s19  ;;  %982 = vrot.lane.b32.xlu2 %v3685_v33, %s3369_s19 }
  0x7a   : > { %984 = vrot.lane.b32.xlu0 %v3651_v27, %s3369_s19 }
  0x7b   : > { %v3775_v48 = vpop.permute.xlu2 %630 }
  0x7f   : > { %2986 = vmatmul.msk.f32.gmra.mxu0 %vm337_vm0, %v324_v49 }
  0x81   : > { %992 = vrot.lane.b32.xlu1 %v3702_v36, %s3369_s19  ;;  %988 = vrot.lane.b32.xlu2 %v3708_v37, %s3369_s19 }
  0x82   : > { %990 = vrot.lane.b32.xlu0 %v3674_v31, %s3369_s19 }
  0x83   : > { %v3785_v50 = vpop.permute.xlu2 %636 }
  0x87   : > { %2987 = vmatmul.msk.f32.gmra.mxu0 %vm337_vm0, %v325_v51 }
  0x89   : > { %998 = vrot.lane.b32.xlu1 %v3725_v40, %s3369_s19  ;;  %994 = vrot.lane.b32.xlu2 %v3731_v41, %s3369_s19 }
  0x8a   : > { %996 = vrot.lane.b32.xlu0 %v3697_v35, %s3369_s19 }
  0x8b   : > { %v3795_v52 = vpop.permute.xlu2 %642  ;;  %v625_v53 = vpop.permute.xlu1 %624 }
  0x8c   : > { %v621_v54 = vpop.permute.xlu0 %620 }
  0x8f   : > { %2988 = vmatmul.msk.f32.gmra.mxu0 %vm337_vm0, %v326_v55 }
  0x91   : > { %1004 = vrot.lane.b32.xlu1 %v3743_v43, %s3369_s19  ;;  %1000 = vrot.lane.b32.xlu2 %v3749_v44, %s3369_s19 }
  0x92   : > { %1002 = vrot.lane.b32.xlu0 %v3720_v39, %s3369_s19 }
  0x93   : > { %v3805_v56 = vpop.permute.xlu2 %648  ;;  %v627_v57 = vpop.permute.xlu1 %626 }
  0x94   : > { %v623_v58 = vpop.permute.xlu0 %622 }
  0x97   : > { %2989 = vmatmul.msk.f32.gmra.mxu0 %vm337_vm0, %v327_v59 }
  0x99   : > { %1042 = vrot.lane.b32.xlu1 %v3495_v1, %s3370_s27  ;;  %1038 = vrot.lane.b32.xlu2 %v3500_v2, %s3370_s27 }
  0x9a   : > { %1040 = vrot.lane.b32.xlu0 %v3542_v6, %s3370_s27 }
  0x9b   : > { %v3815_v60 = vpop.permute.xlu1 %634  ;;  %v3817_v61 = vpop.permute.xlu2 %797 }
  0x9c   : > { %v3819_v62 = vpop.permute.xlu0 %632 }
  0x9f   : > { %2990 = vmatmul.msk.f32.gmra.mxu0 %vm337_vm0, %v328_v63 }
  0xa1   : > { %1048 = vrot.lane.b32.xlu1 %v3527_v4, %s3370_s27  ;;  %1044 = vrot.lane.b32.xlu2 %v3532_v5, %s3370_s27 }
  0xa2   : > { %1046 = vrot.lane.b32.xlu0 %v3490_v0, %s3370_s27 }
  0xa3   : > { %v3836_v7 = vpop.permute.xlu1 %640  ;;  %v3838_v8 = vpop.permute.xlu2 %803 }
  0xa4   : > { %v3840_v9 = vpop.permute.xlu0 %638  ;;  %v403_v10 = vpop.f32.mrf.mxu0 }
  0xa5   : > { %v3843_v14 = vadd.f32 %v3828_v3, %v403_v10 }
  0xa7   : > { %v861_v18 = vmul.f32 %v3500_v2, %v3843_v14  ;;  %v668_v22 = vmul.f32 %v621_v54, %v3843_v14 }
  0xa9   : > { %1050 = vrot.lane.b32.xlu2 %v3570_v13, %s3370_s27  ;;  %700 = vrot.lane.b32.xlu1 %v668_v22, %s3371_s9 }
  0xaa   : > { %893 = vrot.lane.b32.xlu0 %v861_v18, %s5911_s30 }
  0xab   : > { %v3852_v26 = vpop.permute.xlu1 %646  ;;  %v3854_v30 = vpop.permute.xlu2 %809 }
  0xac   : > { %v3856_v34 = vpop.permute.xlu0 %644  ;;  %v406_v38 = vpop.f32.mrf.mxu0 }
  0xad   : > { %v3859_v42 = vadd.f32 %v3828_v3, %v406_v38 }
  0xaf   : > { %v669_v45 = vmul.f32 %v623_v58, %v3859_v42  ;;  %v862_v47 = vmul.f32 %v3542_v6, %v3859_v42 }
  0xb1   : > { %702 = vrot.lane.b32.xlu2 %v669_v45, %s3371_s9  ;;  %895 = vrot.lane.b32.xlu1 %v862_v47, %s5911_s30 }
  0xb2   : > { %1052 = vrot.lane.b32.xlu0 %v3564_v12, %s3370_s27 }
  0xb3   : > { %v3868_v49 = vpop.permute.xlu1 %801  ;;  %v3870_v51 = vpop.permute.xlu2 %815 }
  0xb4   : > { %v3872_v54 = vpop.permute.xlu0 %650  ;;  %v409_v55 = vpop.f32.mrf.mxu0 }
  0xb5   : > { %v3875_v59 = vadd.f32 %v3828_v3, %v409_v55 }
  0xb7   : > { %v863_v58 = vmul.f32 %v3495_v1, %v3875_v59  ;;  %v670_v63 = vmul.f32 %v625_v53, %v3875_v59 }
  0xb9   : > { %897 = vrot.lane.b32.xlu2 %v863_v58, %s5911_s30  ;;  %1054 = vrot.lane.b32.xlu1 %v3559_v11, %s3370_s27 }
  0xba   : > { %704 = vrot.lane.b32.xlu0 %v670_v63, %s3371_s9 }
  0xbb   : > { %v3884_v10 = vpop.permute.xlu1 %807  ;;  %v3886_v18 = vpop.permute.xlu2 %821 }
  0xbc   : > { %5921 = vst [vmem:[#allocation26_spill] sm:$0xff] %v3886_v18  ;;  %v3888_v22 = vpop.permute.xlu0 %799  ;;  %v412_v38 = vpop.f32.mrf.mxu0 }
  0xbd   : > { %v3891_v45 = vadd.f32 %v3828_v3, %v412_v38 }
  0xbf   : > { %v864_v53 = vmul.f32 %v3532_v5, %v3891_v45  ;;  %v671_v47 = vmul.f32 %v627_v57, %v3891_v45 }
  0xc1   : > { %1056 = vrot.lane.b32.xlu2 %v3593_v17, %s3370_s27  ;;  %706 = vrot.lane.b32.xlu1 %v671_v47, %s3371_s9 }
  0xc2   : > { %899 = vrot.lane.b32.xlu0 %v864_v53, %s5911_s30 }
  0xc3   : > { %v3900_v55 = vpop.permute.xlu1 %813  ;;  %v3902_v58 = vpop.permute.xlu2 %827 }
  0xc4   : > { %5922 = vst [vmem:[#allocation27_spill] sm:$0xff] %v3902_v58  ;;  %v3904_v63 = vpop.permute.xlu0 %805  ;;  %v415_v38 = vpop.f32.mrf.mxu0 }
  0xc5   : > { %v3907_v1 = vadd.f32 %v3828_v3, %v415_v38 }
  0xc7   : > { %v672_v57 = vmul.f32 %v3765_v46, %v3907_v1  ;;  %v865_v5 = vmul.f32 %v3490_v0, %v3907_v1 }
  0xc9   : > { %708 = vrot.lane.b32.xlu2 %v672_v57, %s3371_s9  ;;  %901 = vrot.lane.b32.xlu1 %v865_v5, %s5911_s30 }
  0xca   : > { %1058 = vrot.lane.b32.xlu0 %v3587_v16, %s3370_s27 }
  0xcb   : > { %v3917_v53 = vpop.permute.xlu1 %819  ;;  %v3919_v47 = vpop.permute.xlu2 %976 }
  0xcc   : > { %5923 = vst [vmem:[#allocation28_spill] sm:$0xff] %v3919_v47  ;;  %v3921_v58 = vpop.permute.xlu0 %811  ;;  %v418_v38 = vpop.f32.mrf.mxu0 }
  0xcd   : > { %v3924_v2 = vadd.f32 %v3828_v3, %v418_v38 }
  0xcf   : > { %v866_v46 = vmul.f32 %v3527_v4, %v3924_v2  ;;  %v673_v57 = vmul.f32 %v3775_v48, %v3924_v2 }
  0xd1   : > { %903 = vrot.lane.b32.xlu2 %v866_v46, %s5911_s30  ;;  %1060 = vrot.lane.b32.xlu1 %v3582_v15, %s3370_s27 }
  0xd2   : > { %710 = vrot.lane.b32.xlu0 %v673_v57, %s3371_s9 }
  0xd3   : > { %v3934_v5 = vpop.permute.xlu1 %825  ;;  %v3936_v18 = vpop.permute.xlu2 %982 }
  0xd4   : > { %5924 = vst [vmem:[#allocation29_spill] sm:$0xff] %v3934_v5  ;;  %v3938_v43 = vpop.permute.xlu0 %817  ;;  %v421_v38 = vpop.f32.mrf.mxu0 }
  0xd5   : > { %5925 = vst [vmem:[#allocation30_spill] sm:$0xff] %v3936_v18  ;;  %v3941_v0 = vadd.f32 %v3828_v3, %v421_v38 }
  0xd7   : > { %v867_v48 = vmul.f32 %v3570_v13, %v3941_v0  ;;  %v674_v46 = vmul.f32 %v3819_v62, %v3941_v0 }
  0xd9   : > { %1062 = vrot.lane.b32.xlu2 %v3616_v21, %s3370_s27  ;;  %712 = vrot.lane.b32.xlu1 %v674_v46, %s3371_s9 }
  0xda   : > { %905 = vrot.lane.b32.xlu0 %v867_v48, %s5911_s30 }
  0xdb   : > { %v3951_v57 = vpop.permute.xlu1 %974  ;;  %v3953_v18 = vpop.permute.xlu2 %988 }
  0xdc   : > { %5926 = vst [vmem:[#allocation31_spill] sm:$0xff] %v3953_v18  ;;  %v3955_v4 = vpop.permute.xlu0 %823  ;;  %v424_v38 = vpop.f32.mrf.mxu0 }
  0xdd   : > { %5927 = vst [vmem:[#allocation32_spill] sm:$0xff] %v3955_v4  ;;  %v3958_v5 = vadd.f32 %v3828_v3, %v424_v38 }
  0xdf   : > { %v675_v62 = vmul.f32 %v3815_v60, %v3958_v5  ;;  %v868_v13 = vmul.f32 %v3564_v12, %v3958_v5 }
  0xe1   : > { %714 = vrot.lane.b32.xlu2 %v675_v62, %s3371_s9  ;;  %907 = vrot.lane.b32.xlu1 %v868_v13, %s5911_s30 }
  0xe2   : > { %1064 = vrot.lane.b32.xlu0 %v3610_v20, %s3370_s27 }
  0xe3   : > { %v3968_v48 = vpop.permute.xlu1 %980  ;;  %v3970_v46 = vpop.permute.xlu2 %994 }
  0xe4   : > { %5928 = vst [vmem:[#allocation33_spill] sm:$0xff] %v3968_v48  ;;  %v3972_v18 = vpop.permute.xlu0 %978  ;;  %v427_v38 = vpop.f32.mrf.mxu0 }
  0xe5   : > { %5929 = vst [vmem:[#allocation34_spill] sm:$0xff] %v3970_v46  ;;  %v3975_v4 = vadd.f32 %v3828_v3, %v427_v38 }
  0xe7   : > { %v869_v60 = vmul.f32 %v3559_v11, %v3975_v4  ;;  %v676_v62 = vmul.f32 %v3785_v50, %v3975_v4 }
  0xe9   : > { %909 = vrot.lane.b32.xlu2 %v869_v60, %s5911_s30  ;;  %1066 = vrot.lane.b32.xlu1 %v3605_v19, %s3370_s27 }
  0xea   : > { %716 = vrot.lane.b32.xlu0 %v676_v62, %s3371_s9 }
  0xeb   : > { %v3985_v13 = vpop.permute.xlu1 %986  ;;  %v3987_v46 = vpop.permute.xlu2 %1000 }
  0xec   : > { %5930 = vst [vmem:[#allocation35_spill] sm:$0xff] %v3985_v13  ;;  %v3989_v12 = vpop.permute.xlu0 %984  ;;  %v430_v38 = vpop.f32.mrf.mxu0 }
  0xed   : > { %5931 = vst [vmem:[#allocation36_spill] sm:$0xff] %v3987_v46  ;;  %v3992_v48 = vadd.f32 %v3828_v3, %v430_v38 }
  0xee   : > { %5932 = vst [vmem:[#allocation37_spill] sm:$0xff] %v3989_v12 }
  0xef   : > { %v870_v50 = vmul.f32 %v3593_v17, %v3992_v48  ;;  %v677_v60 = vmul.f32 %v3840_v9, %v3992_v48 }
  0xf1   : > { %1068 = vrot.lane.b32.xlu2 %v3639_v25, %s3370_s27  ;;  %718 = vrot.lane.b32.xlu1 %v677_v60, %s3371_s9 }
  0xf2   : > { %911 = vrot.lane.b32.xlu0 %v870_v50, %s5911_s30 }
  0xf3   : > { %v4002_v62 = vpop.permute.xlu1 %992  ;;  %v1039_v46 = vpop.permute.xlu2 %1038 }
  0xf4   : > { %5933 = vst [vmem:[#allocation38_spill] sm:$0xff] %v4002_v62  ;;  %v4004_v11 = vpop.permute.xlu0 %990  ;;  %v433_v38 = vpop.f32.mrf.mxu0  ;;  %v1086_v47 = vmul.f32 %v1039_v46, %v3843_v14 }
  0xf5   : > { %5934 = vst [vmem:[#allocation39_spill] sm:$0xff] %v4004_v11  ;;  %v4007_v13 = vadd.f32 %v3828_v3, %v433_v38 }
  0xf7   : > { %v678_v17 = vmul.f32 %v3836_v7, %v4007_v13  ;;  %v871_v9 = vmul.f32 %v3587_v16, %v4007_v13 }
  0xf9   : > { %720 = vrot.lane.b32.xlu2 %v678_v17, %s3371_s9  ;;  %913 = vrot.lane.b32.xlu1 %v871_v9, %s5911_s30 }
  0xfa   : > { %1118 = vrot.lane.b32.xlu0 %v1086_v47, %s3371_s9 }
  0xfb   : > { %v4017_v50 = vpop.permute.xlu1 %998  ;;  %v1045_v60 = vpop.permute.xlu2 %1044 }
  0xfc   : > { %5935 = vst [vmem:[#allocation40_spill] sm:$0xff] %v4017_v50  ;;  %v4019_v62 = vpop.permute.xlu0 %996  ;;  %v436_v38 = vpop.f32.mrf.mxu0 }
  0xfd   : > { %5936 = vst [vmem:[#allocation41_spill] sm:$0xff] %v4019_v62  ;;  %v4022_v11 = vadd.f32 %v3828_v3, %v436_v38 }
  0xff   : > { %v872_v7 = vmul.f32 %v3582_v15, %v4022_v11  ;;  %v679_v46 = vmul.f32 %v3795_v52, %v4022_v11  ;;  %v589_v52 = vmul.f32 %v3662_v29, %v3859_v42 }
 0x101   : > { %915 = vrot.lane.b32.xlu2 %v872_v7, %s5911_s30 }
 0x102   : > { %722 = vrot.lane.b32.xlu0 %v679_v46, %s3371_s9 }
 0x103   : > { %v4030_v17 = vpop.permute.xlu1 %1004  ;;  %v4032_v47 = vpop.permute.xlu2 %1050 }
 0x104   : > { %5937 = vst [vmem:[#allocation42_spill] sm:$0xff] %v4030_v17  ;;  %v4034_v9 = vpop.permute.xlu0 %1002  ;;  %v439_v50 = vpop.f32.mrf.mxu0 }
 0x105   : > { %5938 = vst [vmem:[#allocation43_spill] sm:$0xff] %v4034_v9  ;;  %v4037_v38 = vadd.f32 %v3828_v3, %v439_v50 }
 0x107   : > { %v873_v15 = vmul.f32 %v3616_v21, %v4037_v38 }
 0x10a   : > { %917 = vrot.lane.b32.xlu0 %v873_v15, %s5911_s30  ;;  %v1089_v15 = vmul.f32 %v1045_v60, %v3891_v45  ;;  %v845_v60 = vmul.f32 %v3817_v61, %v3843_v14 }
 0x10b   : > { %v1043_v7 = vpop.permute.xlu1 %1042  ;;  %v703_v46 = vpop.permute.xlu2 %702 }
 0x10c   : > { %v1041_v17 = vpop.permute.xlu0 %1040  ;;  %v1088_v62 = vmul.f32 %v1043_v7, %v3875_v59  ;;  %v442_v16 = vpop.f32.mrf.mxu0  ;;  %v749_v9 = vsub.f32 %v589_v52, %v703_v46 }
 0x10d   : > { %v1087_v40 = vmul.f32 %v1041_v17, %v3859_v42  ;;  %v4051_v50 = vadd.f32 %v3828_v3, %v442_v16 }
 0x10e   : > { %766 = vst.msk [vmem:[#allocation2 + $0x8] sm:$0xff] %vm764_vm1, %v749_v9  ;;  %1122 = vrot.lane.b32.xlu2 %v1088_v62, %s3371_s9  ;;  %v588_v62 = vmul.f32 %v3633_v24, %v3843_v14 }
 0x10f   : > { %1120 = vrot.lane.b32.xlu1 %v1087_v40, %s3371_s9  ;;  %v681_v17 = vmul.f32 %v3852_v26, %v4051_v50  ;;  %v680_v40 = vmul.f32 %v3856_v34, %v4037_v38  ;;  %v874_v52 = vmul.f32 %v3610_v20, %v4051_v50 }
 0x112   : > { %1124 = vrot.lane.b32.xlu0 %v1089_v15, %s3371_s9 }
 0x113   : > { %v1049_v21 = vpop.permute.xlu1 %1048  ;;  %v898_v12 = vpop.permute.xlu2 %897 }
 0x114   : > { %v1047_v7 = vpop.permute.xlu0 %1046  ;;  %v445_v6 = vpop.f32.mrf.mxu0 }
 0x115   : > { %v4057_v9 = vadd.f32 %v3828_v3, %v445_v6 }
 0x116   : > { %726 = vrot.lane.b32.xlu2 %v681_v17, %s3371_s9 }
 0x117   : > { %724 = vrot.lane.b32.xlu1 %v680_v40, %s3371_s9  ;;  %v682_v16 = vmul.f32 %v3805_v56, %v4057_v9  ;;  %v875_v26 = vmul.f32 %v3605_v19, %v4057_v9 }
 0x11a   : > { %728 = vrot.lane.b32.xlu0 %v682_v16, %s3371_s9  ;;  %v846_v16 = vmul.f32 %v3888_v22, %v3859_v42  ;;  %v1092_v22 = vmul.f32 %v4032_v47, %v3941_v0 }
 0x11b   : > { %v1057_v6 = vpop.permute.xlu2 %1056  ;;  %v701_v34 = vpop.permute.xlu1 %700 }
 0x11c   : > { %v448_v46 = vpop.f32.mrf.mxu0  ;;  %v894_v15 = vpop.permute.xlu0 %893  ;;  %v748_v56 = vsub.f32 %v588_v62, %v701_v34  ;;  %v1091_v34 = vmul.f32 %v1049_v21, %v3924_v2  ;;  %v590_v21 = vmul.f32 %v3628_v23, %v3875_v59  ;;  %v1095_v47 = vmul.f32 %v1057_v6, %v3992_v48 }
 0x11d   : > { %v4075_v17 = vadd.f32 %v3828_v3, %v448_v46  ;;  %v941_v40 = vadd.f32 %v894_v15, %v845_v60  ;;  %v592_v3 = vmul.f32 %v3685_v33, %v3907_v1 }
 0x11e   : > { %765 = vst.msk [vmem:[#allocation2] sm:$0xff] %vm764_vm1, %v748_v56  ;;  %921 = vrot.lane.b32.xlu2 %v875_v26, %s5911_s30 }
 0x11f   : > { %958 = vst.msk [vmem:[#allocation2] sm:$0xff] %vm957_vm2, %v941_v40  ;;  %919 = vrot.lane.b32.xlu1 %v874_v52, %s5911_s30  ;;  %v876_v61 = vmul.f32 %v3639_v25, %v4075_v17  ;;  %v1090_v52 = vmul.f32 %v1047_v7, %v3907_v1  ;;  %v847_v7 = vmul.f32 %v3868_v49, %v3875_v59 }
 0x120   : > { %v591_v49 = vmul.f32 %v3656_v28, %v3891_v45 }
 0x122   : > { %923 = vrot.lane.b32.xlu0 %v876_v61, %s5911_s30 }
 0x123   : > { %v709_v62 = vpop.permute.xlu2 %708  ;;  %v896_v60 = vpop.permute.xlu1 %895 }
 0x124   : > { %v752_v26 = vsub.f32 %v592_v3, %v709_v62  ;;  %v1053_v46 = vpop.permute.xlu0 %1052  ;;  %v942_v15 = vadd.f32 %v896_v60, %v846_v16  ;;  %v683_v62 = vmul.f32 %v3872_v54, %v4075_v17  ;;  %v943_v60 = vadd.f32 %v898_v12, %v847_v7 }
 0x125   : > { %v848_v54 = vmul.f32 %v3838_v8, %v3891_v45  ;;  %v849_v8 = vmul.f32 %v3904_v63, %v3907_v1  ;;  %v850_v63 = vmul.f32 %v3884_v10, %v3924_v2 }
 0x126   : > { %769 = vst.msk [vmem:[#allocation2 + $0x20] sm:$0xff] %vm764_vm1, %v752_v26  ;;  %1128 = vrot.lane.b32.xlu2 %v1091_v34, %s3371_s9 }
 0x127   : > { %959 = vst.msk [vmem:[#allocation2 + $0x8] sm:$0xff] %vm957_vm2, %v942_v15  ;;  %1126 = vrot.lane.b32.xlu1 %v1090_v52, %s3371_s9  ;;  %v1093_v52 = vmul.f32 %v1053_v46, %v3958_v5 }
 0x12a   : > { %1130 = vrot.lane.b32.xlu0 %v1092_v22, %s3371_s9 }
 0x12b   : > { %v904_v56 = vpop.permute.xlu2 %903  ;;  %v1055_v40 = vpop.permute.xlu1 %1054 }
 0x12c   : > { %v705_v61 = vpop.permute.xlu0 %704  ;;  %v1094_v16 = vmul.f32 %v1055_v40, %v3975_v4 }
 0x12d   : > { %v750_v3 = vsub.f32 %v590_v21, %v705_v61  ;;  %v595_v21 = vmul.f32 %v3708_v37, %v3958_v5 }
 0x12e   : > { %1134 = vrot.lane.b32.xlu2 %v1094_v16, %s3371_s9 }
 0x12f   : > { %767 = vst.msk [vmem:[#allocation2 + $0x10] sm:$0xff] %vm764_vm1, %v750_v3  ;;  %730 = vrot.lane.b32.xlu1 %v683_v62, %s3371_s9 }
 0x130   : > { %960 = vst.msk [vmem:[#allocation2 + $0x10] sm:$0xff] %vm957_vm2, %v943_v60  ;;  %v593_v60 = vmul.f32 %v3651_v27, %v3924_v2 }
 0x132   : > { %1136 = vrot.lane.b32.xlu0 %v1095_v47, %s3371_s9 }
 0x133   : > { %v1063_v34 = vpop.permute.xlu2 %1062  ;;  %v707_v12 = vpop.permute.xlu1 %706 }
 0x134   : > { %v900_v26 = vpop.permute.xlu0 %899  ;;  %v751_v15 = vsub.f32 %v591_v49, %v707_v12  ;;  %v1098_v6 = vmul.f32 %v1063_v34, %v4037_v38  ;;  %v946_v12 = vadd.f32 %v904_v56, %v850_v63  ;;  %v598_v56 = vmul.f32 %v3731_v41, %v4007_v13 }
 0x135   : > { %v944_v22 = vadd.f32 %v900_v26, %v848_v54  ;;  %v594_v26 = vmul.f32 %v3679_v32, %v3941_v0 }
 0x136   : > { %768 = vst.msk [vmem:[#allocation2 + $0x18] sm:$0xff] %vm764_vm1, %v751_v15 }
 0x137   : > { %961 = vst.msk [vmem:[#allocation2 + $0x18] sm:$0xff] %vm957_vm2, %v944_v22  ;;  %1132 = vrot.lane.b32.xlu1 %v1093_v52, %s3371_s9  ;;  %v851_v52 = vmul.f32 %v3854_v30, %v3941_v0 }
 0x13a   : > { %1142 = vrot.lane.b32.xlu0 %v1098_v6, %s3371_s9 }
 0x13b   : > { %v715_v40 = vpop.permute.xlu2 %714  ;;  %v902_v7 = vpop.permute.xlu1 %901 }
 0x13c   : > { %v755_v46 = vsub.f32 %v595_v21, %v715_v40  ;;  %v1059_v61 = vpop.permute.xlu0 %1058  ;;  %v945_v16 = vadd.f32 %v902_v7, %v849_v8  ;;  %v852_v40 = vmul.f32 %v3921_v58, %v3958_v5 }
 0x13d   : > { %v1096_v3 = vmul.f32 %v1059_v61, %v4007_v13 }
 0x13e   : > { %772 = vst.msk [vmem:[#allocation2 + $0x38] sm:$0xff] %vm764_vm1, %v755_v46 }
 0x13f   : > { %962 = vst.msk [vmem:[#allocation2 + $0x20] sm:$0xff] %vm957_vm2, %v945_v16  ;;  %1138 = vrot.lane.b32.xlu1 %v1096_v3, %s3371_s9 }
 0x143   : > { %v910_v62 = vpop.permute.xlu2 %909  ;;  %v1061_v47 = vpop.permute.xlu1 %1060 }
 0x144   : > { %v711_v49 = vpop.permute.xlu0 %710  ;;  %v1097_v34 = vmul.f32 %v1061_v47, %v4022_v11  ;;  %v853_v47 = vmul.f32 %v3900_v55, %v3975_v4  ;;  %v597_v55 = vmul.f32 %v3702_v36, %v3992_v48 }
 0x145   : > { %v753_v54 = vsub.f32 %v593_v60, %v711_v49  ;;  %v596_v60 = vmul.f32 %v3674_v31, %v3975_v4 }
 0x146   : > { %1140 = vrot.lane.b32.xlu2 %v1097_v34, %s3371_s9 }
 0x147   : > { %770 = vst.msk [vmem:[#allocation2 + $0x28] sm:$0xff] %vm764_vm1, %v753_v54  ;;  %v949_v54 = vadd.f32 %v910_v62, %v853_v47 }
 0x148   : > { %963 = vst.msk [vmem:[#allocation2 + $0x28] sm:$0xff] %vm957_vm2, %v946_v12  ;;  %v854_v12 = vmul.f32 %v3870_v51, %v3992_v48 }
 0x14b   : > { %v1069_v15 = vpop.permute.xlu2 %1068  ;;  %v713_v22 = vpop.permute.xlu1 %712 }
 0x14c   : > { %v1101_v10 = vmul.f32 %v1069_v15, %v4075_v17  ;;  %v906_v6 = vpop.permute.xlu0 %905  ;;  %v754_v21 = vsub.f32 %v594_v26, %v713_v22  ;;  %v855_v22 = vmul.f32 %v3938_v43, %v4007_v13 }
 0x14d   : > { %v947_v8 = vadd.f32 %v906_v6, %v851_v52 }
 0x14e   : > { %771 = vst.msk [vmem:[#allocation2 + $0x30] sm:$0xff] %vm764_vm1, %v754_v21  ;;  %1148 = vrot.lane.b32.xlu0 %v1101_v10, %s3371_s9  ;;  %v599_v21 = vmul.f32 %v3697_v35, %v4022_v11 }
 0x14f   : > { %964 = vst.msk [vmem:[#allocation2 + $0x30] sm:$0xff] %vm957_vm2, %v947_v8  ;;  %v856_v8 = vmul.f32 %v3917_v53, %v4022_v11  ;;  %v5939_v53 = vld [vmem:[#allocation16_spill] sm:$0xff] }
 0x153   : > { %v721_v7 = vpop.permute.xlu2 %720  ;;  %v908_v30 = vpop.permute.xlu1 %907 }
 0x154   : > { %v758_v46 = vsub.f32 %v598_v56, %v721_v7  ;;  %v1065_v61 = vpop.permute.xlu0 %1064  ;;  %v948_v16 = vadd.f32 %v908_v30, %v852_v40  ;;  %v5940_v7 = vld [vmem:[#allocation37_spill] sm:$0xff] }
 0x155   : > { %v1099_v3 = vmul.f32 %v1065_v61, %v4051_v50  ;;  %v1027_v30 = vmul.f32 %v5940_v7, %v3924_v2 }
 0x156   : > { %775 = vst.msk [vmem:[#allocation2 + $0x50] sm:$0xff] %vm764_vm1, %v758_v46  ;;  %1203 = vrot.lane.b32.xlu0 %v3628_v23, %s3370_s27  ;;  %v5942_v46 = vld [vmem:[#allocation28_spill] sm:$0xff] }
 0x157   : > { %965 = vst.msk [vmem:[#allocation2 + $0x38] sm:$0xff] %vm957_vm2, %v948_v16  ;;  %1144 = vrot.lane.b32.xlu1 %v1099_v3, %s3371_s9  ;;  %v1023_v61 = vmul.f32 %v5942_v46, %v3859_v42 }
 0x15b   : > { %v1067_v58 = vpop.permute.xlu1 %1066  ;;  %v916_v23 = vpop.permute.xlu2 %915 }
 0x15c   : > { %v717_v63 = vpop.permute.xlu0 %716  ;;  %v1100_v49 = vmul.f32 %v1067_v58, %v4057_v9  ;;  %v952_v40 = vadd.f32 %v916_v23, %v856_v8  ;;  %v5943_v58 = vld [vmem:[#allocation33_spill] sm:$0xff] }
 0x15d   : > { %v756_v34 = vsub.f32 %v596_v60, %v717_v63  ;;  %v1025_v47 = vmul.f32 %v5943_v58, %v3891_v45  ;;  %v5946_v23 = vld [vmem:[#allocation25_spill] sm:$0xff] }
 0x15e   : > { %1209 = vrot.lane.b32.xlu0 %v3651_v27, %s3370_s27  ;;  %1146 = vrot.lane.b32.xlu2 %v1100_v49, %s3371_s9  ;;  %v5944_v49 = vld [vmem:[#allocation11_spill] sm:$0xff] }
 0x15f   : > { %773 = vst.msk [vmem:[#allocation2 + $0x40] sm:$0xff] %vm764_vm1, %v756_v34  ;;  %1199 = vrot.lane.b32.xlu1 %v3633_v24, %s3370_s27  ;;  %v1024_v24 = vmul.f32 %v3972_v18, %v3875_v59  ;;  %v5945_v34 = vld [vmem:[#allocation39_spill] sm:$0xff] }
 0x160   : > { %966 = vst.msk [vmem:[#allocation2 + $0x40] sm:$0xff] %vm957_vm2, %v949_v54  ;;  %v1030_v54 = vmul.f32 %v5945_v34, %v3975_v4 }
 0x163   : > { %v719_v62 = vpop.permute.xlu1 %718 }
 0x164   : > { %v912_v26 = vpop.permute.xlu0 %911  ;;  %v757_v15 = vsub.f32 %v597_v55, %v719_v62  ;;  %v5947_v62 = vld [vmem:[#allocation26_spill] sm:$0xff] }
 0x165   : > { %v950_v27 = vadd.f32 %v912_v26, %v854_v12  ;;  %v857_v26 = vmul.f32 %v5947_v62, %v4037_v38 }
 0x166   : > { %774 = vst.msk [vmem:[#allocation2 + $0x48] sm:$0xff] %vm764_vm1, %v757_v15  ;;  %1215 = vrot.lane.b32.xlu0 %v3674_v31, %s3370_s27  ;;  %1201 = vrot.lane.b32.xlu2 %v3662_v29, %s3370_s27  ;;  %v1022_v31 = vmul.f32 %v3951_v57, %v3843_v14 }
 0x167   : > { %967 = vst.msk [vmem:[#allocation2 + $0x48] sm:$0xff] %vm957_vm2, %v950_v27  ;;  %1205 = vrot.lane.b32.xlu1 %v3656_v28, %s3370_s27  ;;  %v601_v28 = vmul.f32 %v3749_v44, %v4051_v50 }
 0x168   : > { %v1123_v51 = vpop.permute.xlu2 %1122 }
 0x169   : > { %v1168_v52 = vsub.f32 %v1024_v24, %v1123_v51 }
 0x16b   : > { %1185 = vst.msk [vmem:[#allocation2 + $0x10] sm:$0xff] %vm1182_vm3, %v1168_v52  ;;  %v914_v29 = vpop.permute.xlu1 %913  ;;  %v5948_v52 = vld [vmem:[#allocation29_spill] sm:$0xff] }
 0x16c   : > { %v1119_v10 = vpop.permute.xlu0 %1118  ;;  %v951_v6 = vadd.f32 %v914_v29, %v855_v22  ;;  %v859_v22 = vmul.f32 %v5948_v52, %v4057_v9  ;;  %v5966_v52 = vld [vmem:[#allocation40_spill] sm:$0xff] }
 0x16d   : > { %v1166_v18 = vsub.f32 %v1022_v31, %v1119_v10 }
 0x16e   : > { %968 = vst.msk [vmem:[#allocation2 + $0x50] sm:$0xff] %vm957_vm2, %v951_v6  ;;  %1221 = vrot.lane.b32.xlu0 %v3697_v35, %s3370_s27  ;;  %1207 = vrot.lane.b32.xlu2 %v3685_v33, %s3370_s27  ;;  %v5949_v6 = vld [vmem:[#allocation18_spill] sm:$0xff] }
 0x16f   : > { %1183 = vst.msk [vmem:[#allocation2] sm:$0xff] %vm1182_vm3, %v1166_v18  ;;  %1211 = vrot.lane.b32.xlu1 %v3679_v32, %s3370_s27  ;;  %v5950_v18 = vld [vmem:[#allocation13_spill] sm:$0xff] }
 0x170   : > { %v727_v43 = vpop.permute.xlu2 %726 }
 0x171   : > { %v761_v57 = vsub.f32 %v601_v28, %v727_v43  ;;  %v5952_v28 = vld [vmem:[#allocation32_spill] sm:$0xff] }
 0x172   : > { %v858_v43 = vmul.f32 %v5952_v28, %v4051_v50 }
 0x173   : > { %778 = vst.msk [vmem:[#allocation2 + $0x68] sm:$0xff] %vm764_vm1, %v761_v57 }
 0x174   : > { %v723_v56 = vpop.permute.xlu0 %722 }
 0x175   : > { %v759_v33 = vsub.f32 %v599_v21, %v723_v56  ;;  %v5953_v56 = vld [vmem:[#allocation21_spill] sm:$0xff] }
 0x176   : > { %1227 = vrot.lane.b32.xlu0 %v3720_v39, %s3370_s27  ;;  %1213 = vrot.lane.b32.xlu2 %v3708_v37, %s3370_s27  ;;  %v5941_v37 = vld [vmem:[#allocation24_spill] sm:$0xff] }
 0x177   : > { %776 = vst.msk [vmem:[#allocation2 + $0x58] sm:$0xff] %vm764_vm1, %v759_v33  ;;  %1217 = vrot.lane.b32.xlu1 %v3702_v36, %s3370_s27  ;;  %v600_v12 = vmul.f32 %v5941_v37, %v4037_v38  ;;  %v5954_v33 = vld [vmem:[#allocation15_spill] sm:$0xff] }
 0x178   : > { %969 = vst.msk [vmem:[#allocation2 + $0x58] sm:$0xff] %vm957_vm2, %v952_v40  ;;  %v922_v32 = vpop.permute.xlu2 %921  ;;  %v5955_v40 = vld [vmem:[#allocation14_spill] sm:$0xff] }
 0x179   : > { %v955_v10 = vadd.f32 %v922_v32, %v859_v22  ;;  %v5956_v32 = vld [vmem:[#allocation30_spill] sm:$0xff]  ;;  %v1034_v22 = vmul.f32 %v5966_v52, %v4037_v38 }
 0x17c   : > { %v918_v35 = vpop.permute.xlu0 %917 }
 0x17d   : > { %v953_v51 = vadd.f32 %v918_v35, %v857_v26  ;;  %v1026_v35 = vmul.f32 %v5956_v32, %v3907_v1 }
 0x17e   : > { %1265 = vrot.lane.b32.xlu0 %v5939_v53, %s3369_s19  ;;  %1219 = vrot.lane.b32.xlu2 %v3731_v41, %s3370_s27 }
 0x17f   : > { %1223 = vrot.lane.b32.xlu1 %v5941_v37, %s3370_s27 }
 0x180   : > { %v1129_v36 = vpop.permute.xlu2 %1128 }
 0x181   : > { %v1171_v16 = vsub.f32 %v1027_v30, %v1129_v36  ;;  %v1121_v3 = vpop.permute.xlu1 %1120  ;;  %v5957_v30 = vld [vmem:[#allocation35_spill] sm:$0xff] }
 0x182   : > { %v1167_v60 = vsub.f32 %v1023_v61, %v1121_v3  ;;  %v1028_v37 = vmul.f32 %v5957_v30, %v3941_v0  ;;  %v5958_v36 = vld [vmem:[#allocation19_spill] sm:$0xff]  ;;  %v5960_v3 = vld [vmem:[#allocation41_spill] sm:$0xff] }
 0x183   : > { %1188 = vst.msk [vmem:[#allocation2 + $0x28] sm:$0xff] %vm1182_vm3, %v1171_v16  ;;  %v5959_v16 = vld [vmem:[#allocation17_spill] sm:$0xff] }
 0x184   : > { %1184 = vst.msk [vmem:[#allocation2 + $0x8] sm:$0xff] %vm1182_vm3, %v1167_v60  ;;  %v1125_v41 = vpop.permute.xlu0 %1124  ;;  %v1033_v60 = vmul.f32 %v5960_v3, %v4022_v11 }
 0x185   : > { %v1169_v63 = vsub.f32 %v1025_v47, %v1125_v41  ;;  %v603_v47 = vmul.f32 %v5946_v23, %v4075_v17  ;;  %v5961_v41 = vld [vmem:[#allocation27_spill] sm:$0xff] }
 0x186   : > { %1271 = vrot.lane.b32.xlu0 %v5944_v49, %s3369_s19  ;;  %1225 = vrot.lane.b32.xlu2 %v3749_v44, %s3370_s27  ;;  %v602_v44 = vmul.f32 %v3720_v39, %v4057_v9  ;;  %v5951_v39 = vld [vmem:[#allocation12_spill] sm:$0xff] }
 0x187   : > { %1186 = vst.msk [vmem:[#allocation2 + $0x18] sm:$0xff] %vm1182_vm3, %v1169_v63  ;;  %1229 = vrot.lane.b32.xlu1 %v5946_v23, %s3370_s27  ;;  %v860_v63 = vmul.f32 %v5961_v41, %v4075_v17  ;;  %v5963_v23 = vld [vmem:[#allocation22_spill] sm:$0xff]  ;;  %s3373_s27 = smov 40  }
 0x188   : > { %v1135_v55 = vpop.permute.xlu2 %1134 }
 0x189   : > { %v1174_v15 = vsub.f32 %v1030_v54, %v1135_v55  ;;  %v725_v27 = vpop.permute.xlu1 %724  ;;  %v5962_v54 = vld [vmem:[#allocation38_spill] sm:$0xff] }
 0x18a   : > { %v760_v24 = vsub.f32 %v600_v12, %v725_v27  ;;  %v1031_v55 = vmul.f32 %v5962_v54, %v3992_v48  ;;  %v5965_v27 = vld [vmem:[#allocation31_spill] sm:$0xff] }
 0x18b   : > { %1191 = vst.msk [vmem:[#allocation2 + $0x40] sm:$0xff] %vm1182_vm3, %v1174_v15  ;;  %v5964_v15 = vld [vmem:[#allocation20_spill] sm:$0xff] }
 0x18c   : > { %777 = vst.msk [vmem:[#allocation2 + $0x60] sm:$0xff] %vm764_vm1, %v760_v24  ;;  %v729_v31 = vpop.permute.xlu0 %728  ;;  %v1029_v24 = vmul.f32 %v5965_v27, %v3958_v5 }
 0x18d   : > { %970 = vst.msk [vmem:[#allocation2 + $0x60] sm:$0xff] %vm957_vm2, %v953_v51  ;;  %v762_v29 = vsub.f32 %v602_v44, %v729_v31 }
 0x18e   : > { %1277 = vrot.lane.b32.xlu0 %v5949_v6, %s3369_s19  ;;  %1263 = vrot.lane.b32.xlu2 %v5950_v18, %s3369_s19  ;;  %v5968_v6 = vld [vmem:[#allocation34_spill] sm:$0xff] }
 0x18f   : > { %779 = vst.msk [vmem:[#allocation2 + $0x70] sm:$0xff] %vm764_vm1, %v762_v29  ;;  %1267 = vrot.lane.b32.xlu1 %v5951_v39, %s3369_s19  ;;  %v1032_v18 = vmul.f32 %v5968_v6, %v4007_v13 }
 0x190   : > { %972 = vst.msk [vmem:[#allocation2 + $0x70] sm:$0xff] %vm957_vm2, %v955_v10  ;;  %v5967_v10 = vld [vmem:[#allocation23_spill] sm:$0xff] }
 0x191   : > { %v920_v57 = vpop.permute.xlu1 %919 }
 0x192   : > { %v954_v21 = vadd.f32 %v920_v57, %v858_v43  ;;  %v5969_v43 = vld [vmem:[#allocation43_spill] sm:$0xff] }
 0x193   : > { %v1036_v57 = vmul.f32 %v5969_v43, %v4057_v9 }
 0x194   : > { %971 = vst.msk [vmem:[#allocation2 + $0x68] sm:$0xff] %vm957_vm2, %v954_v21  ;;  %v924_v8 = vpop.permute.xlu0 %923 }
 0x195   : > { %v956_v12 = vadd.f32 %v924_v8, %v860_v63 }
 0x196   : > { %1283 = vrot.lane.b32.xlu0 %v5953_v56, %s3369_s19  ;;  %1269 = vrot.lane.b32.xlu2 %v5954_v33, %s3369_s19  ;;  %v5970_v56 = vld [vmem:[#allocation42_spill] sm:$0xff] }
 0x197   : > { %1273 = vrot.lane.b32.xlu1 %v5955_v40, %s3369_s19 }
 0x199   : > { %v1127_v53 = vpop.permute.xlu1 %1126 }
 0x19a   : > { %v1170_v7 = vsub.f32 %v1026_v35, %v1127_v53 }
 0x19c   : > { %1187 = vst.msk [vmem:[#allocation2 + $0x20] sm:$0xff] %vm1182_vm3, %v1170_v7  ;;  %v1131_v46 = vpop.permute.xlu0 %1130 }
 0x19d   : > { %v1172_v61 = vsub.f32 %v1028_v37, %v1131_v46 }
 0x19e   : > { %1289 = vrot.lane.b32.xlu0 %v3610_v20, %s3369_s19  ;;  %1275 = vrot.lane.b32.xlu2 %v5958_v36, %s3369_s19 }
 0x19f   : > { %1189 = vst.msk [vmem:[#allocation2 + $0x30] sm:$0xff] %vm1182_vm3, %v1172_v61  ;;  %1279 = vrot.lane.b32.xlu1 %v5959_v16, %s3369_s19 }
 0x1a0   : > { %v1141_v58 = vpop.permute.xlu2 %1140 }
 0x1a1   : > { %v1177_v49 = vsub.f32 %v1033_v60, %v1141_v58  ;;  %v731_v20 = vpop.permute.xlu1 %730 }
 0x1a2   : > { %v763_v34 = vsub.f32 %v603_v47, %v731_v20 }
 0x1a3   : > { %1194 = vst.msk [vmem:[#allocation2 + $0x58] sm:$0xff] %vm1182_vm3, %v1177_v49 }
 0x1a4   : > { %780 = vst.msk [vmem:[#allocation2 + $0x78] sm:$0xff] %vm764_vm1, %v763_v34  ;;  %v1137_v62 = vpop.permute.xlu0 %1136 }
 0x1a5   : > { %973 = vst.msk [vmem:[#allocation2 + $0x78] sm:$0xff] %vm957_vm2, %v956_v12  ;;  %v1175_v26 = vsub.f32 %v1031_v55, %v1137_v62 }
 0x1a6   : > { %1281 = vrot.lane.b32.xlu2 %v5963_v23, %s3369_s19 }
 0x1a7   : > { %1192 = vst.msk [vmem:[#allocation2 + $0x48] sm:$0xff] %vm1182_vm3, %v1175_v26  ;;  %1285 = vrot.lane.b32.xlu1 %v5964_v15, %s3369_s19 }
 0x1a9   : > { %v1133_v51 = vpop.permute.xlu1 %1132 }
 0x1aa   : > { %v1173_v44 = vsub.f32 %v1029_v24, %v1133_v51 }
 0x1ac   : > { %1190 = vst.msk [vmem:[#allocation2 + $0x38] sm:$0xff] %vm1182_vm3, %v1173_v44  ;;  %v1143_v31 = vpop.permute.xlu0 %1142 }
 0x1ad   : > { %v1178_v29 = vsub.f32 %v1034_v22, %v1143_v31 }
 0x1ae   : > { %1287 = vrot.lane.b32.xlu2 %v5967_v10, %s3369_s19 }
 0x1af   : > { %1195 = vst.msk [vmem:[#allocation2 + $0x60] sm:$0xff] %vm1182_vm3, %v1178_v29  ;;  %1291 = vrot.lane.b32.xlu1 %v3605_v19, %s3369_s19  ;;  %v1037_v19 = vmul.f32 %v5970_v56, %v4075_v17 }
 0x1b1   : > { %v1139_v39 = vpop.permute.xlu1 %1138 }
 0x1b2   : > { %v1176_v28 = vsub.f32 %v1032_v18, %v1139_v39 }
 0x1b4   : > { %1193 = vst.msk [vmem:[#allocation2 + $0x50] sm:$0xff] %vm1182_vm3, %v1176_v28 }
 0x1b6   : > { %1293 = vrot.lane.b32.xlu2 %v3639_v25, %s3369_s19  ;;  %v5971_v25 = vld [vmem:[#allocation36_spill] sm:$0xff]  ;;  %s3376_s19 = smov 80  }
 0x1b7   : > { %v1035_v7 = vmul.f32 %v5971_v25, %v4051_v50 }
 0x1b8   : > { %v1147_v21 = vpop.permute.xlu2 %1146 }
 0x1b9   : > { %v1180_v8 = vsub.f32 %v1036_v57, %v1147_v21 }
 0x1bb   : > { %1197 = vst.msk [vmem:[#allocation2 + $0x70] sm:$0xff] %vm1182_vm3, %v1180_v8 }
 0x1c0   : > { %v1149_v33 = vpop.permute.xlu0 %1148  ;;  %v4307_v40 = vpop.permute.xlu2 %1201 }
 0x1c1   : > { %v1181_v32 = vsub.f32 %v1037_v19, %v1149_v33 }
 0x1c3   : > { %1198 = vst.msk [vmem:[#allocation2 + $0x78] sm:$0xff] %vm1182_vm3, %v1181_v32 }
 0x1c8   : > { %v4310_v35 = vpop.permute.xlu0 %1203  ;;  %v4312_v53 = vpop.permute.xlu2 %1207 }
 0x1c9   : > { %v1145_v30 = vpop.permute.xlu1 %1144 }
 0x1ca   : > { %v1179_v37 = vsub.f32 %v1035_v7, %v1145_v30  ;;  %v4375_v30 = vld [vmem:[%s5847_s4] sm:$0xff] }
 0x1cc   : > { %1196 = vst.msk [vmem:[#allocation2 + $0x68] sm:$0xff] %vm1182_vm3, %v1179_v37  ;;  %v4382_v37 = vld [vmem:[%s5847_s4 + $0x10] sm:$0xff] }
 0x1d0   : > { %v4317_v46 = vpop.permute.xlu0 %1209  ;;  %v4319_v61 = vpop.permute.xlu2 %1213 }
 0x1d1   : > { %v4321_v36 = vpop.permute.xlu1 %1199 }
 0x1d8   : > { %v4323_v16 = vpop.permute.xlu0 %1215  ;;  %v4325_v3 = vpop.permute.xlu2 %1219 }
 0x1d9   : > { %v4327_v60 = vpop.permute.xlu1 %1205 }
 0x1e0   : > { %v4329_v58 = vpop.permute.xlu0 %1221  ;;  %v4331_v47 = vpop.permute.xlu2 %1225 }
 0x1e1   : > { %v4333_v41 = vpop.permute.xlu1 %1211 }
 0x1e8   : > { %v4335_v63 = vpop.permute.xlu0 %1227  ;;  %v1264_v49 = vpop.permute.xlu2 %1263 }
 0x1e9   : > { %v1311_v20 = vmul.f32 %v1264_v49, %v3843_v14  ;;  %v4338_v34 = vpop.permute.xlu1 %1217 }
 0x1eb   : > { %1343 = vrot.lane.b32.xlu0 %v1311_v20, %s5911_s30 }
 0x1f0   : > { %v1266_v54 = vpop.permute.xlu0 %1265  ;;  %v1270_v55 = vpop.permute.xlu2 %1269 }
 0x1f1   : > { %v1312_v12 = vmul.f32 %v1266_v54, %v3859_v42  ;;  %v1314_v62 = vmul.f32 %v1270_v55, %v3891_v45  ;;  %v4343_v26 = vpop.permute.xlu1 %1223  ;;  %v4391_v54 = vld [vmem:[%s5847_s4 + $0x18] sm:$0xff]  ;;  %v4398_v55 = vld [vmem:[%s5847_s4 + $0x28] sm:$0xff] }
 0x1f3   : > { %1345 = vrot.lane.b32.xlu1 %v1312_v12, %s5911_s30  ;;  %1349 = vrot.lane.b32.xlu0 %v1314_v62, %s5911_s30  ;;  %v4406_v12 = vld [vmem:[%s5847_s4 + $0x30] sm:$0xff]  ;;  %v4413_v62 = vld [vmem:[%s5847_s4 + $0x40] sm:$0xff] }
 0x1f4   : > { %5972 = vst [vmem:[#allocation16_spill] sm:$0xff] %v4413_v62 }
 0x1f8   : > { %v1272_v23 = vpop.permute.xlu0 %1271  ;;  %v1276_v15 = vpop.permute.xlu2 %1275 }
 0x1f9   : > { %v1315_v27 = vmul.f32 %v1272_v23, %v3907_v1  ;;  %v1317_v24 = vmul.f32 %v1276_v15, %v3941_v0  ;;  %v4349_v51 = vpop.permute.xlu1 %1229  ;;  %v4420_v23 = vld [vmem:[%s5847_s4 + $0x8] sm:$0xff] }
 0x1fa   : > { %v4427_v15 = vld [vmem:[%s5847_s4 + $0x48] sm:$0xff] }
 0x1fb   : > { %1351 = vrot.lane.b32.xlu1 %v1315_v27, %s5911_s30  ;;  %1355 = vrot.lane.b32.xlu0 %v1317_v24, %s5911_s30  ;;  %5973 = vst [vmem:[#allocation37_spill] sm:$0xff] %v4427_v15  ;;  %v4434_v27 = vld [vmem:[%s5847_s4 + $0x58] sm:$0xff]  ;;  %v4441_v24 = vld [vmem:[%s5847_s4 + $0x20] sm:$0xff] }
 0x1fc   : > { %5974 = vst [vmem:[#allocation24_spill] sm:$0xff] %v4434_v27 }
 0x200   : > { %v1278_v44 = vpop.permute.xlu0 %1277  ;;  %v1282_v52 = vpop.permute.xlu2 %1281 }
 0x201   : > { %v1318_v22 = vmul.f32 %v1278_v44, %v3958_v5  ;;  %v1320_v31 = vmul.f32 %v1282_v52, %v3992_v48  ;;  %v1268_v29 = vpop.permute.xlu1 %1267  ;;  %v4448_v44 = vld [vmem:[%s5847_s4 + $0x60] sm:$0xff]  ;;  %v4455_v52 = vld [vmem:[%s5847_s4 + $0x70] sm:$0xff] }
 0x202   : > { %v1313_v10 = vmul.f32 %v1268_v29, %v3875_v59  ;;  %5975 = vst [vmem:[#allocation28_spill] sm:$0xff] %v4448_v44  ;;  %v4476_v29 = vld [vmem:[%s5848_s5 + $0x8] sm:$0xff] }
 0x203   : > { %1357 = vrot.lane.b32.xlu1 %v1318_v22, %s5911_s30  ;;  %1361 = vrot.lane.b32.xlu0 %v1320_v31, %s5911_s30  ;;  %5976 = vst [vmem:[#allocation33_spill] sm:$0xff] %v4455_v52  ;;  %v4462_v22 = vld [vmem:[%s5847_s4 + $0x38] sm:$0xff] }
 0x204   : > { %1347 = vrot.lane.b32.xlu2 %v1313_v10, %s5911_s30  ;;  %v4469_v31 = vld [vmem:[%s5847_s4 + $0x78] sm:$0xff]  ;;  %5977 = vst [vmem:[#allocation11_spill] sm:$0xff] %v4476_v29  ;;  %v4483_v10 = vld [vmem:[%s5847_s4 + $0x50] sm:$0xff] }
 0x205   : > { %5978 = vst [vmem:[#allocation39_spill] sm:$0xff] %v4483_v10 }
 0x208   : > { %v1284_v6 = vpop.permute.xlu0 %1283  ;;  %v1288_v18 = vpop.permute.xlu2 %1287 }
 0x209   : > { %v1321_v39 = vmul.f32 %v1284_v6, %v4007_v13  ;;  %v1323_v28 = vmul.f32 %v1288_v18, %v4037_v38  ;;  %v1274_v43 = vpop.permute.xlu1 %1273  ;;  %v4490_v6 = vld [vmem:[%s5848_s5 + $0x10] sm:$0xff]  ;;  %v4497_v18 = vld [vmem:[%s5848_s5 + $0x20] sm:$0xff] }
 0x20a   : > { %v1316_v57 = vmul.f32 %v1274_v43, %v3924_v2  ;;  %5979 = vst [vmem:[#allocation25_spill] sm:$0xff] %v4490_v6  ;;  %v4518_v43 = vld [vmem:[%s5848_s5 + $0x38] sm:$0xff] }
 0x20b   : > { %1363 = vrot.lane.b32.xlu1 %v1321_v39, %s5911_s30  ;;  %1367 = vrot.lane.b32.xlu0 %v1323_v28, %s5911_s30  ;;  %v4504_v39 = vld [vmem:[%s5847_s4 + $0x68] sm:$0xff] }
 0x20c   : > { %1353 = vrot.lane.b32.xlu2 %v1316_v57, %s5911_s30  ;;  %5980 = vst [vmem:[#allocation26_spill] sm:$0xff] %v4504_v39  ;;  %v4511_v28 = vld [vmem:[%s5848_s5 + $0x28] sm:$0xff]  ;;  %v4525_v57 = vld [vmem:[%s5848_s5] sm:$0xff] }
 0x20d   : > { %5981 = vst [vmem:[#allocation29_spill] sm:$0xff] %v4525_v57 }
 0x210   : > { %v1290_v21 = vpop.permute.xlu0 %1289  ;;  %v1294_v8 = vpop.permute.xlu2 %1293 }
 0x211   : > { %v1324_v56 = vmul.f32 %v1290_v21, %v4051_v50  ;;  %v1326_v19 = vmul.f32 %v1294_v8, %v4075_v17  ;;  %v1280_v33 = vpop.permute.xlu1 %1279  ;;  %v4532_v21 = vld [vmem:[%s5848_s5 + $0x40] sm:$0xff]  ;;  %v4539_v8 = vld [vmem:[%s5848_s5 + $0x50] sm:$0xff] }
 0x212   : > { %v1319_v32 = vmul.f32 %v1280_v33, %v3975_v4  ;;  %v1249_v33 = vmul.f32 %v4310_v35, %v3875_v59  ;;  %v4566_v35 = vld [vmem:[%s5848_s5 + $0x68] sm:$0xff] }
 0x213   : > { %1369 = vrot.lane.b32.xlu1 %v1324_v56, %s5911_s30  ;;  %1373 = vrot.lane.b32.xlu0 %v1326_v19, %s5911_s30  ;;  %v1247_v56 = vmul.f32 %v4321_v36, %v3843_v14  ;;  %v4548_v19 = vld [vmem:[%s5848_s5 + $0x18] sm:$0xff]  ;;  %5983 = vst [vmem:[#allocation13_spill] sm:$0xff] %v4566_v35 }
 0x214   : > { %1359 = vrot.lane.b32.xlu2 %v1319_v32, %s5911_s30  ;;  %v4559_v36 = vld [vmem:[%s5848_s5 + $0x58] sm:$0xff] }
 0x215   : > { %5982 = vst [vmem:[#allocation18_spill] sm:$0xff] %v4559_v36 }
 0x219   : > { %v1286_v25 = vpop.permute.xlu1 %1285 }
 0x21a   : > { %v1322_v7 = vmul.f32 %v1286_v25, %v4022_v11 }
 0x21b   : > { %1424 = vrot.lane.b32.xlu1 %v4375_v30, %s3372_s20  ;;  %1428 = vrot.lane.b32.xlu0 %v4382_v37, %s3372_s20 }
 0x21c   : > { %1365 = vrot.lane.b32.xlu2 %v1322_v7, %s5911_s30 }
 0x221   : > { %v1292_v49 = vpop.permute.xlu1 %1291 }
 0x222   : > { %v1325_v20 = vmul.f32 %v1292_v49, %v4057_v9 }
 0x223   : > { %1430 = vrot.lane.b32.xlu1 %v4391_v54, %s3372_s20  ;;  %1434 = vrot.lane.b32.xlu0 %v4398_v55, %s3372_s20 }
 0x224   : > { %1371 = vrot.lane.b32.xlu2 %v1325_v20, %s5911_s30  ;;  %v1248_v20 = vmul.f32 %v4307_v40, %v3859_v42 }
 0x22b   : > { %1436 = vrot.lane.b32.xlu1 %v4406_v12, %s3372_s20  ;;  %1440 = vrot.lane.b32.xlu0 %v4413_v62, %s3372_s20 }
 0x22c   : > { %1426 = vrot.lane.b32.xlu2 %v4420_v23, %s3372_s20 }
 0x233   : > { %1442 = vrot.lane.b32.xlu1 %v4427_v15, %s3372_s20  ;;  %1446 = vrot.lane.b32.xlu0 %v4434_v27, %s3372_s20 }
 0x234   : > { %1432 = vrot.lane.b32.xlu2 %v4441_v24, %s3372_s20 }
 0x23b   : > { %1448 = vrot.lane.b32.xlu1 %v4448_v44, %s3372_s20  ;;  %1452 = vrot.lane.b32.xlu0 %v4455_v52, %s3372_s20 }
 0x23c   : > { %1438 = vrot.lane.b32.xlu2 %v4462_v22, %s3372_s20 }
 0x243   : > { %1454 = vrot.lane.b32.xlu1 %v4469_v31, %s3372_s20  ;;  %1490 = vrot.lane.b32.xlu0 %v4476_v29, %s3373_s27 }
 0x244   : > { %1444 = vrot.lane.b32.xlu2 %v4483_v10, %s3372_s20 }
 0x24b   : > { %1492 = vrot.lane.b32.xlu1 %v4490_v6, %s3373_s27  ;;  %1496 = vrot.lane.b32.xlu0 %v4497_v18, %s3373_s27 }
 0x24c   : > { %1450 = vrot.lane.b32.xlu2 %v4504_v39, %s3372_s20 }
 0x253   : > { %1498 = vrot.lane.b32.xlu1 %v4511_v28, %s3373_s27  ;;  %1502 = vrot.lane.b32.xlu0 %v4518_v43, %s3373_s27 }
 0x254   : > { %1488 = vrot.lane.b32.xlu2 %v4525_v57, %s3373_s27 }
 0x25b   : > { %1504 = vrot.lane.b32.xlu1 %v4532_v21, %s3373_s27  ;;  %1508 = vrot.lane.b32.xlu0 %v4539_v8, %s3373_s27 }
 0x25c   : > { %1494 = vrot.lane.b32.xlu2 %v4548_v19, %s3373_s27 }
 0x25d   : > { %v1344_v32 = vpop.permute.xlu0 %1343 }
 0x25e   : > { %v1391_v25 = vadd.f32 %v1344_v32, %v1247_v56  ;;  %v1348_v7 = vpop.permute.xlu2 %1347  ;;  %v1250_v56 = vmul.f32 %v4327_v60, %v3891_v45  ;;  %v1252_v32 = vmul.f32 %v4317_v46, %v3924_v2  ;;  %v4589_v60 = vld [vmem:[%s5848_s5 + $0x70] sm:$0xff]  ;;  %v1251_v46 = vmul.f32 %v4312_v53, %v3907_v1 }
 0x25f   : > { %v1393_v49 = vadd.f32 %v1348_v7, %v1249_v33  ;;  %v4577_v33 = vld [vmem:[%s5848_s5 + $0x30] sm:$0xff] }
 0x260   : > { %1408 = vst.msk [vmem:[#allocation2] sm:$0xff] %vm1407_vm4, %v1391_v25 }
 0x261   : > { %1410 = vst.msk [vmem:[#allocation2 + $0x10] sm:$0xff] %vm1407_vm4, %v1393_v49 }
 0x263   : > { %1510 = vrot.lane.b32.xlu1 %v4559_v36, %s3373_s27  ;;  %1514 = vrot.lane.b32.xlu0 %v4566_v35, %s3373_s27 }
 0x264   : > { %1500 = vrot.lane.b32.xlu2 %v4577_v33, %s3373_s27 }
 0x265   : > { %v1350_v25 = vpop.permute.xlu0 %1349  ;;  %v1346_v7 = vpop.permute.xlu1 %1345 }
 0x266   : > { %v1394_v49 = vadd.f32 %v1350_v25, %v1250_v56  ;;  %v1354_v35 = vpop.permute.xlu2 %1353  ;;  %v1392_v36 = vadd.f32 %v1346_v7, %v1248_v20  ;;  %v4600_v20 = vld [vmem:[%s5848_s5 + $0x48] sm:$0xff] }
 0x267   : > { %v1396_v40 = vadd.f32 %v1354_v35, %v1252_v32  ;;  %v1253_v35 = vmul.f32 %v4333_v41, %v3941_v0  ;;  %v1254_v41 = vmul.f32 %v4319_v61, %v3958_v5 }
 0x268   : > { %1411 = vst.msk [vmem:[#allocation2 + $0x18] sm:$0xff] %vm1407_vm4, %v1394_v49 }
 0x269   : > { %1413 = vst.msk [vmem:[#allocation2 + $0x28] sm:$0xff] %vm1407_vm4, %v1396_v40  ;;  %v1256_v40 = vmul.f32 %v4338_v34, %v3992_v48  ;;  %v1257_v34 = vmul.f32 %v4325_v3, %v4007_v13 }
 0x26a   : > { %1409 = vst.msk [vmem:[#allocation2 + $0x8] sm:$0xff] %vm1407_vm4, %v1392_v36  ;;  %v1255_v36 = vmul.f32 %v4323_v16, %v3975_v4  ;;  %v4616_v16 = vld [vmem:[%s5848_s5 + $0x60] sm:$0xff] }
 0x26b   : > { %1516 = vrot.lane.b32.xlu1 %v4589_v60, %s3373_s27 }
 0x26c   : > { %1506 = vrot.lane.b32.xlu2 %v4600_v20, %s3373_s27 }
 0x26d   : > { %v1356_v56 = vpop.permute.xlu0 %1355  ;;  %v1352_v32 = vpop.permute.xlu1 %1351 }
 0x26e   : > { %v1397_v25 = vadd.f32 %v1356_v56, %v1253_v35  ;;  %v1360_v7 = vpop.permute.xlu2 %1359  ;;  %v1395_v49 = vadd.f32 %v1352_v32, %v1251_v46  ;;  %v1258_v46 = vmul.f32 %v4329_v58, %v4022_v11  ;;  %v4632_v58 = vld [vmem:[%s5848_s5 + $0x78] sm:$0xff] }
 0x26f   : > { %v1399_v53 = vadd.f32 %v1360_v7, %v1255_v36  ;;  %v1259_v7 = vmul.f32 %v4343_v26, %v4037_v38  ;;  %5984 = vst [vmem:[#allocation12_spill] sm:$0xff] %v4632_v58  ;;  %v1260_v26 = vmul.f32 %v4331_v47, %v4051_v50 }
 0x270   : > { %1414 = vst.msk [vmem:[#allocation2 + $0x30] sm:$0xff] %vm1407_vm4, %v1397_v25 }
 0x271   : > { %1416 = vst.msk [vmem:[#allocation2 + $0x40] sm:$0xff] %vm1407_vm4, %v1399_v53 }
 0x272   : > { %1412 = vst.msk [vmem:[#allocation2 + $0x20] sm:$0xff] %vm1407_vm4, %v1395_v49  ;;  %v1261_v49 = vmul.f32 %v4335_v63, %v4057_v9 }
 0x274   : > { %1512 = vrot.lane.b32.xlu2 %v4616_v16, %s3373_s27 }
 0x275   : > { %v1362_v35 = vpop.permute.xlu0 %1361  ;;  %v1358_v36 = vpop.permute.xlu1 %1357 }
 0x276   : > { %v1400_v56 = vadd.f32 %v1362_v35, %v1256_v40  ;;  %v1366_v32 = vpop.permute.xlu2 %1365  ;;  %v1398_v25 = vadd.f32 %v1358_v36, %v1254_v41  ;;  %v1262_v36 = vmul.f32 %v4349_v51, %v4075_v17 }
 0x277   : > { %v1402_v61 = vadd.f32 %v1366_v32, %v1258_v46 }
 0x278   : > { %1417 = vst.msk [vmem:[#allocation2 + $0x48] sm:$0xff] %vm1407_vm4, %v1400_v56 }
 0x279   : > { %1419 = vst.msk [vmem:[#allocation2 + $0x58] sm:$0xff] %vm1407_vm4, %v1402_v61 }
 0x27a   : > { %1415 = vst.msk [vmem:[#allocation2 + $0x38] sm:$0xff] %vm1407_vm4, %v1398_v25 }
 0x27c   : > { %1518 = vrot.lane.b32.xlu2 %v4632_v58, %s3373_s27 }
 0x27d   : > { %v1368_v53 = vpop.permute.xlu0 %1367  ;;  %v1364_v41 = vpop.permute.xlu1 %1363 }
 0x27e   : > { %v1403_v40 = vadd.f32 %v1368_v53, %v1259_v7  ;;  %v1372_v46 = vpop.permute.xlu2 %1371  ;;  %v1401_v35 = vadd.f32 %v1364_v41, %v1257_v34 }
 0x27f   : > { %v1405_v3 = vadd.f32 %v1372_v46, %v1261_v49 }
 0x280   : > { %1420 = vst.msk [vmem:[#allocation2 + $0x60] sm:$0xff] %vm1407_vm4, %v1403_v40 }
 0x281   : > { %1422 = vst.msk [vmem:[#allocation2 + $0x70] sm:$0xff] %vm1407_vm4, %v1405_v3 }
 0x282   : > { %1418 = vst.msk [vmem:[#allocation2 + $0x50] sm:$0xff] %vm1407_vm4, %v1401_v35 }
 0x285   : > { %v1374_v56 = vpop.permute.xlu0 %1373  ;;  %v1370_v63 = vpop.permute.xlu1 %1369 }
 0x286   : > { %v1406_v32 = vadd.f32 %v1374_v56, %v1262_v36  ;;  %v4645_v25 = vpop.permute.xlu2 %1426  ;;  %v1404_v61 = vadd.f32 %v1370_v63, %v1260_v26 }
 0x288   : > { %1423 = vst.msk [vmem:[#allocation2 + $0x78] sm:$0xff] %vm1407_vm4, %v1406_v32 }
 0x289   : > { %1421 = vst.msk [vmem:[#allocation2 + $0x68] sm:$0xff] %vm1407_vm4, %v1404_v61 }
 0x28d   : > { %v4649_v34 = vpop.permute.xlu0 %1428  ;;  %v4651_v7 = vpop.permute.xlu1 %1424 }
 0x28e   : > { %v4653_v49 = vpop.permute.xlu2 %1432 }
 0x295   : > { %v4655_v47 = vpop.permute.xlu0 %1434  ;;  %v4657_v53 = vpop.permute.xlu1 %1430 }
 0x296   : > { %v4659_v51 = vpop.permute.xlu2 %1438 }
 0x297   : > { %5985 = vst [vmem:[#allocation32_spill] sm:$0xff] %v4659_v51 }
 0x29d   : > { %v4661_v41 = vpop.permute.xlu0 %1440  ;;  %v4663_v40 = vpop.permute.xlu1 %1436 }
 0x29e   : > { %5986 = vst [vmem:[#allocation21_spill] sm:$0xff] %v4663_v40  ;;  %v4665_v46 = vpop.permute.xlu2 %1444 }
 0x29f   : > { %5987 = vst [vmem:[#allocation15_spill] sm:$0xff] %v4665_v46 }
 0x2a5   : > { %v4667_v35 = vpop.permute.xlu0 %1446  ;;  %v4669_v3 = vpop.permute.xlu1 %1442 }
 0x2a6   : > { %5988 = vst [vmem:[#allocation14_spill] sm:$0xff] %v4669_v3  ;;  %v4671_v26 = vpop.permute.xlu2 %1450 }
 0x2a7   : > { %5989 = vst [vmem:[#allocation30_spill] sm:$0xff] %v4671_v26 }
 0x2ad   : > { %v4673_v36 = vpop.permute.xlu0 %1452  ;;  %v4675_v56 = vpop.permute.xlu1 %1448 }
 0x2ae   : > { %5990 = vst [vmem:[#allocation35_spill] sm:$0xff] %v4673_v36  ;;  %v1489_v63 = vpop.permute.xlu2 %1488 }
 0x2af   : > { %5991 = vst [vmem:[#allocation19_spill] sm:$0xff] %v4675_v56  ;;  %v1536_v32 = vmul.f32 %v1489_v63, %v3843_v14 }
 0x2b1   : > { %1568 = vrot.lane.b32.xlu0 %v1536_v32, %s3371_s9 }
 0x2b5   : > { %v1491_v61 = vpop.permute.xlu0 %1490  ;;  %v4679_v51 = vpop.permute.xlu1 %1454 }
 0x2b6   : > { %5992 = vst [vmem:[#allocation17_spill] sm:$0xff] %v4679_v51  ;;  %v1537_v46 = vmul.f32 %v1491_v61, %v3859_v42  ;;  %v1495_v58 = vpop.permute.xlu2 %1494 }
 0x2b7   : > { %v1539_v40 = vmul.f32 %v1495_v58, %v3891_v45 }
 0x2b8   : > { %1570 = vrot.lane.b32.xlu1 %v1537_v46, %s3371_s9 }
 0x2b9   : > { %1574 = vrot.lane.b32.xlu0 %v1539_v40, %s3371_s9 }
 0x2bd   : > { %v1497_v26 = vpop.permute.xlu0 %1496  ;;  %v1493_v3 = vpop.permute.xlu1 %1492 }
 0x2be   : > { %v1540_v56 = vmul.f32 %v1497_v26, %v3907_v1  ;;  %v1501_v36 = vpop.permute.xlu2 %1500  ;;  %v1538_v63 = vmul.f32 %v1493_v3, %v3875_v59 }
 0x2bf   : > { %v1542_v32 = vmul.f32 %v1501_v36, %v3941_v0 }
 0x2c0   : > { %1576 = vrot.lane.b32.xlu1 %v1540_v56, %s3371_s9  ;;  %1572 = vrot.lane.b32.xlu2 %v1538_v63, %s3371_s9 }
 0x2c1   : > { %1580 = vrot.lane.b32.xlu0 %v1542_v32, %s3371_s9 }
 0x2c5   : > { %v1503_v58 = vpop.permute.xlu0 %1502  ;;  %v1499_v61 = vpop.permute.xlu1 %1498 }
 0x2c6   : > { %v1543_v46 = vmul.f32 %v1503_v58, %v3958_v5  ;;  %v1507_v40 = vpop.permute.xlu2 %1506  ;;  %v1541_v51 = vmul.f32 %v1499_v61, %v3924_v2 }
 0x2c7   : > { %v1545_v26 = vmul.f32 %v1507_v40, %v3992_v48 }
 0x2c8   : > { %1582 = vrot.lane.b32.xlu1 %v1543_v46, %s3371_s9  ;;  %1578 = vrot.lane.b32.xlu2 %v1541_v51, %s3371_s9 }
 0x2c9   : > { %1586 = vrot.lane.b32.xlu0 %v1545_v26, %s3371_s9 }
 0x2cd   : > { %v1509_v3 = vpop.permute.xlu0 %1508  ;;  %v1505_v36 = vpop.permute.xlu1 %1504 }
 0x2ce   : > { %v1546_v56 = vmul.f32 %v1509_v3, %v4007_v13  ;;  %v1513_v63 = vpop.permute.xlu2 %1512  ;;  %v1544_v32 = vmul.f32 %v1505_v36, %v3975_v4 }
 0x2cf   : > { %v1548_v58 = vmul.f32 %v1513_v63, %v4037_v38  ;;  %v1474_v63 = vmul.f32 %v4649_v34, %v3875_v59  ;;  %v1472_v34 = vmul.f32 %v4651_v7, %v3843_v14  ;;  %v1480_v7 = vmul.f32 %v4661_v41, %v3975_v4  ;;  %v5995_v41 = vld [vmem:[#allocation21_spill] sm:$0xff] }
 0x2d0   : > { %1588 = vrot.lane.b32.xlu1 %v1546_v56, %s3371_s9  ;;  %1584 = vrot.lane.b32.xlu2 %v1544_v32, %s3371_s9 }
 0x2d1   : > { %1592 = vrot.lane.b32.xlu0 %v1548_v58, %s3371_s9 }
 0x2d5   : > { %v1515_v61 = vpop.permute.xlu0 %1514  ;;  %v1511_v46 = vpop.permute.xlu1 %1510 }
 0x2d6   : > { %v1549_v51 = vmul.f32 %v1515_v61, %v4051_v50  ;;  %v1519_v40 = vpop.permute.xlu2 %1518  ;;  %v1547_v26 = vmul.f32 %v1511_v46, %v4022_v11  ;;  %v1477_v61 = vmul.f32 %v4655_v47, %v3924_v2  ;;  %v1473_v47 = vmul.f32 %v4645_v25, %v3859_v42 }
 0x2d7   : > { %v1551_v3 = vmul.f32 %v1519_v40, %v4075_v17  ;;  %v1476_v25 = vmul.f32 %v4653_v49, %v3907_v1  ;;  %v5996_v49 = vld [vmem:[#allocation12_spill] sm:$0xff] }
 0x2d8   : > { %1594 = vrot.lane.b32.xlu1 %v1549_v51, %s3371_s9  ;;  %1590 = vrot.lane.b32.xlu2 %v1547_v26, %s3371_s9 }
 0x2d9   : > { %1598 = vrot.lane.b32.xlu0 %v1551_v3, %s3371_s9  ;;  %v5993_v3 = vld [vmem:[#allocation18_spill] sm:$0xff] }
 0x2dd   : > { %v1517_v36 = vpop.permute.xlu1 %1516 }
 0x2de   : > { %v1550_v56 = vmul.f32 %v1517_v36, %v4057_v9  ;;  %v5994_v36 = vld [vmem:[#allocation13_spill] sm:$0xff] }
 0x2e0   : > { %1649 = vrot.lane.b32.xlu1 %v4375_v30, %s3373_s27  ;;  %1596 = vrot.lane.b32.xlu2 %v1550_v56, %s3371_s9  ;;  %v1475_v56 = vmul.f32 %v4657_v53, %v3891_v45  ;;  %v1483_v53 = vmul.f32 %v4667_v35, %v4022_v11  ;;  %v5997_v35 = vld [vmem:[#allocation32_spill] sm:$0xff] }
 0x2e1   : > { %1653 = vrot.lane.b32.xlu0 %v4382_v37, %s3373_s27 }
 0x2e8   : > { %1655 = vrot.lane.b32.xlu1 %v4391_v54, %s3373_s27  ;;  %1651 = vrot.lane.b32.xlu2 %v4420_v23, %s3373_s27 }
 0x2e9   : > { %1659 = vrot.lane.b32.xlu0 %v4398_v55, %s3373_s27 }
 0x2f0   : > { %1661 = vrot.lane.b32.xlu1 %v4406_v12, %s3373_s27  ;;  %1657 = vrot.lane.b32.xlu2 %v4441_v24, %s3373_s27 }
 0x2f1   : > { %1665 = vrot.lane.b32.xlu0 %v4413_v62, %s3373_s27 }
 0x2f8   : > { %1667 = vrot.lane.b32.xlu1 %v4427_v15, %s3373_s27  ;;  %1663 = vrot.lane.b32.xlu2 %v4462_v22, %s3373_s27 }
 0x2f9   : > { %1671 = vrot.lane.b32.xlu0 %v4434_v27, %s3373_s27 }
 0x300   : > { %1673 = vrot.lane.b32.xlu1 %v4448_v44, %s3373_s27  ;;  %1669 = vrot.lane.b32.xlu2 %v4483_v10, %s3373_s27 }
 0x301   : > { %1677 = vrot.lane.b32.xlu0 %v4455_v52, %s3373_s27 }
 0x308   : > { %1679 = vrot.lane.b32.xlu1 %v4469_v31, %s3373_s27  ;;  %1675 = vrot.lane.b32.xlu2 %v4504_v39, %s3373_s27  ;;  %s3375_s27 = smov 56  }
 0x309   : > { %1715 = vrot.lane.b32.xlu0 %v4476_v29, %s3372_s20 }
 0x310   : > { %1717 = vrot.lane.b32.xlu1 %v4490_v6, %s3372_s20  ;;  %1713 = vrot.lane.b32.xlu2 %v4525_v57, %s3372_s20 }
 0x311   : > { %1721 = vrot.lane.b32.xlu0 %v4497_v18, %s3372_s20 }
 0x318   : > { %1723 = vrot.lane.b32.xlu1 %v4511_v28, %s3372_s20  ;;  %1719 = vrot.lane.b32.xlu2 %v4548_v19, %s3372_s20 }
 0x319   : > { %1727 = vrot.lane.b32.xlu0 %v4518_v43, %s3372_s20 }
 0x31a   : > { %v1573_v32 = vpop.permute.xlu2 %1572 }
 0x31b   : > { %v1618_v58 = vsub.f32 %v1474_v63, %v1573_v32 }
 0x31d   : > { %1635 = vst.msk [vmem:[#allocation2 + $0x10] sm:$0xff] %vm1632_vm5, %v1618_v58 }
 0x320   : > { %1729 = vrot.lane.b32.xlu1 %v4532_v21, %s3372_s20  ;;  %1725 = vrot.lane.b32.xlu2 %v4577_v33, %s3372_s20 }
 0x321   : > { %1733 = vrot.lane.b32.xlu0 %v4539_v8, %s3372_s20 }
 0x322   : > { %v1579_v46 = vpop.permute.xlu2 %1578 }
 0x323   : > { %v1569_v51 = vpop.permute.xlu0 %1568  ;;  %v1621_v40 = vsub.f32 %v1477_v61, %v1579_v46 }
 0x324   : > { %v1616_v26 = vsub.f32 %v1472_v34, %v1569_v51  ;;  %v1478_v51 = vmul.f32 %v5995_v41, %v3941_v0 }
 0x325   : > { %1638 = vst.msk [vmem:[#allocation2 + $0x28] sm:$0xff] %vm1632_vm5, %v1621_v40 }
 0x326   : > { %1633 = vst.msk [vmem:[#allocation2] sm:$0xff] %vm1632_vm5, %v1616_v26 }
 0x328   : > { %1735 = vrot.lane.b32.xlu1 %v5993_v3, %s3372_s20  ;;  %1731 = vrot.lane.b32.xlu2 %v4600_v20, %s3372_s20 }
 0x329   : > { %1739 = vrot.lane.b32.xlu0 %v5994_v36, %s3372_s20 }
 0x32a   : > { %v1585_v63 = vpop.permute.xlu2 %1584  ;;  %v1571_v32 = vpop.permute.xlu1 %1570 }
 0x32b   : > { %v1575_v58 = vpop.permute.xlu0 %1574  ;;  %v1624_v61 = vsub.f32 %v1480_v7, %v1585_v63  ;;  %v1617_v34 = vsub.f32 %v1473_v47, %v1571_v32  ;;  %v1479_v32 = vmul.f32 %v5997_v35, %v3958_v5 }
 0x32c   : > { %v1619_v46 = vsub.f32 %v1475_v56, %v1575_v58  ;;  %v5998_v58 = vld [vmem:[#allocation35_spill] sm:$0xff] }
 0x32d   : > { %1641 = vst.msk [vmem:[#allocation2 + $0x40] sm:$0xff] %vm1632_vm5, %v1624_v61  ;;  %v1486_v61 = vmul.f32 %v5998_v58, %v4057_v9 }
 0x32e   : > { %1636 = vst.msk [vmem:[#allocation2 + $0x18] sm:$0xff] %vm1632_vm5, %v1619_v46 }
 0x32f   : > { %1634 = vst.msk [vmem:[#allocation2 + $0x8] sm:$0xff] %vm1632_vm5, %v1617_v34  ;;  %v5999_v34 = vld [vmem:[#allocation14_spill] sm:$0xff] }
 0x330   : > { %1741 = vrot.lane.b32.xlu1 %v4589_v60, %s3372_s20  ;;  %1737 = vrot.lane.b32.xlu2 %v4616_v16, %s3372_s20  ;;  %v1481_v46 = vmul.f32 %v5999_v34, %v3992_v48 }
 0x332   : > { %v1591_v40 = vpop.permute.xlu2 %1590  ;;  %v1577_v26 = vpop.permute.xlu1 %1576 }
 0x333   : > { %v1581_v47 = vpop.permute.xlu0 %1580  ;;  %v1627_v7 = vsub.f32 %v1483_v53, %v1591_v40  ;;  %v1620_v56 = vsub.f32 %v1476_v25, %v1577_v26 }
 0x334   : > { %v1622_v63 = vsub.f32 %v1478_v51, %v1581_v47  ;;  %v6000_v47 = vld [vmem:[#allocation15_spill] sm:$0xff] }
 0x335   : > { %1644 = vst.msk [vmem:[#allocation2 + $0x58] sm:$0xff] %vm1632_vm5, %v1627_v7  ;;  %v1482_v7 = vmul.f32 %v6000_v47, %v4007_v13 }
 0x336   : > { %1639 = vst.msk [vmem:[#allocation2 + $0x30] sm:$0xff] %vm1632_vm5, %v1622_v63 }
 0x337   : > { %1637 = vst.msk [vmem:[#allocation2 + $0x20] sm:$0xff] %vm1632_vm5, %v1620_v56  ;;  %v6001_v56 = vld [vmem:[#allocation19_spill] sm:$0xff] }
 0x338   : > { %1743 = vrot.lane.b32.xlu2 %v5996_v49, %s3372_s20  ;;  %v1484_v63 = vmul.f32 %v6001_v56, %v4037_v38  ;;  %s3374_s20 = smov 48  }
 0x33a   : > { %v1597_v25 = vpop.permute.xlu2 %1596  ;;  %v1583_v53 = vpop.permute.xlu1 %1582 }
 0x33b   : > { %v1587_v41 = vpop.permute.xlu0 %1586  ;;  %v1630_v51 = vsub.f32 %v1486_v61, %v1597_v25  ;;  %v1623_v40 = vsub.f32 %v1479_v32, %v1583_v53  ;;  %v6002_v32 = vld [vmem:[#allocation30_spill] sm:$0xff]  ;;  %v6003_v25 = vld [vmem:[#allocation17_spill] sm:$0xff] }
 0x33c   : > { %v1625_v26 = vsub.f32 %v1481_v46, %v1587_v41  ;;  %v1485_v46 = vmul.f32 %v6002_v32, %v4051_v50  ;;  %v1487_v53 = vmul.f32 %v6003_v25, %v4075_v17 }
 0x33d   : > { %1647 = vst.msk [vmem:[#allocation2 + $0x70] sm:$0xff] %vm1632_vm5, %v1630_v51 }
 0x33e   : > { %1642 = vst.msk [vmem:[#allocation2 + $0x48] sm:$0xff] %vm1632_vm5, %v1625_v26 }
 0x33f   : > { %1640 = vst.msk [vmem:[#allocation2 + $0x38] sm:$0xff] %vm1632_vm5, %v1623_v40 }
 0x342   : > { %v4815_v35 = vpop.permute.xlu2 %1651  ;;  %v1589_v58 = vpop.permute.xlu1 %1588 }
 0x343   : > { %v1593_v34 = vpop.permute.xlu0 %1592  ;;  %v1626_v10 = vsub.f32 %v1482_v7, %v1589_v58 }
 0x344   : > { %v1628_v61 = vsub.f32 %v1484_v63, %v1593_v34 }
 0x345   : > { %1643 = vst.msk [vmem:[#allocation2 + $0x50] sm:$0xff] %vm1632_vm5, %v1626_v10 }
 0x346   : > { %1645 = vst.msk [vmem:[#allocation2 + $0x60] sm:$0xff] %vm1632_vm5, %v1628_v61 }
 0x34a   : > { %v4823_v41 = vpop.permute.xlu2 %1657  ;;  %v1595_v51 = vpop.permute.xlu1 %1594 }
 0x34b   : > { %v1599_v40 = vpop.permute.xlu0 %1598  ;;  %v1629_v26 = vsub.f32 %v1485_v46, %v1595_v51 }
 0x34c   : > { %v1631_v47 = vsub.f32 %v1487_v53, %v1599_v40 }
 0x34d   : > { %1646 = vst.msk [vmem:[#allocation2 + $0x68] sm:$0xff] %vm1632_vm5, %v1629_v26 }
 0x34e   : > { %1648 = vst.msk [vmem:[#allocation2 + $0x78] sm:$0xff] %vm1632_vm5, %v1631_v47 }
 0x352   : > { %v4827_v7 = vpop.permute.xlu2 %1663  ;;  %v4829_v10 = vpop.permute.xlu1 %1649 }
 0x353   : > { %v4831_v56 = vpop.permute.xlu0 %1653 }
 0x35a   : > { %v4833_v63 = vpop.permute.xlu2 %1669  ;;  %v4835_v58 = vpop.permute.xlu1 %1655 }
 0x35b   : > { %6004 = vst [vmem:[#allocation41_spill] sm:$0xff] %v4833_v63  ;;  %v4837_v34 = vpop.permute.xlu0 %1659 }
 0x362   : > { %v4839_v61 = vpop.permute.xlu2 %1675  ;;  %v4841_v32 = vpop.permute.xlu1 %1661 }
 0x363   : > { %6005 = vst [vmem:[#allocation27_spill] sm:$0xff] %v4839_v61  ;;  %v4843_v46 = vpop.permute.xlu0 %1665 }
 0x36a   : > { %v1714_v25 = vpop.permute.xlu2 %1713  ;;  %v4845_v53 = vpop.permute.xlu1 %1667 }
 0x36b   : > { %v4847_v51 = vpop.permute.xlu0 %1671  ;;  %v1761_v40 = vmul.f32 %v1714_v25, %v3843_v14 }
 0x36d   : > { %1793 = vrot.lane.b32.xlu0 %v1761_v40, %s5911_s30 }
 0x372   : > { %v1720_v26 = vpop.permute.xlu2 %1719  ;;  %v4851_v47 = vpop.permute.xlu1 %1673 }
 0x373   : > { %v4853_v27 = vpop.permute.xlu0 %1677  ;;  %v1764_v62 = vmul.f32 %v1720_v26, %v3891_v45 }
 0x375   : > { %1799 = vrot.lane.b32.xlu0 %v1764_v62, %s5911_s30 }
 0x37a   : > { %v1726_v44 = vpop.permute.xlu2 %1725  ;;  %v4857_v15 = vpop.permute.xlu1 %1679 }
 0x37b   : > { %v1716_v39 = vpop.permute.xlu0 %1715  ;;  %v1767_v57 = vmul.f32 %v1726_v44, %v3941_v0 }
 0x37c   : > { %v1762_v52 = vmul.f32 %v1716_v39, %v3859_v42 }
 0x37d   : > { %1805 = vrot.lane.b32.xlu0 %v1767_v57, %s5911_s30 }
 0x37e   : > { %1795 = vrot.lane.b32.xlu1 %v1762_v52, %s5911_s30 }
 0x382   : > { %v1732_v25 = vpop.permute.xlu2 %1731  ;;  %v1718_v40 = vpop.permute.xlu1 %1717 }
 0x383   : > { %v1722_v29 = vpop.permute.xlu0 %1721  ;;  %v1770_v6 = vmul.f32 %v1732_v25, %v3992_v48  ;;  %v1763_v26 = vmul.f32 %v1718_v40, %v3875_v59 }
 0x384   : > { %v1765_v62 = vmul.f32 %v1722_v29, %v3907_v1 }
 0x385   : > { %1811 = vrot.lane.b32.xlu0 %v1770_v6, %s5911_s30  ;;  %1797 = vrot.lane.b32.xlu2 %v1763_v26, %s5911_s30 }
 0x386   : > { %1801 = vrot.lane.b32.xlu1 %v1765_v62, %s5911_s30 }
 0x38a   : > { %v1738_v44 = vpop.permute.xlu2 %1737  ;;  %v1724_v39 = vpop.permute.xlu1 %1723 }
 0x38b   : > { %v1728_v57 = vpop.permute.xlu0 %1727  ;;  %v1773_v52 = vmul.f32 %v1738_v44, %v4037_v38  ;;  %v1766_v61 = vmul.f32 %v1724_v39, %v3924_v2 }
 0x38c   : > { %v1768_v63 = vmul.f32 %v1728_v57, %v3958_v5 }
 0x38d   : > { %1817 = vrot.lane.b32.xlu0 %v1773_v52, %s5911_s30  ;;  %1803 = vrot.lane.b32.xlu2 %v1766_v61, %s5911_s30 }
 0x38e   : > { %1807 = vrot.lane.b32.xlu1 %v1768_v63, %s5911_s30 }
 0x392   : > { %v1744_v29 = vpop.permute.xlu2 %1743  ;;  %v1730_v6 = vpop.permute.xlu1 %1729 }
 0x393   : > { %v1734_v25 = vpop.permute.xlu0 %1733  ;;  %v1776_v40 = vmul.f32 %v1744_v29, %v4075_v17  ;;  %v1769_v26 = vmul.f32 %v1730_v6, %v3975_v4 }
 0x394   : > { %v1771_v62 = vmul.f32 %v1734_v25, %v4007_v13 }
 0x395   : > { %1823 = vrot.lane.b32.xlu0 %v1776_v40, %s5911_s30  ;;  %1809 = vrot.lane.b32.xlu2 %v1769_v26, %s5911_s30 }
 0x396   : > { %1813 = vrot.lane.b32.xlu1 %v1771_v62, %s5911_s30 }
 0x39a   : > { %v1736_v44 = vpop.permute.xlu1 %1735 }
 0x39b   : > { %v1740_v39 = vpop.permute.xlu0 %1739  ;;  %v1772_v61 = vmul.f32 %v1736_v44, %v4022_v11 }
 0x39c   : > { %v1774_v63 = vmul.f32 %v1740_v39, %v4051_v50 }
 0x39d   : > { %1878 = vrot.lane.b32.xlu0 %v4382_v37, %s3374_s20  ;;  %1815 = vrot.lane.b32.xlu2 %v1772_v61, %s5911_s30  ;;  %v1697_v37 = vmul.f32 %v4829_v10, %v3843_v14 }
 0x39e   : > { %1819 = vrot.lane.b32.xlu1 %v1774_v63, %s5911_s30 }
 0x3a2   : > { %v1742_v57 = vpop.permute.xlu1 %1741 }
 0x3a3   : > { %v1775_v52 = vmul.f32 %v1742_v57, %v4057_v9 }
 0x3a5   : > { %1884 = vrot.lane.b32.xlu0 %v4398_v55, %s3374_s20  ;;  %1821 = vrot.lane.b32.xlu2 %v1775_v52, %s5911_s30 }
 0x3a6   : > { %1874 = vrot.lane.b32.xlu1 %v4375_v30, %s3374_s20  ;;  %v1699_v30 = vmul.f32 %v4831_v56, %v3875_v59 }
 0x3ad   : > { %1968 = vrot.lane.b32.xlu0 %v5996_v49, %s3375_s27  ;;  %1876 = vrot.lane.b32.xlu2 %v4420_v23, %s3374_s20 }
 0x3ae   : > { %1880 = vrot.lane.b32.xlu1 %v4391_v54, %s3374_s20 }
 0x3b5   : > { %2191 = vrot.lane.b32.xlu0 %v4589_v60, %s3374_s20  ;;  %1882 = vrot.lane.b32.xlu2 %v4441_v24, %s3374_s20  ;;  %v1702_v24 = vmul.f32 %v4837_v34, %v3924_v2 }
 0x3b6   : > { %1886 = vrot.lane.b32.xlu1 %v4406_v12, %s3374_s20 }
 0x3bd   : > { %1962 = vrot.lane.b32.xlu0 %v4616_v16, %s3375_s27  ;;  %1888 = vrot.lane.b32.xlu2 %v4462_v22, %s3374_s20  ;;  %v1700_v22 = vmul.f32 %v4835_v58, %v3891_v45 }
 0x3be   : > { %2193 = vrot.lane.b32.xlu1 %v5996_v49, %s3374_s20 }
 0x3c5   : > { %2185 = vrot.lane.b32.xlu0 %v5993_v3, %s3374_s20  ;;  %1966 = vrot.lane.b32.xlu2 %v4589_v60, %s3375_s27 }
 0x3c6   : > { %1964 = vrot.lane.b32.xlu1 %v5994_v36, %s3375_s27 }
 0x3cd   : > { %1956 = vrot.lane.b32.xlu0 %v4600_v20, %s3375_s27  ;;  %2189 = vrot.lane.b32.xlu2 %v5994_v36, %s3374_s20  ;;  %v1698_v36 = vmul.f32 %v4815_v35, %v3859_v42  ;;  %v1701_v35 = vmul.f32 %v4823_v41, %v3907_v1  ;;  %v1709_v41 = vmul.f32 %v4851_v47, %v4037_v38 }
 0x3ce   : > { %2187 = vrot.lane.b32.xlu1 %v4616_v16, %s3374_s20 }
 0x3d5   : > { %2179 = vrot.lane.b32.xlu0 %v4532_v21, %s3374_s20  ;;  %1960 = vrot.lane.b32.xlu2 %v5993_v3, %s3375_s27  ;;  %v1703_v3 = vmul.f32 %v4841_v32, %v3941_v0 }
 0x3d6   : > { %1958 = vrot.lane.b32.xlu1 %v4539_v8, %s3375_s27 }
 0x3dd   : > { %1950 = vrot.lane.b32.xlu0 %v4577_v33, %s3375_s27  ;;  %2183 = vrot.lane.b32.xlu2 %v4539_v8, %s3374_s20 }
 0x3de   : > { %2181 = vrot.lane.b32.xlu1 %v4600_v20, %s3374_s20 }
 0x3df   : > { %v1794_v54 = vpop.permute.xlu0 %1793  ;;  %v1798_v55 = vpop.permute.xlu2 %1797 }
 0x3e0   : > { %v1841_v12 = vadd.f32 %v1794_v54, %v1697_v37  ;;  %v1843_v23 = vadd.f32 %v1798_v55, %v1699_v30  ;;  %v6007_v37 = vld [vmem:[#allocation27_spill] sm:$0xff] }
 0x3e1   : > { %v1710_v54 = vmul.f32 %v6007_v37, %v4051_v50  ;;  %v6016_v37 = vld [vmem:[#allocation24_spill] sm:$0xff] }
 0x3e2   : > { %1858 = vst.msk [vmem:[#allocation2] sm:$0xff] %vm1857_vm6, %v1841_v12 }
 0x3e3   : > { %1860 = vst.msk [vmem:[#allocation2 + $0x10] sm:$0xff] %vm1857_vm6, %v1843_v23 }
 0x3e5   : > { %1948 = vrot.lane.b32.xlu0 %v4511_v28, %s3375_s27  ;;  %1954 = vrot.lane.b32.xlu2 %v4532_v21, %s3375_s27  ;;  %v1705_v21 = vmul.f32 %v4843_v46, %v3975_v4 }
 0x3e6   : > { %1952 = vrot.lane.b32.xlu1 %v4518_v43, %s3375_s27 }
 0x3e7   : > { %v1800_v8 = vpop.permute.xlu0 %1799  ;;  %v1804_v60 = vpop.permute.xlu2 %1803 }
 0x3e8   : > { %v1844_v20 = vadd.f32 %v1800_v8, %v1700_v22  ;;  %v1846_v16 = vadd.f32 %v1804_v60, %v1702_v24  ;;  %v6008_v24 = vld [vmem:[#allocation25_spill] sm:$0xff] }
 0x3ea   : > { %1861 = vst.msk [vmem:[#allocation2 + $0x18] sm:$0xff] %vm1857_vm6, %v1844_v20 }
 0x3eb   : > { %1863 = vst.msk [vmem:[#allocation2 + $0x28] sm:$0xff] %vm1857_vm6, %v1846_v16 }
 0x3ed   : > { %2173 = vrot.lane.b32.xlu0 %v4511_v28, %s3374_s20  ;;  %2177 = vrot.lane.b32.xlu2 %v4518_v43, %s3374_s20  ;;  %v1708_v43 = vmul.f32 %v4847_v51, %v4022_v11 }
 0x3ee   : > { %2175 = vrot.lane.b32.xlu1 %v4577_v33, %s3374_s20  ;;  %v1706_v33 = vmul.f32 %v4845_v53, %v3992_v48  ;;  %v1704_v53 = vmul.f32 %v4827_v7, %v3958_v5 }
 0x3ef   : > { %v1806_v49 = vpop.permute.xlu0 %1805  ;;  %v1810_v10 = vpop.permute.xlu2 %1809 }
 0x3f0   : > { %v1847_v56 = vadd.f32 %v1806_v49, %v1703_v3  ;;  %v1849_v58 = vadd.f32 %v1810_v10, %v1705_v21  ;;  %v1796_v28 = vpop.permute.xlu1 %1795  ;;  %v6009_v21 = vld [vmem:[#allocation11_spill] sm:$0xff]  ;;  %v6010_v10 = vld [vmem:[#allocation33_spill] sm:$0xff] }
 0x3f1   : > { %v1842_v34 = vadd.f32 %v1796_v28, %v1698_v36 }
 0x3f2   : > { %1864 = vst.msk [vmem:[#allocation2 + $0x30] sm:$0xff] %vm1857_vm6, %v1847_v56 }
 0x3f3   : > { %1866 = vst.msk [vmem:[#allocation2 + $0x40] sm:$0xff] %vm1857_vm6, %v1849_v58 }
 0x3f4   : > { %1859 = vst.msk [vmem:[#allocation2 + $0x8] sm:$0xff] %vm1857_vm6, %v1842_v34 }
 0x3f5   : > { %1946 = vrot.lane.b32.xlu0 %v4497_v18, %s3375_s27  ;;  %1904 = vrot.lane.b32.xlu2 %v4469_v31, %s3374_s20 }
 0x3f6   : > { %2129 = vrot.lane.b32.xlu1 %v4469_v31, %s3375_s27  ;;  %v1711_v31 = vmul.f32 %v4853_v27, %v4057_v9  ;;  %v1712_v27 = vmul.f32 %v4857_v15, %v4075_v17 }
 0x3f7   : > { %v1812_v32 = vpop.permute.xlu0 %1811  ;;  %v1816_v46 = vpop.permute.xlu2 %1815 }
 0x3f8   : > { %v1850_v29 = vadd.f32 %v1812_v32, %v1706_v33  ;;  %v1852_v6 = vadd.f32 %v1816_v46, %v1708_v43  ;;  %v1802_v25 = vpop.permute.xlu1 %1801  ;;  %v6011_v33 = vld [vmem:[#allocation29_spill] sm:$0xff] }
 0x3f9   : > { %v1845_v40 = vadd.f32 %v1802_v25, %v1701_v35 }
 0x3fa   : > { %1867 = vst.msk [vmem:[#allocation2 + $0x48] sm:$0xff] %vm1857_vm6, %v1850_v29  ;;  %v6012_v29 = vld [vmem:[#allocation26_spill] sm:$0xff] }
 0x3fb   : > { %1869 = vst.msk [vmem:[#allocation2 + $0x58] sm:$0xff] %vm1857_vm6, %v1852_v6 }
 0x3fc   : > { %1862 = vst.msk [vmem:[#allocation2 + $0x20] sm:$0xff] %vm1857_vm6, %v1845_v40 }
 0x3fd   : > { %2171 = vrot.lane.b32.xlu0 %v4497_v18, %s3374_s20  ;;  %v6006_v18 = vld [vmem:[#allocation41_spill] sm:$0xff] }
 0x3fe   : > { %v1707_v7 = vmul.f32 %v6006_v18, %v4007_v13 }
 0x3ff   : > { %v1818_v51 = vpop.permute.xlu0 %1817  ;;  %v1822_v26 = vpop.permute.xlu2 %1821 }
 0x400   : > { %v1853_v62 = vadd.f32 %v1818_v51, %v1709_v41  ;;  %v1855_v44 = vadd.f32 %v1822_v26, %v1711_v31  ;;  %v1808_v39 = vpop.permute.xlu1 %1807 }
 0x401   : > { %v1848_v61 = vadd.f32 %v1808_v39, %v1704_v53  ;;  %v6013_v53 = vld [vmem:[#allocation37_spill] sm:$0xff] }
 0x402   : > { %1870 = vst.msk [vmem:[#allocation2 + $0x60] sm:$0xff] %vm1857_vm6, %v1853_v62  ;;  %v6014_v62 = vld [vmem:[#allocation28_spill] sm:$0xff] }
 0x403   : > { %1872 = vst.msk [vmem:[#allocation2 + $0x70] sm:$0xff] %vm1857_vm6, %v1855_v44  ;;  %v6015_v44 = vld [vmem:[#allocation16_spill] sm:$0xff] }
 0x404   : > { %1865 = vst.msk [vmem:[#allocation2 + $0x38] sm:$0xff] %vm1857_vm6, %v1848_v61 }
 0x405   : > { %1944 = vrot.lane.b32.xlu0 %v4548_v19, %s3375_s27 }
 0x407   : > { %v1824_v47 = vpop.permute.xlu0 %1823  ;;  %v5000_v57 = vpop.permute.xlu2 %1876 }
 0x408   : > { %v1856_v63 = vadd.f32 %v1824_v47, %v1712_v27  ;;  %v1814_v52 = vpop.permute.xlu1 %1813 }
 0x409   : > { %v1851_v30 = vadd.f32 %v1814_v52, %v1707_v7 }
 0x40a   : > { %1873 = vst.msk [vmem:[#allocation2 + $0x78] sm:$0xff] %vm1857_vm6, %v1856_v63 }
 0x40b   : > { %1868 = vst.msk [vmem:[#allocation2 + $0x50] sm:$0xff] %vm1857_vm6, %v1851_v30 }
 0x40d   : > { %2169 = vrot.lane.b32.xlu0 %v4548_v19, %s3374_s20 }
 0x40f   : > { %v5008_v15 = vpop.permute.xlu0 %1878  ;;  %v5010_v23 = vpop.permute.xlu2 %1882 }
 0x410   : > { %v1820_v55 = vpop.permute.xlu1 %1819 }
 0x411   : > { %v1854_v12 = vadd.f32 %v1820_v55, %v1710_v54 }
 0x413   : > { %1871 = vst.msk [vmem:[#allocation2 + $0x68] sm:$0xff] %vm1857_vm6, %v1854_v12 }
 0x415   : > { %1942 = vrot.lane.b32.xlu0 %v6008_v24, %s3375_s27 }
 0x417   : > { %v5015_v22 = vpop.permute.xlu0 %1884  ;;  %v5019_v60 = vpop.permute.xlu2 %1888 }
 0x418   : > { %v5017_v8 = vpop.permute.xlu1 %1874 }
 0x41d   : > { %2167 = vrot.lane.b32.xlu0 %v6008_v24, %s3374_s20 }
 0x41f   : > { %v1969_v19 = vpop.permute.xlu0 %1968  ;;  %v1967_v3 = vpop.permute.xlu2 %1966 }
 0x420   : > { %v2001_v20 = vmul.f32 %v1969_v19, %v4075_v17  ;;  %v5024_v16 = vpop.permute.xlu1 %1880  ;;  %v2000_v58 = vmul.f32 %v1967_v3, %v4057_v9  ;;  %v6017_v3 = vld [vmem:[#allocation39_spill] sm:$0xff] }
 0x422   : > { %2048 = vrot.lane.b32.xlu2 %v2001_v20, %s3371_s9 }
 0x425   : > { %1940 = vrot.lane.b32.xlu0 %v6009_v21, %s3375_s27 }
 0x427   : > { %v2192_v36 = vpop.permute.xlu0 %2191  ;;  %v2190_v28 = vpop.permute.xlu2 %2189 }
 0x428   : > { %v5029_v49 = vpop.permute.xlu1 %1886  ;;  %v2225_v31 = vmul.f32 %v2192_v36, %v4057_v9  ;;  %v2224_v7 = vmul.f32 %v2190_v28, %v4051_v50 }
 0x42a   : > { %1902 = vrot.lane.b32.xlu2 %v6010_v10, %s3374_s20 }
 0x42d   : > { %2165 = vrot.lane.b32.xlu0 %v6009_v21, %s3374_s20 }
 0x42f   : > { %v1963_v56 = vpop.permute.xlu0 %1962  ;;  %v1961_v46 = vpop.permute.xlu2 %1960 }
 0x430   : > { %v2194_v34 = vpop.permute.xlu1 %2193  ;;  %v1998_v27 = vmul.f32 %v1963_v56, %v4037_v38  ;;  %v1997_v12 = vmul.f32 %v1961_v46, %v4022_v11 }
 0x431   : > { %v2226_v43 = vmul.f32 %v2194_v34, %v4075_v17 }
 0x432   : > { %2046 = vrot.lane.b32.xlu2 %v2000_v58, %s3371_s9 }
 0x433   : > { %2273 = vrot.lane.b32.xlu1 %v2226_v43, %s5911_s30 }
 0x435   : > { %1938 = vrot.lane.b32.xlu0 %v6011_v33, %s3375_s27 }
 0x437   : > { %v2186_v35 = vpop.permute.xlu0 %2185  ;;  %v2184_v41 = vpop.permute.xlu2 %2183 }
 0x438   : > { %v1965_v32 = vpop.permute.xlu1 %1964  ;;  %v2222_v58 = vmul.f32 %v2186_v35, %v4022_v11 }
 0x439   : > { %v1999_v25 = vmul.f32 %v1965_v32, %v4051_v50 }
 0x43a   : > { %1900 = vrot.lane.b32.xlu2 %v6012_v29, %s3374_s20 }
 0x43b   : > { %2127 = vrot.lane.b32.xlu1 %v6010_v10, %s3375_s27 }
 0x43d   : > { %2163 = vrot.lane.b32.xlu0 %v6011_v33, %s3374_s20 }
 0x43f   : > { %v5047_v6 = vpop.permute.xlu0 %1956  ;;  %v1955_v39 = vpop.permute.xlu2 %1954 }
 0x440   : > { %v2188_v40 = vpop.permute.xlu1 %2187 }
 0x441   : > { %v2223_v19 = vmul.f32 %v2188_v40, %v4037_v38  ;;  %v2221_v40 = vmul.f32 %v2184_v41, %v4007_v13 }
 0x442   : > { %2044 = vrot.lane.b32.xlu2 %v1999_v25, %s3371_s9 }
 0x443   : > { %2271 = vrot.lane.b32.xlu1 %v2225_v31, %s5911_s30 }
 0x445   : > { %2117 = vrot.lane.b32.xlu0 %v6013_v53, %s3375_s27 }
 0x447   : > { %v2180_v51 = vpop.permute.xlu0 %2179  ;;  %v2178_v52 = vpop.permute.xlu2 %2177 }
 0x448   : > { %v1959_v26 = vpop.permute.xlu1 %1958  ;;  %v2219_v47 = vmul.f32 %v2180_v51, %v3975_v4  ;;  %v2218_v54 = vmul.f32 %v2178_v52, %v3958_v5  ;;  %v1994_v51 = vmul.f32 %v1955_v39, %v3975_v4 }
 0x449   : > { %v1996_v56 = vmul.f32 %v1959_v26, %v4007_v13 }
 0x44a   : > { %1898 = vrot.lane.b32.xlu2 %v6014_v62, %s3374_s20 }
 0x44b   : > { %2125 = vrot.lane.b32.xlu1 %v6012_v29, %s3375_s27 }
 0x44d   : > { %1890 = vrot.lane.b32.xlu0 %v6015_v44, %s3374_s20 }
 0x44f   : > { %v5061_v61 = vpop.permute.xlu0 %1950  ;;  %v1905_v34 = vpop.permute.xlu2 %1904 }
 0x450   : > { %v2182_v18 = vpop.permute.xlu1 %2181  ;;  %v1937_v33 = vmul.f32 %v1905_v34, %v4075_v17 }
 0x451   : > { %v2220_v29 = vmul.f32 %v2182_v18, %v3992_v48 }
 0x452   : > { %2042 = vrot.lane.b32.xlu2 %v1998_v27, %s3371_s9 }
 0x453   : > { %2269 = vrot.lane.b32.xlu1 %v2224_v7, %s5911_s30  ;;  %v3264_v7 = vld [vmem:[%s5847_s4 + $0x40] sm:$0xff] }
 0x455   : > { %2259 = vrot.lane.b32.xlu0 %v2219_v47, %s5911_s30 }
 0x457   : > { %v5069_v63 = vpop.permute.xlu0 %1948 }
 0x458   : > { %v1953_v30 = vpop.permute.xlu1 %1952 }
 0x459   : > { %v1993_v39 = vmul.f32 %v1953_v30, %v3958_v5  ;;  %v1992_v30 = vmul.f32 %v5061_v61, %v3941_v0 }
 0x45a   : > { %1896 = vrot.lane.b32.xlu2 %v6016_v37, %s3374_s20 }
 0x45b   : > { %2123 = vrot.lane.b32.xlu1 %v6014_v62, %s3375_s27  ;;  %v1995_v62 = vmul.f32 %v5047_v6, %v3992_v48  ;;  %v3263_v6 = vld [vmem:[%s5847_s4 + $0x8] sm:$0xff] }
 0x45d   : > { %2257 = vrot.lane.b32.xlu0 %v2218_v54, %s5911_s30  ;;  %v3265_v54 = vld [vmem:[%s5847_s4 + $0x38] sm:$0xff] }
 0x45f   : > { %v2174_v55 = vpop.permute.xlu0 %2173 }
 0x460   : > { %v2176_v24 = vpop.permute.xlu1 %2175  ;;  %v2216_v36 = vmul.f32 %v2174_v55, %v3924_v2 }
 0x461   : > { %v2217_v20 = vmul.f32 %v2176_v24, %v3941_v0 }
 0x462   : > { %2040 = vrot.lane.b32.xlu2 %v1997_v12, %s3371_s9 }
 0x463   : > { %2267 = vrot.lane.b32.xlu1 %v2223_v19, %s5911_s30 }
 0x465   : > { %2255 = vrot.lane.b32.xlu0 %v2217_v20, %s5911_s30  ;;  %v1991_v20 = vmul.f32 %v5069_v63, %v3924_v2 }
 0x467   : > { %v5083_v21 = vpop.permute.xlu0 %1946 }
 0x468   : > { %v2130_v12 = vpop.permute.xlu1 %2129  ;;  %v1990_v63 = vmul.f32 %v5083_v21, %v3907_v1 }
 0x46a   : > { %1894 = vrot.lane.b32.xlu2 %v6017_v3, %s3374_s20 }
 0x46b   : > { %2121 = vrot.lane.b32.xlu1 %v6016_v37, %s3375_s27 }
 0x46d   : > { %2253 = vrot.lane.b32.xlu0 %v2216_v36, %s5911_s30  ;;  %v2162_v36 = vmul.f32 %v2130_v12, %v4075_v17  ;;  %v3267_v17 = vld [vmem:[%s5847_s4 + $0x28] sm:$0xff] }
 0x46f   : > { %v2172_v10 = vpop.permute.xlu0 %2171 }
 0x470   : > { %v2215_v28 = vmul.f32 %v2172_v10, %v3907_v1 }
 0x472   : > { %2038 = vrot.lane.b32.xlu2 %v1996_v56, %s3371_s9 }
 0x473   : > { %2265 = vrot.lane.b32.xlu1 %v2222_v58, %s5911_s30 }
 0x475   : > { %2251 = vrot.lane.b32.xlu0 %v2215_v28, %s5911_s30 }
 0x477   : > { %v5097_v43 = vpop.permute.xlu0 %1944 }
 0x47a   : > { %1892 = vrot.lane.b32.xlu2 %v6013_v53, %s3374_s20 }
 0x47b   : > { %2119 = vrot.lane.b32.xlu1 %v6017_v3, %s3375_s27  ;;  %v3266_v3 = vld [vmem:[%s5847_s4 + $0x30] sm:$0xff] }
 0x47c   : > { %v2049_v35 = vpop.permute.xlu2 %2048 }
 0x47d   : > { %v2081_v32 = vsub.f32 %v1937_v33, %v2049_v35 }
 0x47f   : > { %2098 = vst.msk [vmem:[#allocation2 + $0x78] sm:$0xff] %vm2082_vm7, %v2081_v32  ;;  %v2170_v46 = vpop.permute.xlu0 %2169 }
 0x480   : > { %v2214_v25 = vmul.f32 %v2170_v46, %v3891_v45 }
 0x482   : > { %2261 = vrot.lane.b32.xlu2 %v2220_v29, %s5911_s30  ;;  %2249 = vrot.lane.b32.xlu0 %v2214_v25, %s5911_s30  ;;  %v1989_v29 = vmul.f32 %v5097_v43, %v3891_v45  ;;  %v3268_v25 = vld [vmem:[%s5847_s4 + $0x20] sm:$0xff]  ;;  %v3269_v43 = vld [vmem:[%s5847_s4 + $0x10] sm:$0xff] }
 0x483   : > { %2263 = vrot.lane.b32.xlu1 %v2221_v40, %s5911_s30 }
 0x484   : > { %v1903_v31 = vpop.permute.xlu2 %1902 }
 0x485   : > { %v1936_v41 = vmul.f32 %v1903_v31, %v4057_v9 }
 0x487   : > { %v1943_v53 = vpop.permute.xlu0 %1942 }
 0x488   : > { %v1988_v26 = vmul.f32 %v1943_v53, %v3875_v59 }
 0x48a   : > { %2034 = vrot.lane.b32.xlu2 %v1994_v51, %s3371_s9  ;;  %2022 = vrot.lane.b32.xlu0 %v1988_v26, %s3371_s9 }
 0x48b   : > { %2036 = vrot.lane.b32.xlu1 %v1995_v62, %s3371_s9 }
 0x48c   : > { %v2047_v44 = vpop.permute.xlu2 %2046 }
 0x48d   : > { %v2080_v27 = vsub.f32 %v1936_v41, %v2047_v44  ;;  %v3270_v41 = vld [vmem:[%s5847_s4 + $0x18] sm:$0xff] }
 0x48f   : > { %2097 = vst.msk [vmem:[#allocation2 + $0x70] sm:$0xff] %vm2082_vm7, %v2080_v27  ;;  %v5120_v18 = vpop.permute.xlu0 %2167 }
 0x490   : > { %v2213_v12 = vmul.f32 %v5120_v18, %v3875_v59  ;;  %v3271_v18 = vld [vmem:[%s5847_s4] sm:$0xff] }
 0x492   : > { %2032 = vrot.lane.b32.xlu2 %v1993_v39, %s3371_s9  ;;  %2101 = vrot.lane.b32.xlu0 %v3263_v6, %s3375_s27 }
 0x493   : > { %2115 = vrot.lane.b32.xlu1 %v3264_v7, %s3375_s27 }
 0x494   : > { %v1901_v47 = vpop.permute.xlu2 %1900 }
 0x495   : > { %v1935_v37 = vmul.f32 %v1901_v47, %v4051_v50 }
 0x497   : > { %v5132_v52 = vpop.permute.xlu0 %1940 }
 0x49a   : > { %2030 = vrot.lane.b32.xlu2 %v1992_v30, %s3371_s9 }
 0x49b   : > { %2113 = vrot.lane.b32.xlu1 %v3265_v54, %s3375_s27 }
 0x49c   : > { %v2045_v55 = vpop.permute.xlu2 %2044 }
 0x49d   : > { %v2079_v24 = vsub.f32 %v1935_v37, %v2045_v55 }
 0x49f   : > { %2096 = vst.msk [vmem:[#allocation2 + $0x68] sm:$0xff] %vm2082_vm7, %v2079_v24  ;;  %v2166_v19 = vpop.permute.xlu0 %2165 }
 0x4a0   : > { %v2212_v61 = vmul.f32 %v2166_v19, %v3859_v42 }
 0x4a2   : > { %2028 = vrot.lane.b32.xlu2 %v1991_v20, %s3371_s9  ;;  %2245 = vrot.lane.b32.xlu0 %v2212_v61, %s5911_s30 }
 0x4a3   : > { %2111 = vrot.lane.b32.xlu1 %v3266_v3, %s3375_s27  ;;  %v1987_v3 = vmul.f32 %v5132_v52, %v3859_v42 }
 0x4a4   : > { %v1899_v10 = vpop.permute.xlu2 %1898 }
 0x4a5   : > { %v2274_v56 = vpop.permute.xlu1 %2273  ;;  %v1934_v33 = vmul.f32 %v1899_v10, %v4037_v38 }
 0x4a6   : > { %v2306_v58 = vadd.f32 %v2274_v56, %v2162_v36 }
 0x4a7   : > { %v1939_v28 = vpop.permute.xlu0 %1938 }
 0x4a8   : > { %2323 = vst.msk [vmem:[#allocation2 + $0x78] sm:$0xff] %vm2307_vm8, %v2306_v58  ;;  %v1986_v34 = vmul.f32 %v1939_v28, %v3843_v14 }
 0x4aa   : > { %2026 = vrot.lane.b32.xlu2 %v1990_v63, %s3371_s9  ;;  %2018 = vrot.lane.b32.xlu0 %v1986_v34, %s3371_s9 }
 0x4ab   : > { %2109 = vrot.lane.b32.xlu1 %v3267_v17, %s3375_s27 }
 0x4ac   : > { %v2043_v35 = vpop.permute.xlu2 %2042 }
 0x4ad   : > { %v2078_v32 = vsub.f32 %v1934_v33, %v2043_v35  ;;  %v2128_v46 = vpop.permute.xlu1 %2127 }
 0x4ae   : > { %v2161_v40 = vmul.f32 %v2128_v46, %v4057_v9 }
 0x4af   : > { %2095 = vst.msk [vmem:[#allocation2 + $0x60] sm:$0xff] %vm2082_vm7, %v2078_v32  ;;  %v2164_v21 = vpop.permute.xlu0 %2163  ;;  %v5188_v7 = vld [vmem:[#allocation2 + $0x78] sm:$0xff] }
 0x4b0   : > { %v2211_v28 = vmul.f32 %v2164_v21, %v3843_v14 }
 0x4b2   : > { %2024 = vrot.lane.b32.xlu2 %v1989_v29, %s3371_s9 }
 0x4b3   : > { %2107 = vrot.lane.b32.xlu1 %v3268_v25, %s3375_s27 }
 0x4b4   : > { %v1897_v31 = vpop.permute.xlu2 %1896 }
 0x4b5   : > { %v2272_v53 = vpop.permute.xlu1 %2271  ;;  %v1933_v62 = vmul.f32 %v1897_v31, %v4022_v11 }
 0x4b6   : > { %v2305_v51 = vadd.f32 %v2272_v53, %v2161_v40  ;;  %v1929_v40 = vmul.f32 %v5019_v60, %v3958_v5 }
 0x4b7   : > { %v5173_v26 = vpop.permute.xlu0 %2117 }
 0x4b8   : > { %2322 = vst.msk [vmem:[#allocation2 + $0x70] sm:$0xff] %vm2307_vm8, %v2305_v51 }
 0x4ba   : > { %2103 = vrot.lane.b32.xlu2 %v3269_v43, %s3375_s27 }
 0x4bb   : > { %2105 = vrot.lane.b32.xlu1 %v3270_v41, %s3375_s27 }
 0x4bc   : > { %v2041_v9 = vpop.permute.xlu2 %2040 }
 0x4bd   : > { %v2077_v44 = vsub.f32 %v1933_v62, %v2041_v9  ;;  %v2126_v27 = vpop.permute.xlu1 %2125  ;;  %v1928_v62 = vmul.f32 %v5029_v49, %v3941_v0  ;;  %v1927_v49 = vmul.f32 %v5015_v22, %v3924_v2 }
 0x4be   : > { %v2160_v47 = vmul.f32 %v2126_v27, %v4051_v50 }
 0x4bf   : > { %2094 = vst.msk [vmem:[#allocation2 + $0x58] sm:$0xff] %vm2082_vm7, %v2077_v44  ;;  %v1891_v39 = vpop.permute.xlu0 %1890  ;;  %v5186_v6 = vld [vmem:[#allocation2 + $0x70] sm:$0xff] }
 0x4c0   : > { %v1930_v35 = vmul.f32 %v1891_v39, %v3975_v4 }
 0x4c2   : > { %2658 = vrot.lane.b32.xlu2 %v5186_v6, %s3376_s19 }
 0x4c3   : > { %2660 = vrot.lane.b32.xlu1 %v5188_v7, %s3376_s19 }
 0x4c4   : > { %v1895_v30 = vpop.permute.xlu2 %1894 }
 0x4c5   : > { %v2270_v37 = vpop.permute.xlu1 %2269  ;;  %v1932_v24 = vmul.f32 %v1895_v30, %v4007_v13 }
 0x4c6   : > { %v2304_v54 = vadd.f32 %v2270_v37, %v2160_v47  ;;  %v1924_v47 = vmul.f32 %v5008_v15, %v3875_v59  ;;  %v1926_v15 = vmul.f32 %v5010_v23, %v3907_v1  ;;  %v1925_v23 = vmul.f32 %v5024_v16, %v3891_v45 }
 0x4c7   : > { %v5195_v55 = vpop.permute.xlu0 %2259 }
 0x4c8   : > { %2321 = vst.msk [vmem:[#allocation2 + $0x68] sm:$0xff] %vm2307_vm8, %v2304_v54 }
 0x4ca   : > { %2386 = vrot.lane.b32.xlu2 %v5188_v7, %s3377_s29 }
 0x4cb   : > { %2247 = vrot.lane.b32.xlu1 %v2213_v12, %s5911_s30 }
 0x4cc   : > { %v2039_v19 = vpop.permute.xlu2 %2038 }
 0x4cd   : > { %v2076_v50 = vsub.f32 %v1932_v24, %v2039_v19  ;;  %v2124_v20 = vpop.permute.xlu1 %2123  ;;  %v2156_v19 = vmul.f32 %v5173_v26, %v3992_v48 }
 0x4ce   : > { %v2159_v36 = vmul.f32 %v2124_v20, %v4037_v38 }
 0x4cf   : > { %2093 = vst.msk [vmem:[#allocation2 + $0x50] sm:$0xff] %vm2082_vm7, %v2076_v50  ;;  %v5205_v61 = vpop.permute.xlu0 %2257  ;;  %v5220_v52 = vld [vmem:[#allocation2 + $0x68] sm:$0xff] }
 0x4d2   : > { %2099 = vrot.lane.b32.xlu2 %v3271_v18, %s3375_s27 }
 0x4d3   : > { %2020 = vrot.lane.b32.xlu1 %v1987_v3, %s3371_s9  ;;  %s3378_s9 = smov 96  }
 0x4d4   : > { %v1893_v10 = vpop.permute.xlu2 %1892 }
 0x4d5   : > { %v2268_v56 = vpop.permute.xlu1 %2267 }
 0x4d6   : > { %v2303_v58 = vadd.f32 %v2268_v56, %v2159_v36 }
 0x4d7   : > { %v5217_v63 = vpop.permute.xlu0 %2255 }
 0x4d8   : > { %2320 = vst.msk [vmem:[#allocation2 + $0x60] sm:$0xff] %vm2307_vm8, %v2303_v58 }
 0x4da   : > { %2243 = vrot.lane.b32.xlu2 %v2211_v28, %s5911_s30 }
 0x4db   : > { %2656 = vrot.lane.b32.xlu1 %v5220_v52, %s3376_s19 }
 0x4dc   : > { %v2262_v34 = vpop.permute.xlu2 %2261 }
 0x4dd   : > { %v2122_v33 = vpop.permute.xlu1 %2121  ;;  %v2300_v3 = vadd.f32 %v2262_v34, %v2156_v19 }
 0x4de   : > { %v2158_v32 = vmul.f32 %v2122_v33, %v4022_v11 }
 0x4df   : > { %v5224_v17 = vld [vmem:[#allocation2 + $0x60] sm:$0xff]  ;;  %v5228_v38 = vpop.permute.xlu0 %2253 }
 0x4e0   : > { %2654 = vrot.lane.b32.xlu0 %v5224_v17, %s3376_s19 }
 0x4e3   : > { %2384 = vrot.lane.b32.xlu1 %v5186_v6, %s3377_s29 }
 0x4e4   : > { %v2035_v46 = vpop.permute.xlu2 %2034 }
 0x4e5   : > { %v2074_v21 = vsub.f32 %v1930_v35, %v2035_v46  ;;  %v2266_v29 = vpop.permute.xlu1 %2265 }
 0x4e6   : > { %v2302_v25 = vadd.f32 %v2266_v29, %v2158_v32 }
 0x4e7   : > { %2091 = vst.msk [vmem:[#allocation2 + $0x40] sm:$0xff] %vm2082_vm7, %v2074_v21  ;;  %v5242_v31 = vpop.permute.xlu0 %2251 }
 0x4e8   : > { %2319 = vst.msk [vmem:[#allocation2 + $0x58] sm:$0xff] %vm2307_vm8, %v2302_v25  ;;  %2380 = vrot.lane.b32.xlu0 %v5224_v17, %s3377_s29 }
 0x4eb   : > { %2382 = vrot.lane.b32.xlu1 %v5220_v52, %s3377_s29 }
 0x4ec   : > { %v2033_v11 = vpop.permute.xlu2 %2032 }
 0x4ed   : > { %v2073_v53 = vsub.f32 %v1929_v40, %v2033_v11  ;;  %v2120_v51 = vpop.permute.xlu1 %2119 }
 0x4ee   : > { %v2157_v60 = vmul.f32 %v2120_v51, %v4007_v13  ;;  %v1931_v13 = vmul.f32 %v1893_v10, %v3992_v48 }
 0x4ef   : > { %2090 = vst.msk [vmem:[#allocation2 + $0x38] sm:$0xff] %vm2082_vm7, %v2073_v53  ;;  %v5245_v43 = vld [vmem:[#allocation2 + $0x58] sm:$0xff] }
 0x4f0   : > { %2652 = vrot.lane.b32.xlu2 %v5245_v43, %s3376_s19 }
 0x4f4   : > { %v2031_v41 = vpop.permute.xlu2 %2030  ;;  %v5252_v9 = vpop.permute.xlu0 %2249 }
 0x4f5   : > { %v2072_v44 = vsub.f32 %v1928_v62, %v2031_v41  ;;  %v2264_v27 = vpop.permute.xlu1 %2263 }
 0x4f6   : > { %v2301_v39 = vadd.f32 %v2264_v27, %v2157_v60 }
 0x4f7   : > { %2089 = vst.msk [vmem:[#allocation2 + $0x30] sm:$0xff] %vm2082_vm7, %v2072_v44 }
 0x4f8   : > { %2318 = vst.msk [vmem:[#allocation2 + $0x50] sm:$0xff] %vm2307_vm8, %v2301_v39  ;;  %2378 = vrot.lane.b32.xlu2 %v5245_v43, %s3377_s29 }
 0x4fc   : > { %v2029_v30 = vpop.permute.xlu2 %2028  ;;  %v2023_v37 = vpop.permute.xlu0 %2022 }
 0x4fd   : > { %v2071_v54 = vsub.f32 %v1927_v49, %v2029_v30  ;;  %v2068_v12 = vsub.f32 %v1924_v47, %v2023_v37  ;;  %v2037_v24 = vpop.permute.xlu1 %2036  ;;  %v1923_v30 = vmul.f32 %v5000_v57, %v3859_v42 }
 0x4fe   : > { %v2075_v50 = vsub.f32 %v1931_v13, %v2037_v24 }
 0x4ff   : > { %2088 = vst.msk [vmem:[#allocation2 + $0x28] sm:$0xff] %vm2082_vm7, %v2071_v54  ;;  %v5266_v20 = vld [vmem:[#allocation2 + $0x50] sm:$0xff] }
 0x500   : > { %2085 = vst.msk [vmem:[#allocation2 + $0x10] sm:$0xff] %vm2082_vm7, %v2068_v12  ;;  %2650 = vrot.lane.b32.xlu1 %v5266_v20, %s3376_s19 }
 0x501   : > { %2092 = vst.msk [vmem:[#allocation2 + $0x48] sm:$0xff] %vm2082_vm7, %v2075_v50 }
 0x502   : > { %2317 = vst.msk [vmem:[#allocation2 + $0x48] sm:$0xff] %vm2307_vm8, %v2300_v3 }
 0x504   : > { %v2027_v22 = vpop.permute.xlu2 %2026  ;;  %v5287_v56 = vpop.permute.xlu0 %2101 }
 0x505   : > { %v2070_v48 = vsub.f32 %v1926_v15, %v2027_v22  ;;  %v2116_v26 = vpop.permute.xlu1 %2115  ;;  %v2148_v37 = vmul.f32 %v5287_v56, %v3859_v42 }
 0x506   : > { %v2155_v18 = vmul.f32 %v2116_v26, %v3975_v4 }
 0x507   : > { %2087 = vst.msk [vmem:[#allocation2 + $0x20] sm:$0xff] %vm2082_vm7, %v2070_v48 }
 0x508   : > { %v2299_v36 = vadd.f32 %v5195_v55, %v2155_v18  ;;  %2376 = vrot.lane.b32.xlu1 %v5266_v20, %s3377_s29 }
 0x509   : > { %v5280_v10 = vld [vmem:[#allocation2 + $0x48] sm:$0xff] }
 0x50a   : > { %2316 = vst.msk [vmem:[#allocation2 + $0x40] sm:$0xff] %vm2307_vm8, %v2299_v36  ;;  %2648 = vrot.lane.b32.xlu0 %v5280_v10, %s3376_s19 }
 0x50c   : > { %v2025_v4 = vpop.permute.xlu2 %2024 }
 0x50d   : > { %v2069_v58 = vsub.f32 %v1925_v23, %v2025_v4  ;;  %v2114_v28 = vpop.permute.xlu1 %2113 }
 0x50e   : > { %v2154_v55 = vmul.f32 %v2114_v28, %v3958_v5 }
 0x50f   : > { %2086 = vst.msk [vmem:[#allocation2 + $0x18] sm:$0xff] %vm2082_vm7, %v2069_v58 }
 0x510   : > { %v2298_v34 = vadd.f32 %v5205_v61, %v2154_v55  ;;  %v1922_v61 = vmul.f32 %v5017_v8, %v3843_v14 }
 0x511   : > { %v5292_v33 = vld [vmem:[#allocation2 + $0x40] sm:$0xff] }
 0x512   : > { %2315 = vst.msk [vmem:[#allocation2 + $0x38] sm:$0xff] %vm2307_vm8, %v2298_v34  ;;  %2374 = vrot.lane.b32.xlu0 %v5280_v10, %s3377_s29  ;;  %2646 = vrot.lane.b32.xlu2 %v5292_v33, %s3376_s19 }
 0x514   : > { %v2104_v16 = vpop.permute.xlu2 %2103  ;;  %v2246_v35 = vpop.permute.xlu0 %2245 }
 0x515   : > { %v2112_v32 = vpop.permute.xlu1 %2111  ;;  %v2292_v24 = vadd.f32 %v2246_v35, %v2148_v37 }
 0x516   : > { %v2153_v46 = vmul.f32 %v2112_v32, %v3941_v0 }
 0x518   : > { %v2297_v5 = vadd.f32 %v5217_v63, %v2153_v46 }
 0x519   : > { %v5301_v21 = vld [vmem:[#allocation2 + $0x38] sm:$0xff] }
 0x51a   : > { %2314 = vst.msk [vmem:[#allocation2 + $0x30] sm:$0xff] %vm2307_vm8, %v2297_v5  ;;  %2372 = vrot.lane.b32.xlu2 %v5292_v33, %s3377_s29  ;;  %2644 = vrot.lane.b32.xlu1 %v5301_v21, %s3376_s19 }
 0x51c   : > { %v2019_v29 = vpop.permute.xlu0 %2018  ;;  %v5310_v25 = vpop.permute.xlu2 %2658 }
 0x51d   : > { %v2066_v40 = vsub.f32 %v1922_v61, %v2019_v29  ;;  %v2110_v0 = vpop.permute.xlu1 %2109 }
 0x51e   : > { %v2152_v63 = vmul.f32 %v2110_v0, %v3924_v2 }
 0x51f   : > { %2083 = vst.msk [vmem:[#allocation2] sm:$0xff] %vm2082_vm7, %v2066_v40 }
 0x520   : > { %v2296_v11 = vadd.f32 %v5228_v38, %v2152_v63 }
 0x521   : > { %v5315_v53 = vld [vmem:[#allocation2 + $0x30] sm:$0xff] }
 0x522   : > { %2313 = vst.msk [vmem:[#allocation2 + $0x28] sm:$0xff] %vm2307_vm8, %v2296_v11  ;;  %2370 = vrot.lane.b32.xlu1 %v5301_v21, %s3377_s29  ;;  %2642 = vrot.lane.b32.xlu0 %v5315_v53, %s3376_s19 }
 0x524   : > { %v2387_v8 = vpop.permute.xlu2 %2386 }
 0x525   : > { %v2108_v51 = vpop.permute.xlu1 %2107  ;;  %3007 = vmatpush.xpose.msk.msra.mxu1 %vm2388_vm9, %v2387_v8  ;;  %3097 = vmatpush.xpose.msk.msra.mxu3 %vm2388_vm9, %v2387_v8 }
 0x526   : > { %v2151_v2 = vmul.f32 %v2108_v51, %v3907_v1 }
 0x528   : > { %v2295_v38 = vadd.f32 %v5242_v31, %v2151_v2 }
 0x529   : > { %v5326_v62 = vld [vmem:[#allocation2 + $0x28] sm:$0xff] }
 0x52a   : > { %2312 = vst.msk [vmem:[#allocation2 + $0x20] sm:$0xff] %vm2307_vm8, %v2295_v38  ;;  %2368 = vrot.lane.b32.xlu0 %v5315_v53, %s3377_s29  ;;  %2640 = vrot.lane.b32.xlu2 %v5326_v62, %s3376_s19 }
 0x52c   : > { %v2100_v60 = vpop.permute.xlu2 %2099 }
 0x52d   : > { %v2106_v41 = vpop.permute.xlu1 %2105  ;;  %v2147_v1 = vmul.f32 %v2100_v60, %v3843_v14  ;;  %v2149_v14 = vmul.f32 %v2104_v16, %v3875_v59 }
 0x52e   : > { %v2150_v44 = vmul.f32 %v2106_v41, %v3891_v45 }
 0x530   : > { %v2294_v27 = vadd.f32 %v5252_v9, %v2150_v44 }
 0x531   : > { %v5335_v39 = vld [vmem:[#allocation2 + $0x20] sm:$0xff] }
 0x532   : > { %2311 = vst.msk [vmem:[#allocation2 + $0x18] sm:$0xff] %vm2307_vm8, %v2294_v27  ;;  %2366 = vrot.lane.b32.xlu2 %v5326_v62, %s3377_s29  ;;  %2638 = vrot.lane.b32.xlu1 %v5335_v39, %s3376_s19 }
 0x534   : > { %v2244_v31 = vpop.permute.xlu2 %2243 }
 0x535   : > { %v2291_v47 = vadd.f32 %v2244_v31, %v2147_v1  ;;  %v5343_v49 = vpop.permute.xlu1 %2660  ;;  %v487_v1 = vlaneseq }
 0x536   : > { %3039 = vmatpush.xpose.msk.msrb.mxu0 %vm2388_vm9, %v5343_v49  ;;  %3113 = vmatpush.xpose.msk.msra.mxu2 %vm2388_vm9, %v5343_v49 }
 0x537   : > { %2308 = vst.msk [vmem:[#allocation2] sm:$0xff] %vm2307_vm8, %v2291_v47  ;;  %v5612_v47 = vand.u32 127, %v487_v1 }
 0x539   : > { %v5350_v45 = vld [vmem:[#allocation2 + $0x18] sm:$0xff] }
 0x53a   : > { %2364 = vrot.lane.b32.xlu1 %v5335_v39, %s3377_s29  ;;  %2636 = vrot.lane.b32.xlu0 %v5350_v45, %s3376_s19 }
 0x53b   : > { %3040 = vmatpush.xpose.msk.msrb.mxu0 %vm2388_vm9, %v5310_v25  ;;  %3115 = vmatpush.xpose.msk.msra.mxu2 %vm2388_vm9, %v5310_v25 }
 0x53d   : > { %v2248_v9 = vpop.permute.xlu1 %2247 }
 0x53e   : > { %v2293_v13 = vadd.f32 %v2248_v9, %v2149_v14  ;;  %v5374_v59 = vld [vmem:[#allocation2] sm:$0xff] }
 0x540   : > { %2310 = vst.msk [vmem:[#allocation2 + $0x10] sm:$0xff] %vm2307_vm8, %v2293_v13 }
 0x542   : > { %2362 = vrot.lane.b32.xlu0 %v5350_v45, %s3377_s29 }
 0x545   : > { %v2021_v54 = vpop.permute.xlu1 %2020 }
 0x546   : > { %v2067_v12 = vsub.f32 %v1923_v30, %v2021_v54 }
 0x547   : > { %v5368_v19 = vld [vmem:[#allocation2 + $0x10] sm:$0xff] }
 0x548   : > { %2084 = vst.msk [vmem:[#allocation2 + $0x8] sm:$0xff] %vm2082_vm7, %v2067_v12  ;;  %2634 = vrot.lane.b32.xlu2 %v5368_v19, %s3376_s19 }
 0x549   : > { %2309 = vst.msk [vmem:[#allocation2 + $0x8] sm:$0xff] %vm2307_vm8, %v2292_v24 }
 0x54a   : > { %2630 = vrot.lane.b32.xlu0 %v5374_v59, %s3376_s19  ;;  %v5398_v15 = vpop.permute.xlu2 %2652 }
 0x54d   : > { %v5378_v57 = vpop.permute.xlu1 %2656 }
 0x54e   : > { %3041 = vmatpush.xpose.msk.msrb.mxu0 %vm2388_vm9, %v5378_v57  ;;  %3117 = vmatpush.xpose.msk.msra.mxu2 %vm2388_vm9, %v5378_v57 }
 0x550   : > { %2360 = vrot.lane.b32.xlu2 %v5368_v19, %s3377_s29  ;;  %v5386_v42 = vld [vmem:[#allocation2 + $0x8] sm:$0xff] }
 0x551   : > { %2632 = vrot.lane.b32.xlu1 %v5386_v42, %s3376_s19 }
 0x552   : > { %v5390_v50 = vpop.permute.xlu0 %2654  ;;  %2356 = vrot.lane.b32.xlu0 %v5374_v59, %s3377_s29  ;;  %v2379_v26 = vpop.permute.xlu2 %2378 }
 0x553   : > { %3042 = vmatpush.xpose.msk.msrb.mxu0 %vm2388_vm9, %v5390_v50  ;;  %3119 = vmatpush.xpose.msk.msra.mxu2 %vm2388_vm9, %v5390_v50 }
 0x555   : > { %v2385_v3 = vpop.permute.xlu1 %2384 }
 0x556   : > { %3008 = vmatpush.xpose.msk.msra.mxu1 %vm2388_vm9, %v2385_v3  ;;  %3098 = vmatpush.xpose.msk.msra.mxu3 %vm2388_vm9, %v2385_v3 }
 0x557   : > { %3043 = vmatpush.xpose.msk.msrb.mxu0 %vm2388_vm9, %v5398_v15  ;;  %3121 = vmatpush.xpose.msk.msra.mxu2 %vm2388_vm9, %v5398_v15 }
 0x558   : > { %2602 = vrot.lane.b32.xlu2 %v5368_v19, %s3378_s9 }
 0x559   : > { %2358 = vrot.lane.b32.xlu1 %v5386_v42, %s3377_s29  ;;  %s2858_s29 = sshll.u32 %s2855_s15, 4  ;;  %s2859_s29 = int_to_ptr.hbm [resolvable:$true] %s2858_s29 }
 0x55a   : > { %2608 = vrot.lane.b32.xlu0 %v5326_v62, %s3378_s9  ;;  %v2381_v48 = vpop.permute.xlu0 %2380  ;;  %s3286_s17 = sshra.s32 %s2859_s29, 4  ;;  %s3287_s17 = int_to_ptr.hbm [resolvable:$true] %s3286_s17 }
 0x55b   : > { %p3293_p4 = scmp.lt.s32.totalorder %s3287_s17, %s5849_s6 }
 0x55d   : > { %v2383_v22 = vpop.permute.xlu1 %2382 }
 0x55e   : > { %3009 = vmatpush.xpose.msk.msra.mxu1 %vm2388_vm9, %v2383_v22  ;;  %3099 = vmatpush.xpose.msk.msra.mxu3 %vm2388_vm9, %v2383_v22 }
 0x560   : > { %2606 = vrot.lane.b32.xlu2 %v5335_v39, %s3378_s9 }
 0x561   : > { %2604 = vrot.lane.b32.xlu1 %v5350_v45, %s3378_s9 }
 0x562   : > { %3010 = vmatpush.xpose.msk.msra.mxu1 %vm2388_vm9, %v2381_v48  ;;  %3100 = vmatpush.xpose.msk.msra.mxu3 %vm2388_vm9, %v2381_v48 }
 0x563   : > { %2614 = vrot.lane.b32.xlu0 %v5292_v33, %s3378_s9 }
 0x566   : > { %3011 = vmatpush.xpose.msk.msra.mxu1 %vm2388_vm9, %v2379_v26  ;;  %3101 = vmatpush.xpose.msk.msra.mxu3 %vm2388_vm9, %v2379_v26 }
 0x568   : > { %2612 = vrot.lane.b32.xlu2 %v5301_v21, %s3378_s9 }
 0x569   : > { %2610 = vrot.lane.b32.xlu1 %v5315_v53, %s3378_s9 }
 0x56b   : > { %2624 = vrot.lane.b32.xlu0 %v5220_v52, %s3378_s9 }
 0x56c   : > { %v5456_v56 = vpop.permute.xlu2 %2646 }
 0x570   : > { %2618 = vrot.lane.b32.xlu2 %v5266_v20, %s3378_s9 }
 0x571   : > { %2616 = vrot.lane.b32.xlu1 %v5280_v10, %s3378_s9 }
 0x572   : > { %v5434_v18 = vpop.permute.xlu1 %2650 }
 0x573   : > { %2598 = vrot.lane.b32.xlu0 %v5374_v59, %s3378_s9  ;;  %3044 = vmatpush.xpose.msk.msrb.mxu0 %vm2388_vm9, %v5434_v18 }
 0x574   : > { %3123 = vmatpush.xpose.msk.msra.mxu2 %vm2388_vm9, %v5434_v18  ;;  %v2373_v58 = vpop.permute.xlu2 %2372 }
 0x578   : > { %2626 = vrot.lane.b32.xlu2 %v5186_v6, %s3378_s9 }
 0x579   : > { %2620 = vrot.lane.b32.xlu1 %v5245_v43, %s3378_s9 }
 0x57a   : > { %v2377_v36 = vpop.permute.xlu1 %2376 }
 0x57b   : > { %2600 = vrot.lane.b32.xlu0 %v5386_v42, %s3378_s9  ;;  %3012 = vmatpush.xpose.msk.msra.mxu1 %vm2388_vm9, %v2377_v36 }
 0x57c   : > { %v5449_v23 = vpop.permute.xlu0 %2648  ;;  %3102 = vmatpush.xpose.msk.msra.mxu3 %vm2388_vm9, %v2377_v36 }
 0x57d   : > { %3045 = vmatpush.xpose.msk.msrb.mxu0 %vm2388_vm9, %v5449_v23  ;;  %3125 = vmatpush.xpose.msk.msra.mxu2 %vm2388_vm9, %v5449_v23 }
 0x580   : > { %2628 = vrot.lane.b32.xlu2 %v5188_v7, %s3378_s9 }
 0x581   : > { %3046 = vmatpush.xpose.msk.msrb.mxu0 %vm2388_vm9, %v5456_v56  ;;  %3127 = vmatpush.xpose.msk.msra.mxu2 %vm2388_vm9, %v5456_v56 }
 0x582   : > { %2622 = vrot.lane.b32.xlu1 %v5224_v17, %s3378_s9  ;;  %s3288_s9 = scalar_lea.hbm %s3287_s17, 256 }
 0x583   : > { %p3289_p0 = scmp.ne.s32.totalorder %s3287_s17, %s3288_s9 }
 0x584   : > { %v2375_v4 = vpop.permute.xlu0 %2374  ;;  %v5480_v16 = vpop.permute.xlu2 %2640 }
 0x585   : > { %3013 = vmatpush.xpose.msk.msra.mxu1 %vm2388_vm9, %v2375_v4  ;;  %3103 = vmatpush.xpose.msk.msra.mxu3 %vm2388_vm9, %v2375_v4  ;;  %p3290_p1 = pnand %p3289_p0, %p3467_p3 }
 0x587   : > { %p3291_p2 = pneg %p3290_p1 }
 0x589   : > { %3014 = vmatpush.xpose.msk.msra.mxu1 %vm2388_vm9, %v2373_v58  ;;  %3104 = vmatpush.xpose.msk.msra.mxu3 %vm2388_vm9, %v2373_v58 }
 0x58c   : > { %v5470_v28 = vpop.permute.xlu1 %2644  ;;  %v2367_v32 = vpop.permute.xlu2 %2366 }
 0x58d   : > { %3047 = vmatpush.xpose.msk.msrb.mxu0 %vm2388_vm9, %v5470_v28  ;;  %3129 = vmatpush.xpose.msk.msra.mxu2 %vm2388_vm9, %v5470_v28 }
 0x594   : > { %v5476_v55 = vpop.permute.xlu0 %2642  ;;  %v2371_v34 = vpop.permute.xlu1 %2370 }
 0x595   : > { %3015 = vmatpush.xpose.msk.msra.mxu1 %vm2388_vm9, %v2371_v34  ;;  %3105 = vmatpush.xpose.msk.msra.mxu3 %vm2388_vm9, %v2371_v34 }
 0x596   : > { %3048 = vmatpush.xpose.msk.msrb.mxu0 %vm2388_vm9, %v5476_v55  ;;  %3131 = vmatpush.xpose.msk.msra.mxu2 %vm2388_vm9, %v5476_v55 }
 0x59a   : > { %3049 = vmatpush.xpose.msk.msrb.mxu0 %vm2388_vm9, %v5480_v16  ;;  %3133 = vmatpush.xpose.msk.msra.mxu2 %vm2388_vm9, %v5480_v16 }
 0x59c   : > { %v2369_v35 = vpop.permute.xlu0 %2368 }
 0x59d   : > { %3016 = vmatpush.xpose.msk.msra.mxu1 %vm2388_vm9, %v2369_v35  ;;  %3106 = vmatpush.xpose.msk.msra.mxu3 %vm2388_vm9, %v2369_v35 }
 0x5a1   : > { %3017 = vmatpush.xpose.msk.msra.mxu1 %vm2388_vm9, %v2367_v32  ;;  %3107 = vmatpush.xpose.msk.msra.mxu3 %vm2388_vm9, %v2367_v32 }
 0x5a2   : > { %v5504_v29 = vpop.permute.xlu2 %2634 }
 0x5a4   : > { %v5494_v46 = vpop.permute.xlu1 %2638 }
 0x5a5   : > { %3050 = vmatpush.xpose.msk.msrb.mxu0 %vm2388_vm9, %v5494_v46  ;;  %3135 = vmatpush.xpose.msk.msra.mxu2 %vm2388_vm9, %v5494_v46 }
 0x5aa   : > { %v2361_v0 = vpop.permute.xlu2 %2360 }
 0x5ac   : > { %v5500_v5 = vpop.permute.xlu0 %2636  ;;  %v2365_v61 = vpop.permute.xlu1 %2364 }
 0x5ad   : > { %3018 = vmatpush.xpose.msk.msra.mxu1 %vm2388_vm9, %v2365_v61  ;;  %3108 = vmatpush.xpose.msk.msra.mxu3 %vm2388_vm9, %v2365_v61 }
 0x5ae   : > { %3051 = vmatpush.xpose.msk.msrb.mxu0 %vm2388_vm9, %v5500_v5  ;;  %3137 = vmatpush.xpose.msk.msra.mxu2 %vm2388_vm9, %v5500_v5 }
 0x5b2   : > { %3052 = vmatpush.xpose.msk.msrb.mxu0 %vm2388_vm9, %v5504_v29  ;;  %3139 = vmatpush.xpose.msk.msra.mxu2 %vm2388_vm9, %v5504_v29  ;;  %v2603_v51 = vpop.permute.xlu2 %2602 }
 0x5b4   : > { %v2363_v40 = vpop.permute.xlu0 %2362 }
 0x5b5   : > { %3019 = vmatpush.xpose.msk.msra.mxu1 %vm2388_vm9, %v2363_v40  ;;  %3109 = vmatpush.xpose.msk.msra.mxu3 %vm2388_vm9, %v2363_v40 }
 0x5b9   : > { %3020 = vmatpush.xpose.msk.msra.mxu1 %vm2388_vm9, %v2361_v0  ;;  %3110 = vmatpush.xpose.msk.msra.mxu3 %vm2388_vm9, %v2361_v0 }
 0x5ba   : > { %v2607_v44 = vpop.permute.xlu2 %2606 }
 0x5bc   : > { %v5518_v63 = vpop.permute.xlu0 %2630 }
 0x5c3   : > { %v2633_v11 = vpop.permute.xlu1 %2632 }
 0x5c4   : > { %3053 = vmatpush.xpose.msk.msrb.mxu0 %vm2388_vm9, %v2633_v11  ;;  %3141 = vmatpush.xpose.msk.msra.mxu2 %vm2388_vm9, %v2633_v11  ;;  %v2357_v8 = vpop.permute.xlu0 %2356 }
 0x5c8   : > { %3054 = vmatpush.xpose.msk.msrb.mxu0 %vm2388_vm9, %v5518_v63  ;;  %3143 = vmatpush.xpose.msk.msra.mxu2 %vm2388_vm9, %v5518_v63 }
 0x5cb   : > { %v2359_v2 = vpop.permute.xlu1 %2358  ;;  %3057 = vmatmul.msk.f32.vlgmr.msra.gmra.mxu2 %vm2388_vm9, %v2603_v51 }
 0x5cc   : > { %3021 = vmatpush.xpose.msk.msra.mxu1 %vm2388_vm9, %v2359_v2  ;;  %3111 = vmatpush.xpose.msk.msra.mxu3 %vm2388_vm9, %v2359_v2  ;;  %v2609_v38 = vpop.permute.xlu0 %2608 }
 0x5d0   : > { %3022 = vmatpush.xpose.msk.msra.mxu1 %vm2388_vm9, %v2357_v8  ;;  %3112 = vmatpush.xpose.msk.msra.mxu3 %vm2388_vm9, %v2357_v8 }
 0x5d3   : > { %v2605_v60 = vpop.permute.xlu1 %2604  ;;  %3023 = vmatmul.msk.f32.vlgmr.msra.gmra.mxu1 %vm2388_vm9, %v5374_v59  ;;  %3034 = vmatmul.msk.f32.vlgmr.msra.gmra.mxu3 %vm2388_vm9, %v5245_v43 }
 0x5d4   : > { %3114 = vmatpush.xpose.msk.msrb.mxu3 %vm2388_vm9, %v5343_v49  ;;  %3058 = vmatmul.msk.f32.gmra.mxu2 %vm2388_vm9, %v2605_v60 }
 0x5d5   : > { %v2615_v41 = vpop.permute.xlu0 %2614 }
 0x5d8   : > { %3116 = vmatpush.xpose.msk.msrb.mxu3 %vm2388_vm9, %v5310_v25  ;;  %v2613_v25 = vpop.permute.xlu2 %2612 }
 0x5db   : > { %3024 = vmatmul.msk.f32.gmra.mxu1 %vm2388_vm9, %v5386_v42  ;;  %3035 = vmatmul.msk.f32.gmra.mxu3 %vm2388_vm9, %v5224_v17  ;;  %v2611_v17 = vpop.permute.xlu1 %2610 }
 0x5dc   : > { %3118 = vmatpush.xpose.msk.msrb.mxu3 %vm2388_vm9, %v5378_v57  ;;  %3059 = vmatmul.msk.f32.gmra.mxu2 %vm2388_vm9, %v2607_v44 }
 0x5dd   : > { %v2625_v27 = vpop.permute.xlu0 %2624 }
 0x5e0   : > { %3120 = vmatpush.xpose.msk.msrb.mxu3 %vm2388_vm9, %v5390_v50 }
 0x5e3   : > { %3025 = vmatmul.msk.f32.gmra.mxu1 %vm2388_vm9, %v5368_v19  ;;  %3036 = vmatmul.msk.f32.gmra.mxu3 %vm2388_vm9, %v5220_v52 }
 0x5e4   : > { %3122 = vmatpush.xpose.msk.msrb.mxu3 %vm2388_vm9, %v5398_v15  ;;  %3060 = vmatmul.msk.f32.gmra.mxu2 %vm2388_vm9, %v2609_v38 }
 0x5e5   : > { %v2599_v43 = vpop.permute.xlu0 %2598 }
 0x5e6   : > { %3055 = vmatmul.msk.f32.vlgmr.msrb.gmra.mxu0 %vm2388_vm9, %v2599_v43 }
 0x5e8   : > { %3124 = vmatpush.xpose.msk.msrb.mxu3 %vm2388_vm9, %v5434_v18 }
 0x5eb   : > { %3026 = vmatmul.msk.f32.gmra.mxu1 %vm2388_vm9, %v5350_v45  ;;  %3037 = vmatmul.msk.f32.gmra.mxu3 %vm2388_vm9, %v5186_v6  ;;  %v2617_v6 = vpop.permute.xlu1 %2616 }
 0x5ec   : > { %3126 = vmatpush.xpose.msk.msrb.mxu3 %vm2388_vm9, %v5449_v23  ;;  %3061 = vmatmul.msk.f32.gmra.mxu2 %vm2388_vm9, %v2611_v17 }
 0x5ed   : > { %v2601_v52 = vpop.permute.xlu0 %2600 }
 0x5ee   : > { %3056 = vmatmul.msk.f32.gmra.mxu0 %vm2388_vm9, %v2601_v52 }
 0x5f0   : > { %3128 = vmatpush.xpose.msk.msrb.mxu3 %vm2388_vm9, %v5456_v56 }
 0x5f3   : > { %3027 = vmatmul.msk.f32.gmra.mxu1 %vm2388_vm9, %v5335_v39  ;;  %3038 = vmatmul.msk.f32.gmra.mxu3 %vm2388_vm9, %v5188_v7  ;;  %v2619_v7 = vpop.permute.xlu2 %2618 }
 0x5f4   : > { %3130 = vmatpush.xpose.msk.msrb.mxu3 %vm2388_vm9, %v5470_v28  ;;  %3062 = vmatmul.msk.f32.gmra.mxu2 %vm2388_vm9, %v2613_v25 }
 0x5f8   : > { %3132 = vmatpush.xpose.msk.msrb.mxu3 %vm2388_vm9, %v5476_v55 }
 0x5fb   : > { %3028 = vmatmul.msk.f32.gmra.mxu1 %vm2388_vm9, %v5326_v62  ;;  %v2627_v62 = vpop.permute.xlu2 %2626 }
 0x5fc   : > { %3134 = vmatpush.xpose.msk.msrb.mxu3 %vm2388_vm9, %v5480_v16  ;;  %3063 = vmatmul.msk.f32.gmra.mxu2 %vm2388_vm9, %v2615_v41 }
 0x600   : > { %3136 = vmatpush.xpose.msk.msrb.mxu3 %vm2388_vm9, %v5494_v46 }
 0x603   : > { %3029 = vmatmul.msk.f32.gmra.mxu1 %vm2388_vm9, %v5315_v53  ;;  %v2621_v53 = vpop.permute.xlu1 %2620 }
 0x604   : > { %3138 = vmatpush.xpose.msk.msrb.mxu3 %vm2388_vm9, %v5500_v5  ;;  %3064 = vmatmul.msk.f32.gmra.mxu2 %vm2388_vm9, %v2617_v6 }
 0x608   : > { %3140 = vmatpush.xpose.msk.msrb.mxu3 %vm2388_vm9, %v5504_v29 }
 0x60b   : > { %3030 = vmatmul.msk.f32.gmra.mxu1 %vm2388_vm9, %v5301_v21  ;;  %v2623_v39 = vpop.permute.xlu1 %2622  ;;  %v2629_v21 = vpop.permute.xlu2 %2628 }
 0x60c   : > { %3142 = vmatpush.xpose.msk.msrb.mxu3 %vm2388_vm9, %v2633_v11  ;;  %3065 = vmatmul.msk.f32.gmra.mxu2 %vm2388_vm9, %v2619_v7 }
 0x610   : > { %3144 = vmatpush.xpose.msk.msrb.mxu3 %vm2388_vm9, %v5518_v63 }
 0x613   : > { %3068 = vmatmul.msk.f32.vlgmr.msrb.gmra.mxu3 %vm2388_vm9, %v2625_v27  ;;  %3031 = vmatmul.msk.f32.gmra.mxu1 %vm2388_vm9, %v5292_v33  ;;  %v5609_v33 = vshrl.u32 %v487_v1, 7 }
 0x614   : > { %3066 = vmatmul.msk.f32.gmra.mxu2 %vm2388_vm9, %v2621_v53 }
 0x615   : > { %v490_v31 = vadd.s32 16, %v5609_v33  ;;  %vm506_vm11 = vcmp.gt.s32.totalorder %v5609_v33, %v5612_v47  ;;  %v499_v14 = vadd.s32 88, %v5609_v33  ;;  %v491_v13 = vadd.s32 24, %v5609_v33 }
 0x616   : > { %v489_v54 = vadd.s32 8, %v5609_v33  ;;  %v500_v3 = vadd.s32 96, %v5609_v33  ;;  %v492_v48 = vadd.s32 32, %v5609_v33  ;;  %v501_v5 = vadd.s32 104, %v5609_v33 }
 0x617   : > { %vm508_vm10 = vcmp.gt.s32.totalorder %v490_v31, %v5612_v47  ;;  %vm517_vm12 = vcmp.gt.s32.totalorder %v499_v14, %v5612_v47  ;;  %vm509_vm13 = vcmp.gt.s32.totalorder %v491_v13, %v5612_v47  ;;  %v493_v40 = vadd.s32 40, %v5609_v33 }
 0x618   : > { %vm507_vm14 = vcmp.gt.s32.totalorder %v489_v54, %v5612_v47  ;;  %vm518_vm15 = vcmp.gt.s32.totalorder %v500_v3, %v5612_v47  ;;  %vm510_vm0 = vcmp.gt.s32.totalorder %v492_v48, %v5612_v47  ;;  %vm519_vm1 = vcmp.gt.s32.totalorder %v501_v5, %v5612_v47 }
 0x619   : > { %vm511_vm2 = vcmp.gt.s32.totalorder %v493_v40, %v5612_v47  ;;  %v502_v52 = vadd.s32 112, %v5609_v33  ;;  %v494_v7 = vadd.s32 48, %v5609_v33 }
 0x61b   : > { %3069 = vmatmul.msk.f32.gmra.mxu3 %vm2388_vm9, %v2627_v62  ;;  %3032 = vmatmul.msk.f32.gmra.mxu1 %vm2388_vm9, %v5280_v10  ;;  %v5619_v10 = vld [vmem:[%s311_s14] ss:$0 sm:$0xff]  ;;  %s2970_s14 = sshll.u32 %s293_s12, 8  ;;  %vm520_vm3 = vcmp.gt.s32.totalorder %v502_v52, %v5612_v47  ;;  %vm512_vm4 = vcmp.gt.s32.totalorder %v494_v7, %v5612_v47  ;;  %v497_v52 = vadd.s32 72, %v5609_v33 }
 0x61c   : > { %3067 = vmatmul.msk.f32.gmra.mxu2 %vm2388_vm9, %v2623_v39  ;;  %v554_v49 = vsub.f32 1.0, %v5619_v10  ;;  %s5652_s20 = scalar_lea.vmem [#allocation3], %s2970_s14  ;;  %s3292_s14 = scalar_lea.hbm %s5849_s6, 1024 }
 0x61d   : > { %vm515_vm8 = vcmp.gt.s32.totalorder %v497_v52, %v5612_v47  ;;  %s2856_s19 = sshll.u32 %s5652_s20, 4  ;;  %p3294_p5 = scmp.lt.s32.totalorder %s3292_s14, %s3288_s9  ;;  %s2857_s19 = int_to_ptr.vmem [resolvable:$true] %s2856_s19 }
 0x61e   : > { %v5629_v30 = vmul.f32 2.5e+11, %v554_v49 }
 0x61f   : > { %p3295_p6 = por %p3294_p5, %p3293_p4 }
 0x621   : > { %p3296_p7 = pnand %p3295_p6, %p3291_p2 }
 0x623   : > { %3070 = vmatmul.msk.f32.gmra.mxu3 %vm2388_vm9, %v2629_v21  ;;  %3033 = vmatmul.msk.f32.gmra.mxu1 %vm2388_vm9, %v5266_v20  ;;  %v3379_v20 = vmov 0.0  }
 0x624   : > { %v2993_v45 = vsel %vm508_vm10, 1.0, %v3379_v20  ;;  %v2991_v9 = vsel %vm506_vm11, 1.0, %v3379_v20  ;;  %v3002_v59 = vsel %vm517_vm12, 1.0, %v3379_v20  ;;  %v2994_v50 = vsel %vm509_vm13, 1.0, %v3379_v20 }
 0x625   : > { %v558_v37 = vmul.f32 2.5e+11, %v2993_v45  ;;  %v556_v12 = vmul.f32 2.5e+11, %v2991_v9  ;;  %v2992_v22 = vsel %vm507_vm14, 1.0, %v3379_v20  ;;  %v3003_v34 = vsel %vm518_vm15, 1.0, %v3379_v20 }
 0x626   : > { %v567_v36 = vmul.f32 2.5e+11, %v3002_v59  ;;  %v559_v23 = vmul.f32 2.5e+11, %v2994_v50  ;;  %v557_v4 = vmul.f32 2.5e+11, %v2992_v22 }
 0x627   : > { %v5638_v24 = vadd.f32 %v558_v37, %v5629_v30  ;;  %v5644_v42 = vadd.f32 %v556_v12, %v5629_v30  ;;  %v2995_v46 = vsel %vm510_vm0, 1.0, %v3379_v20  ;;  %v568_v11 = vmul.f32 2.5e+11, %v3003_v34 }
 0x628   : > { %v5660_v58 = vadd.f32 %v567_v36, %v5629_v30  ;;  %v5663_v55 = vadd.f32 %v559_v23, %v5629_v30  ;;  %v5668_v32 = vadd.f32 %v557_v4, %v5629_v30  ;;  %v560_v51 = vmul.f32 2.5e+11, %v2995_v46 }
 0x629   : > { %v5684_v38 = vadd.f32 %v568_v11, %v5629_v30  ;;  %v3004_v44 = vsel %vm519_vm1, 1.0, %v3379_v20  ;;  %v2996_v17 = vsel %vm511_vm2, 1.0, %v3379_v20  ;;  %v3005_v54 = vsel %vm520_vm3, 1.0, %v3379_v20 }
 0x62a   : > { %v5687_v41 = vadd.f32 %v560_v51, %v5629_v30  ;;  %v569_v39 = vmul.f32 2.5e+11, %v3004_v44  ;;  %v561_v1 = vmul.f32 2.5e+11, %v2996_v17  ;;  %v503_v59 = vadd.s32 120, %v5609_v33 }
 0x62b   : > { %v570_v22 = vmul.f32 2.5e+11, %v3005_v54 }
 0x62c   : > { %v5706_v14 = vadd.f32 %v569_v39, %v5629_v30  ;;  %v577_v37 = vadd.f32 %v561_v1, %v5629_v30  ;;  %vm521_vm5 = vcmp.gt.s32.totalorder %v503_v59, %v5612_v47  ;;  %v3000_v1 = vsel %vm515_vm8, 1.0, %v3379_v20 }
 0x64e   : > { %v2749_v19 = vpop.f32.mrf.mxu2 }
 0x64f   : > { %v2793_v57 = vmul.f32 %v5619_v10, %v2749_v19  ;;  %v2997_v19 = vsel %vm512_vm4, 1.0, %v3379_v20 }
 0x650   : > { %v2470_v15 = vpop.f32.mrf.mxu1 }
 0x651   : > { %v2809_v26 = vsub.f32 %v2793_v57, %v5638_v24  ;;  %v2518_v18 = vmul.f32 %v5619_v10, %v2470_v15 }
 0x653   : > { %3073 = vst [vmem:[%s5652_s20 + $0x90] sm:$0xff] %v2809_v26  ;;  %v2534_v56 = vsub.f32 %v2518_v18, %v5644_v42  ;;  %v562_v26 = vmul.f32 2.5e+11, %v2997_v19 }
 0x655   : > { %2550 = vst [vmem:[%s5652_s20] sm:$0xff] %v2534_v56  ;;  %v5727_v56 = vadd.f32 %v570_v22, %v5629_v30  ;;  %v578_v34 = vadd.f32 %v562_v26, %v5629_v30 }
 0x656   : > { %v2503_v28 = vpop.f32.mrf.mxu3 }
 0x657   : > { %v2529_v16 = vmul.f32 %v5619_v10, %v2503_v28  ;;  %v2752_v35 = vpop.f32.mrf.mxu2 }
 0x658   : > { %v2794_v61 = vmul.f32 %v5619_v10, %v2752_v35  ;;  %v2473_v29 = vpop.f32.mrf.mxu1 }
 0x659   : > { %v2545_v0 = vsub.f32 %v2529_v16, %v5660_v58  ;;  %v2519_v63 = vmul.f32 %v5619_v10, %v2473_v29  ;;  %v496_v29 = vadd.s32 64, %v5609_v33 }
 0x65a   : > { %v2810_v8 = vsub.f32 %v2794_v61, %v5663_v55 }
 0x65b   : > { %2561 = vst [vmem:[%s5652_s20 + $0x58] sm:$0xff] %v2545_v0  ;;  %v2535_v2 = vsub.f32 %v2519_v63, %v5668_v32  ;;  %vm514_vm7 = vcmp.gt.s32.totalorder %v496_v29, %v5612_v47 }
 0x65c   : > { %3074 = vst [vmem:[%s5652_s20 + $0x98] sm:$0xff] %v2810_v8 }
 0x65d   : > { %2551 = vst [vmem:[%s5652_s20 + $0x8] sm:$0xff] %v2535_v2 }
 0x65e   : > { %v2506_v60 = vpop.f32.mrf.mxu3 }
 0x65f   : > { %v2530_v27 = vmul.f32 %v5619_v10, %v2506_v60  ;;  %v2755_v43 = vpop.f32.mrf.mxu2 }
 0x660   : > { %v2795_v25 = vmul.f32 %v5619_v10, %v2755_v43  ;;  %v2476_v6 = vpop.f32.mrf.mxu1  ;;  %v2999_v43 = vsel %vm514_vm7, 1.0, %v3379_v20 }
 0x661   : > { %v2546_v53 = vsub.f32 %v2530_v27, %v5684_v38  ;;  %v2520_v62 = vmul.f32 %v5619_v10, %v2476_v6 }
 0x662   : > { %v2811_v21 = vsub.f32 %v2795_v25, %v5687_v41 }
 0x663   : > { %2562 = vst [vmem:[%s5652_s20 + $0x60] sm:$0xff] %v2546_v53  ;;  %v2536_v31 = vsub.f32 %v2520_v62, %v5638_v24  ;;  %v2743_v49 = vpop.f32.mrf.mxu0  ;;  %v564_v53 = vmul.f32 2.5e+11, %v2999_v43 }
 0x664   : > { %3075 = vst [vmem:[%s5652_s20 + $0xa0] sm:$0xff] %v2811_v21  ;;  %v2791_v45 = vmul.f32 %v5619_v10, %v2743_v49 }
 0x665   : > { %2552 = vst [vmem:[%s5652_s20 + $0x10] sm:$0xff] %v2536_v31  ;;  %v580_v39 = vadd.f32 %v564_v53, %v5629_v30 }
 0x666   : > { %v2807_v9 = vsub.f32 %v2791_v45, %v5644_v42  ;;  %v2509_v13 = vpop.f32.mrf.mxu3  ;;  %v495_v42 = vadd.s32 56, %v5609_v33  ;;  %v498_v45 = vadd.s32 80, %v5609_v33 }
 0x667   : > { %v2531_v12 = vmul.f32 %v5619_v10, %v2509_v13  ;;  %v2758_v24 = vpop.f32.mrf.mxu2 }
 0x668   : > { %3071 = vst [vmem:[%s5652_s20 + $0x80] sm:$0xff] %v2807_v9  ;;  %v2796_v57 = vmul.f32 %v5619_v10, %v2758_v24  ;;  %v2479_v50 = vpop.f32.mrf.mxu1  ;;  %vm513_vm6 = vcmp.gt.s32.totalorder %v495_v42, %v5612_v47  ;;  %vm516_vm9 = vcmp.gt.s32.totalorder %v498_v45, %v5612_v47 }
 0x669   : > { %v2547_v3 = vsub.f32 %v2531_v12, %v5706_v14  ;;  %v2521_v15 = vmul.f32 %v5619_v10, %v2479_v50  ;;  %v2998_v46 = vsel %vm513_vm6, 1.0, %v3379_v20  ;;  %v3001_v19 = vsel %vm516_vm9, 1.0, %v3379_v20 }
 0x66a   : > { %v2812_v48 = vsub.f32 %v2796_v57, %v577_v37  ;;  %v563_v11 = vmul.f32 2.5e+11, %v2998_v46  ;;  %v566_v42 = vmul.f32 2.5e+11, %v3001_v19 }
 0x66b   : > { %2563 = vst [vmem:[%s5652_s20 + $0x68] sm:$0xff] %v2547_v3  ;;  %v2537_v18 = vsub.f32 %v2521_v15, %v5663_v55  ;;  %v2746_v36 = vpop.f32.mrf.mxu0  ;;  %v3006_v55 = vsel %vm521_vm5, 1.0, %v3379_v20 }
 0x66c   : > { %3076 = vst [vmem:[%s5652_s20 + $0xa8] sm:$0xff] %v2812_v48  ;;  %v2792_v23 = vmul.f32 %v5619_v10, %v2746_v36  ;;  %v571_v0 = vmul.f32 2.5e+11, %v3006_v55  ;;  %v579_v60 = vadd.f32 %v563_v11, %v5629_v30  ;;  %v582_v47 = vadd.f32 %v566_v42, %v5629_v30 }
 0x66d   : > { %2553 = vst [vmem:[%s5652_s20 + $0x18] sm:$0xff] %v2537_v18 }
 0x66e   : > { %v2808_v4 = vsub.f32 %v2792_v23, %v5668_v32  ;;  %v2512_v28 = vpop.f32.mrf.mxu3  ;;  %v5745_v51 = vadd.f32 %v571_v0, %v5629_v30 }
 0x66f   : > { %v2532_v16 = vmul.f32 %v5619_v10, %v2512_v28  ;;  %v2761_v35 = vpop.f32.mrf.mxu2 }
 0x670   : > { %3072 = vst [vmem:[%s5652_s20 + $0x88] sm:$0xff] %v2808_v4  ;;  %v2797_v5 = vmul.f32 %v5619_v10, %v2761_v35  ;;  %v2482_v61 = vpop.f32.mrf.mxu1 }
 0x671   : > { %v2548_v32 = vsub.f32 %v2532_v16, %v5727_v56  ;;  %v2522_v40 = vmul.f32 %v5619_v10, %v2482_v61 }
 0x672   : > { %v2813_v63 = vsub.f32 %v2797_v5, %v578_v34 }
 0x673   : > { %2564 = vst [vmem:[%s5652_s20 + $0x70] sm:$0xff] %v2548_v32  ;;  %v2538_v8 = vsub.f32 %v2522_v40, %v5687_v41 }
 0x674   : > { %3077 = vst [vmem:[%s5652_s20 + $0xb0] sm:$0xff] %v2813_v63 }
 0x675   : > { %2554 = vst [vmem:[%s5652_s20 + $0x20] sm:$0xff] %v2538_v8 }
 0x676   : > { %v2515_v2 = vpop.f32.mrf.mxu3 }
 0x677   : > { %v2533_v44 = vmul.f32 %v5619_v10, %v2515_v2  ;;  %v2764_v27 = vpop.f32.mrf.mxu2 }
 0x678   : > { %v2798_v41 = vmul.f32 %v5619_v10, %v2764_v27  ;;  %v2485_v17 = vpop.f32.mrf.mxu1 }
 0x679   : > { %v2549_v25 = vsub.f32 %v2533_v44, %v5745_v51  ;;  %v2523_v6 = vmul.f32 %v5619_v10, %v2485_v17 }
 0x67a   : > { %v2814_v7 = vsub.f32 %v2798_v41, %v579_v60 }
 0x67b   : > { %2565 = vst [vmem:[%s5652_s20 + $0x78] sm:$0xff] %v2549_v25  ;;  %v2539_v62 = vsub.f32 %v2523_v6, %v577_v37  ;;  %v565_v37 = vmul.f32 2.5e+11, %v3000_v1 }
 0x67c   : > { %3078 = vst [vmem:[%s5652_s20 + $0xb8] sm:$0xff] %v2814_v7 }
 0x67d   : > { %2555 = vst [vmem:[%s5652_s20 + $0x28] sm:$0xff] %v2539_v62  ;;  %v581_v12 = vadd.f32 %v565_v37, %v5629_v30 }
 0x67f   : > { %v2767_v21 = vpop.f32.mrf.mxu2 }
 0x680   : > { %v2799_v31 = vmul.f32 %v5619_v10, %v2767_v21  ;;  %v2488_v49 = vpop.f32.mrf.mxu1 }
 0x681   : > { %v2524_v9 = vmul.f32 %v5619_v10, %v2488_v49 }
 0x682   : > { %v2815_v13 = vsub.f32 %v2799_v31, %v580_v39 }
 0x683   : > { %v2540_v54 = vsub.f32 %v2524_v9, %v578_v34 }
 0x684   : > { %3079 = vst [vmem:[%s5652_s20 + $0xc0] sm:$0xff] %v2815_v13 }
 0x685   : > { %2556 = vst [vmem:[%s5652_s20 + $0x30] sm:$0xff] %v2540_v54 }
 0x687   : > { %v2770_v24 = vpop.f32.mrf.mxu2 }
 0x688   : > { %v2800_v59 = vmul.f32 %v5619_v10, %v2770_v24  ;;  %v2491_v33 = vpop.f32.mrf.mxu1 }
 0x689   : > { %v2525_v57 = vmul.f32 %v5619_v10, %v2491_v33 }
 0x68a   : > { %v2816_v50 = vsub.f32 %v2800_v59, %v581_v12 }
 0x68b   : > { %v2541_v3 = vsub.f32 %v2525_v57, %v579_v60 }
 0x68c   : > { %3080 = vst [vmem:[%s5652_s20 + $0xc8] sm:$0xff] %v2816_v50 }
 0x68d   : > { %2557 = vst [vmem:[%s5652_s20 + $0x38] sm:$0xff] %v2541_v3 }
 0x68f   : > { %v2773_v15 = vpop.f32.mrf.mxu2 }
 0x690   : > { %v2801_v20 = vmul.f32 %v5619_v10, %v2773_v15  ;;  %v2494_v22 = vpop.f32.mrf.mxu1 }
 0x691   : > { %v2526_v48 = vmul.f32 %v5619_v10, %v2494_v22 }
 0x692   : > { %v2817_v26 = vsub.f32 %v2801_v20, %v582_v47 }
 0x693   : > { %v2542_v18 = vsub.f32 %v2526_v48, %v580_v39 }
 0x694   : > { %3081 = vst [vmem:[%s5652_s20 + $0xd0] sm:$0xff] %v2817_v26 }
 0x695   : > { %2558 = vst [vmem:[%s5652_s20 + $0x40] sm:$0xff] %v2542_v18 }
 0x696   : > { %v2782_v36 = vpop.f32.mrf.mxu3 }
 0x697   : > { %v2804_v23 = vmul.f32 %v5619_v10, %v2782_v36  ;;  %v2776_v28 = vpop.f32.mrf.mxu2 }
 0x698   : > { %v2802_v30 = vmul.f32 %v5619_v10, %v2776_v28  ;;  %v2497_v34 = vpop.f32.mrf.mxu1 }
 0x699   : > { %v2820_v4 = vsub.f32 %v2804_v23, %v5706_v14  ;;  %v2527_v55 = vmul.f32 %v5619_v10, %v2497_v34 }
 0x69a   : > { %v2818_v16 = vsub.f32 %v2802_v30, %v5660_v58 }
 0x69b   : > { %3084 = vst [vmem:[%s5652_s20 + $0xe8] sm:$0xff] %v2820_v4  ;;  %v2543_v35 = vsub.f32 %v2527_v55, %v581_v12 }
 0x69c   : > { %3082 = vst [vmem:[%s5652_s20 + $0xd8] sm:$0xff] %v2818_v16 }
 0x69d   : > { %2559 = vst [vmem:[%s5652_s20 + $0x48] sm:$0xff] %v2543_v35 }
 0x69e   : > { %v2785_v46 = vpop.f32.mrf.mxu3 }
 0x69f   : > { %v2805_v14 = vmul.f32 %v5619_v10, %v2785_v46  ;;  %v2779_v61 = vpop.f32.mrf.mxu2 }
 0x6a0   : > { %v2803_v29 = vmul.f32 %v5619_v10, %v2779_v61  ;;  %v2500_v58 = vpop.f32.mrf.mxu1 }
 0x6a1   : > { %v2821_v5 = vsub.f32 %v2805_v14, %v5727_v56  ;;  %v2528_v32 = vmul.f32 %v5619_v10, %v2500_v58 }
 0x6a2   : > { %v2819_v40 = vsub.f32 %v2803_v29, %v5684_v38 }
 0x6a3   : > { %3085 = vst [vmem:[%s5652_s20 + $0xf0] sm:$0xff] %v2821_v5  ;;  %v2544_v0 = vsub.f32 %v2528_v32, %v582_v47 }
 0x6a4   : > { %3083 = vst [vmem:[%s5652_s20 + $0xe0] sm:$0xff] %v2819_v40 }
 0x6a5   : > { %2560 = vst [vmem:[%s5652_s20 + $0x50] sm:$0xff] %v2544_v0 }
 0x6a6   : > { %v2788_v63 = vpop.f32.mrf.mxu3 }
 0x6a7   : > { %v2806_v56 = vmul.f32 %v5619_v10, %v2788_v63 }
 0x6a9   : > { %v2822_v11 = vsub.f32 %v2806_v56, %v5745_v51 }
 0x6ab   : > { %3086 = vst [vmem:[%s5652_s20 + $0xf8] sm:$0xff] %v2822_v11 }
 0x6ac   : > { %3299 = shalt.err (!%p3296_p7)
}
 0x6ad   : > { %s3380_s12 = smov 128  }
 0x6ae   : > { %3145 = dma.vmem_to_hbm [thread:$0]  (%p3467_p3), %s2857_s19, 4096, %s2859_s29, %s2841_s16, %s3380_s12, %s3380_s12, %s5911_s30  }
 0x6af PF: > { %p3151_p9 = scmp.ge.s32.totalorder %s3366_s28, 2  ;;  %s2873_s20 = sand.u32 1, %s3338_s21  }
 0x6b0   : > { %s2874_s8 = scalar_lea.sflag [#allocation4], %s2873_s20 }
 0x6b1   : > { %p3148_p10 = pnand %p3151_p9, %p3476_p8 }
 0x6b3   : > { %p3149_p11 = pneg %p3148_p10 }
 0x6b5   : > { %3333 = dma.done.wait (%p3149_p11), %s2874_s8, 4096  }
 0x6b6   : > { %3335 = vsyncadd (%p3149_p11), %s2874_s8, 4294963200  ;;  %s19_s28 = sadd.s32 1, %s3366_s28   ;;  %s6018_s10 = sld [smem:[#allocation10_spill]] }
 0x6b7   : > { %p16_p12 = scmp.ge.s32.totalorder %s19_s28, 6   ;;  %s6019_s24 = sld [smem:[#allocation6_spill]] }
 0x6b8   : > { %s6020_s25 = sld [smem:[#allocation7_spill]]  ;;  %s6023_s21 = smov %s3342_s22 }
 0x6b9   : > { %s6021_s26 = sld [smem:[#allocation8_spill]]  ;;  %s6024_s22 = smov %s3346_s23 }
 0x6ba   : > { %s6022_s27 = sld [smem:[#allocation9_spill]]  ;;  %18 = sbr.rel (!%p16_p12) target bundleno = 5 (0x5), region = 89 }
 0x6bc   : > { %s6025_s23 = smov %s6018_s10 }
 0x6bf   :  { %2880 = vsyncpa [#allocation4], 1 }
 0x6c0   :  { %2882 = vsyncpa [#allocation4 + $0x1], 1 }

</bundles_post_ra>
